<compile_context>
chip_gen: v7x
topology: tpu7x:2x2x1
jax: 0.10.0
libtpu: 0.0.40
codegen_flags: <defaults>
</compile_context>

<pallas_src>
import math
import functools

import jax
import jax.numpy as jnp
from jax.experimental import pallas as pl
from jax.experimental.pallas import tpu as pltpu

LN_EPS = 1e-5


# ---------------------------------------------------------------------------
# Fused Pallas kernel: the whole TwoWayAttentionBlock forward, one batch
# element per grid step.
# ---------------------------------------------------------------------------
def _two_way_block_kernel(
        # activations (one batch element per grid step)
        q_ref, k_ref, qpe_ref, kpe_ref,
        # self-attention (packed [3,E,D] / [3,1,D], wo [H,hd,E], bo [1,E])
        sa_wqkv_ref, sa_bqkv_ref, sa_wo_ref, sa_bo_ref,
        # cross attention token -> image
        t2i_wqkv_ref, t2i_bqkv_ref, t2i_wo_ref, t2i_bo_ref,
        # MLP
        mlp_w1_ref, mlp_b1_ref, mlp_w2_ref, mlp_b2_ref,
        # cross attention image -> token
        i2t_wqkv_ref, i2t_bqkv_ref, i2t_wo_ref, i2t_bo_ref,
        # packed LayerNorm gamma/beta: [4, E] each (norm1..norm4)
        ln_w_ref, ln_b_ref,
        # outputs
        q_out_ref, k_out_ref,
        *, num_heads, skip_first_layer_pe, compute_dtype):
    cd = compute_dtype
    H = num_heads

    queries = q_ref[0]                      # [Ns, E] f32
    keys = k_ref[0]                         # [Nd, E] f32
    qpe = qpe_ref[0]
    kpe = kpe_ref[0]
    ln_w = ln_w_ref[...]                    # [4, E] f32
    ln_b = ln_b_ref[...]

    def layer_norm(x, idx):
        mean = jnp.mean(x, axis=-1, keepdims=True)
        var = jnp.mean((x - mean) ** 2, axis=-1, keepdims=True)
        xn = (x - mean) * jax.lax.rsqrt(var + LN_EPS)
        return xn * ln_w[idx:idx + 1, :] + ln_b[idx:idx + 1, :]

    def attention(q_tok, k_tok, v_tok, wqkv_ref, bqkv_ref, wo_ref, bo_ref,
                  transpose_scores):
        """Multi-head attention for one batch element.

        q_tok: [nq, E]; k_tok / v_tok: [nk, E] (all f32).  Returns [nq, E]
        in f32.  Weight refs are pre-cast to `compute_dtype` in the wrapper;
        every matmul accumulates in f32.
        """
        nq = q_tok.shape[0]
        nk = k_tok.shape[0]
        D = wqkv_ref.shape[2]
        hd = D // H
        scale = 1.0 / math.sqrt(hd)

        # Full-width projections (contraction depth E); packed-weight
        # selection is a free major-axis index (no lane slicing).
        qp = jnp.dot(q_tok.astype(cd), wqkv_ref[0],
                     preferred_element_type=jnp.float32) + bqkv_ref[0]
        kp = jnp.dot(k_tok.astype(cd), wqkv_ref[1],
                     preferred_element_type=jnp.float32) + bqkv_ref[1]
        vp = jnp.dot(v_tok.astype(cd), wqkv_ref[2],
                     preferred_element_type=jnp.float32) + bqkv_ref[2]

        # Head split: one reshape + one einshape relayout per tensor
        # (replaces the H stacked lane-slice copies of the old version).
        def to_heads(x, n):
            return pltpu.einshape("nhd->hnd", x.reshape(n, H, hd)).astype(cd)

        qh = to_heads(qp, nq)               # [H, nq, hd]
        kh = to_heads(kp, nk)               # [H, nk, hd]
        vh = to_heads(vp, nk)               # [H, nk, hd]

        if transpose_scores:
            # Few keys / many queries (image -> token): keep the long query
            # axis on lanes and do the softmax reduction over sublanes, so
            # exp / max / sum all run lane-dense.
            st = jax.lax.dot_general(
                kh, qh, (((2,), (2,)), ((0,), (0,))),
                preferred_element_type=jnp.float32) * scale    # [H, nk, nq]
            m = jnp.max(st, axis=1, keepdims=True)
            e = jnp.exp(st - m)
            z = jnp.sum(e, axis=1, keepdims=True)
            # TODO(synk): at real SAM sizes, also keep the PV matmul and the
            # [H, Nd, hd] intermediate lane-dense (Nd on lanes) instead of
            # transposing p back here.
            p = jnp.swapaxes(e / z, 1, 2).astype(cd)           # [H, nq, nk]
        else:
            s = jax.lax.dot_general(
                qh, kh, (((2,), (2,)), ((0,), (0,))),
                preferred_element_type=jnp.float32) * scale    # [H, nq, nk]
            m = jnp.max(s, axis=-1, keepdims=True)
            e = jnp.exp(s - m)
            z = jnp.sum(e, axis=-1, keepdims=True)
            p = (e / z).astype(cd)                             # [H, nq, nk]

        o = jax.lax.dot_general(
            p, vh, (((2,), (1,)), ((0,), (0,))),
            preferred_element_type=jnp.float32)                # [H, nq, hd]

        # Head recombine + output projection: one head-batched matmul plus a
        # cross-head reduce (no per-head Python loop, no lane concatenate).
        out_h = jax.lax.dot_general(
            o.astype(cd), wo_ref[...], (((2,), (1,)), ((0,), (0,))),
            preferred_element_type=jnp.float32)                # [H, nq, E]
        return jnp.sum(out_h, axis=0) + bo_ref[...]            # [nq, E]

    # (1) self-attention on sparse tokens.
    if skip_first_layer_pe:
        queries = attention(queries, queries, queries,
                            sa_wqkv_ref, sa_bqkv_ref, sa_wo_ref, sa_bo_ref,
                            False)
    else:
        q_in = queries + qpe
        queries = queries + attention(q_in, q_in, queries,
                                      sa_wqkv_ref, sa_bqkv_ref,
                                      sa_wo_ref, sa_bo_ref, False)
    queries = layer_norm(queries, 0)

    # (2) cross attention, tokens -> image.
    q_in = queries + qpe
    k_in = keys + kpe
    queries = queries + attention(q_in, k_in, keys,
                                  t2i_wqkv_ref, t2i_bqkv_ref,
                                  t2i_wo_ref, t2i_bo_ref, False)
    queries = layer_norm(queries, 1)

    # (3) MLP on sparse tokens (ReLU kept in f32).
    h = jnp.dot(queries.astype(cd), mlp_w1_ref[...],
                preferred_element_type=jnp.float32) + mlp_b1_ref[...]
    h = jnp.maximum(h, 0.0)
    mlp_out = jnp.dot(h.astype(cd), mlp_w2_ref[...],
                      preferred_element_type=jnp.float32) + mlp_b2_ref[...]
    queries = layer_norm(queries + mlp_out, 2)

    # (4) cross attention, image -> tokens (lane-dense transposed scores).
    q_in = queries + qpe
    k_in = keys + kpe
    keys = keys + attention(k_in, q_in, queries,
                            i2t_wqkv_ref, i2t_bqkv_ref, i2t_wo_ref, i2t_bo_ref,
                            True)
    keys = layer_norm(keys, 3)

    q_out_ref[0] = queries
    k_out_ref[0] = keys


# ---------------------------------------------------------------------------
# Wrapper: one pallas_call, grid over the batch (parallel on megacore chips).
# ---------------------------------------------------------------------------
def two_way_attention_block(params, queries, keys, query_pe, key_pe,
                            num_heads, skip_first_layer_pe=False,
                            compute_dtype=jnp.bfloat16):
    B, Ns, E = queries.shape
    Nd = keys.shape[1]
    cd = compute_dtype

    # Keep the token axes sublane-aligned so in-kernel reshapes stay
    # layout-preserving.
    # TODO(synk): pad Ns/Nd to multiples of 8 (with key-side masking in the
    # image->token softmax) instead of asserting, for arbitrary token counts.
    assert Ns % 8 == 0 and Nd % 8 == 0, "token counts must be multiples of 8"

    def prep_attn(p):
        D = p['wqkv'].shape[2]
        hd = D // num_heads
        return (p['wqkv'].astype(cd),                          # [3, E, D]
                p['bqkv'],                                     # [3, 1, D] f32
                p['wo'].reshape(num_heads, hd, E).astype(cd),  # [H, hd, E]
                p['bo'])                                       # [1, E]  f32

    weights = (
        *prep_attn(params['self_attn']),
        *prep_attn(params['cross_t2i']),
        params['mlp']['w1'].astype(cd), params['mlp']['b1'],
        params['mlp']['w2'].astype(cd), params['mlp']['b2'],
        *prep_attn(params['cross_i2t']),
        params['ln_w'], params['ln_b'],
    )

    def act_spec(n):
        return pl.BlockSpec((1, n, E), lambda b: (b, 0, 0))

    def weight_spec(x):
        ndim = x.ndim
        return pl.BlockSpec(x.shape, lambda b: (0,) * ndim)

    kernel = functools.partial(
        _two_way_block_kernel,
        num_heads=num_heads,
        skip_first_layer_pe=skip_first_layer_pe,
        compute_dtype=compute_dtype)

    # TODO(synk): at real SAM sizes (Nd~4096, E=256, mlp_dim=2048) add an Nd
    # tile axis (flash-style online softmax for the token->image reduction and
    # an init/finalize epilogue on the image->token side) so the dense side
    # streams through VMEM instead of being fully resident.
    out_q, out_k = pl.pallas_call(
        kernel,
        out_shape=(jax.ShapeDtypeStruct((B, Ns, E), jnp.float32),
                   jax.ShapeDtypeStruct((B, Nd, E), jnp.float32)),
        grid=(B,),
        in_specs=[act_spec(Ns), act_spec(Nd), act_spec(Ns), act_spec(Nd)]
                + [weight_spec(w) for w in weights],
        out_specs=(act_spec(Ns), act_spec(Nd)),
        compiler_params=pltpu.CompilerParams(
            dimension_semantics=("parallel",),
            vmem_limit_bytes=32 * 1024 * 1024),
    )(queries, keys, query_pe, key_pe, *weights)
    return out_q, out_k


# ---------------------------------------------------------------------------
# Deterministic parameter init (synthetic, packed layout).
# ---------------------------------------------------------------------------
def _init_linear(key, din, dout, scale=0.05):
    kw, kb = jax.random.split(key)
    w = scale * jax.random.normal(kw, (din, dout), jnp.float32)
    b = scale * jax.random.normal(kb, (1, dout), jnp.float32)
    return w, b


def _init_attention(key, embedding_dim, internal_dim):
    ks = jax.random.split(key, 4)
    wq, bq = _init_linear(ks[0], embedding_dim, internal_dim)
    wk, bk = _init_linear(ks[1], embedding_dim, internal_dim)
    wv, bv = _init_linear(ks[2], embedding_dim, internal_dim)
    wo, bo = _init_linear(ks[3], internal_dim, embedding_dim)
    return dict(wqkv=jnp.stack([wq, wk, wv], axis=0),   # [3, E, D]
                bqkv=jnp.stack([bq, bk, bv], axis=0),   # [3, 1, D]
                wo=wo, bo=bo)


def init_params(key, embedding_dim, mlp_dim, attention_downsample_rate):
    ks = jax.random.split(key, 9)
    internal_cross = embedding_dim // attention_downsample_rate
    w1, b1 = _init_linear(ks[3], embedding_dim, mlp_dim)
    w2, b2 = _init_linear(ks[4], mlp_dim, embedding_dim)
    ln_w_rows, ln_b_rows = [], []
    for i in range(4):
        kw, kb = jax.random.split(ks[5 + i])
        ln_w_rows.append(1.0 + 0.05 * jax.random.normal(
            kw, (embedding_dim,), jnp.float32))
        ln_b_rows.append(0.05 * jax.random.normal(
            kb, (embedding_dim,), jnp.float32))
    return {
        'self_attn': _init_attention(ks[0], embedding_dim, embedding_dim),
        'cross_t2i': _init_attention(ks[1], embedding_dim, internal_cross),
        'cross_i2t': _init_attention(ks[2], embedding_dim, internal_cross),
        'mlp': dict(w1=w1, b1=b1, w2=w2, b2=b2),
        'ln_w': jnp.stack(ln_w_rows),   # [4, E]
        'ln_b': jnp.stack(ln_b_rows),   # [4, E]
    }


# ---------------------------------------------------------------------------
# Pure-JAX reference (for correctness check only)
# ---------------------------------------------------------------------------
def _attention_ref(q, k, v, p, num_heads):
    qp = q @ p['wqkv'][0] + p['bqkv'][0]
    kp = k @ p['wqkv'][1] + p['bqkv'][1]
    vp = v @ p['wqkv'][2] + p['bqkv'][2]
    B, Nq, D = qp.shape
    Nk = kp.shape[1]
    hd = D // num_heads
    qh = qp.reshape(B, Nq, num_heads, hd).transpose(0, 2, 1, 3)
    kh = kp.reshape(B, Nk, num_heads, hd).transpose(0, 2, 1, 3)
    vh = vp.reshape(B, Nk, num_heads, hd).transpose(0, 2, 1, 3)
    attn = jnp.einsum('bhqd,bhkd->bhqk', qh, kh) / math.sqrt(hd)
    attn = jax.nn.softmax(attn, axis=-1)
    oh = jnp.einsum('bhqk,bhkd->bhqd', attn, vh)
    o = oh.transpose(0, 2, 1, 3).reshape(B, Nq, D)
    return o @ p['wo'] + p['bo'][0]


def _ln_ref(x, w, b):
    m = x.mean(-1, keepdims=True)
    v = ((x - m) ** 2).mean(-1, keepdims=True)
    return (x - m) / jnp.sqrt(v + LN_EPS) * w + b


def _block_ref(params, queries, keys, query_pe, key_pe, num_heads,
               skip_first_layer_pe=False):
    if skip_first_layer_pe:
        queries = _attention_ref(queries, queries, queries,
                                 params['self_attn'], num_heads)
    else:
        q = queries + query_pe
        queries = queries + _attention_ref(q, q, queries,
                                           params['self_attn'], num_heads)
    queries = _ln_ref(queries, params['ln_w'][0], params['ln_b'][0])
    q = queries + query_pe
    k = keys + key_pe
    queries = queries + _attention_ref(q, k, keys, params['cross_t2i'],
                                       num_heads)
    queries = _ln_ref(queries, params['ln_w'][1], params['ln_b'][1])
    h = jnp.maximum(queries @ params['mlp']['w1'] + params['mlp']['b1'][0], 0.0)
    queries = queries + (h @ params['mlp']['w2'] + params['mlp']['b2'][0])
    queries = _ln_ref(queries, params['ln_w'][2], params['ln_b'][2])
    q = queries + query_pe
    k = keys + key_pe
    keys = keys + _attention_ref(k, q, queries, params['cross_i2t'], num_heads)
    keys = _ln_ref(keys, params['ln_w'][3], params['ln_b'][3])
    return queries, keys


# ---------------------------------------------------------------------------
# Main
# ---------------------------------------------------------------------------
if __name__ == "__main__":
    B = 2
    EMBED = 32
    NUM_HEADS = 4
    MLP_DIM = 64
    DOWNSAMPLE = 2
    N_SPARSE = 8          # query tokens
    N_DENSE = 64          # flattened 8x8 image tokens

    root = jax.random.PRNGKey(0)
    kp, kq, kk, kqpe, kkpe = jax.random.split(root, 5)

    params = init_params(kp, EMBED, MLP_DIM, DOWNSAMPLE)
    queries = jax.random.normal(kq, (B, N_SPARSE, EMBED), jnp.float32)
    keys = jax.random.normal(kk, (B, N_DENSE, EMBED), jnp.float32)
    query_pe = jax.random.normal(kqpe, (B, N_SPARSE, EMBED), jnp.float32)
    key_pe = jax.random.normal(kkpe, (B, N_DENSE, EMBED), jnp.float32)

    ref_q, ref_k = _block_ref(params, queries, keys, query_pe, key_pe,
                              num_heads=NUM_HEADS, skip_first_layer_pe=False)

    # --- fused kernel, f32 MXU operands (tight tolerance) -------------------
    out_q, out_k = two_way_attention_block(
        params, queries, keys, query_pe, key_pe,
        num_heads=NUM_HEADS, skip_first_layer_pe=False,
        compute_dtype=jnp.float32)
    jax.block_until_ready((out_q, out_k))
    assert out_q.shape == (B, N_SPARSE, EMBED)
    assert out_k.shape == (B, N_DENSE, EMBED)
    assert jnp.allclose(out_q, ref_q, atol=2e-2, rtol=2e-2), \
        float(jnp.max(jnp.abs(out_q - ref_q)))
    assert jnp.allclose(out_k, ref_k, atol=2e-2, rtol=2e-2), \
        float(jnp.max(jnp.abs(out_k - ref_k)))

    # --- skip_first_layer_pe=True branch ------------------------------------
    sq, sk = two_way_attention_block(
        params, queries, keys, query_pe, key_pe,
        num_heads=NUM_HEADS, skip_first_layer_pe=True,
        compute_dtype=jnp.float32)
    jax.block_until_ready((sq, sk))
    rsq, rsk = _block_ref(params, queries, keys, query_pe, key_pe,
                          num_heads=NUM_HEADS, skip_first_layer_pe=True)
    assert jnp.allclose(sq, rsq, atol=2e-2, rtol=2e-2)
    assert jnp.allclose(sk, rsk, atol=2e-2, rtol=2e-2)

    # --- default path: bf16 MXU operands, f32 accumulate / softmax / LN -----
    bf_q, bf_k = two_way_attention_block(
        params, queries, keys, query_pe, key_pe,
        num_heads=NUM_HEADS, skip_first_layer_pe=False)
    jax.block_until_ready((bf_q, bf_k))
    assert jnp.allclose(bf_q, ref_q, atol=2e-1, rtol=2e-1)
    assert jnp.allclose(bf_k, ref_k, atol=2e-1, rtol=2e-1)

    print("KERNEL_OK")
</pallas_src>

<mosaic_0001>
module attributes {stable_mosaic.version = 11 : i64} {
  func.func @_two_way_block_kernel(%arg0: i32, %arg1: memref<1x8x32xf32, #tpu.memory_space<vmem>>, %arg2: memref<1x64x32xf32, #tpu.memory_space<vmem>>, %arg3: memref<1x8x32xf32, #tpu.memory_space<vmem>>, %arg4: memref<1x64x32xf32, #tpu.memory_space<vmem>>, %arg5: memref<3x32x32xf32, #tpu.memory_space<vmem>>, %arg6: memref<3x1x32xf32, #tpu.memory_space<vmem>>, %arg7: memref<4x8x32xf32, #tpu.memory_space<vmem>>, %arg8: memref<1x32xf32, #tpu.memory_space<vmem>>, %arg9: memref<3x32x16xf32, #tpu.memory_space<vmem>>, %arg10: memref<3x1x16xf32, #tpu.memory_space<vmem>>, %arg11: memref<4x4x32xf32, #tpu.memory_space<vmem>>, %arg12: memref<1x32xf32, #tpu.memory_space<vmem>>, %arg13: memref<32x64xf32, #tpu.memory_space<vmem>>, %arg14: memref<1x64xf32, #tpu.memory_space<vmem>>, %arg15: memref<64x32xf32, #tpu.memory_space<vmem>>, %arg16: memref<1x32xf32, #tpu.memory_space<vmem>>, %arg17: memref<3x32x16xf32, #tpu.memory_space<vmem>>, %arg18: memref<3x1x16xf32, #tpu.memory_space<vmem>>, %arg19: memref<4x4x32xf32, #tpu.memory_space<vmem>>, %arg20: memref<1x32xf32, #tpu.memory_space<vmem>>, %arg21: memref<4x32xf32, #tpu.memory_space<vmem>>, %arg22: memref<4x32xf32, #tpu.memory_space<vmem>>, %arg23: memref<1x8x32xf32, #tpu.memory_space<vmem>>, %arg24: memref<1x64x32xf32, #tpu.memory_space<vmem>>) attributes {dimension_semantics = [#tpu.dimension_semantics<parallel>], iteration_bounds = array<i64: 2>, scalar_prefetch = 0 : i64, scratch_operands = 0 : i64, tpu.core_type = #tpu.core_type<tc>, window_params = [{transform_indices = @transform_0, window_bounds = array<i64: 1, 8, 32>}, {transform_indices = @transform_1, window_bounds = array<i64: 1, 64, 32>}, {transform_indices = @transform_2, window_bounds = array<i64: 1, 8, 32>}, {transform_indices = @transform_3, window_bounds = array<i64: 1, 64, 32>}, {pipeline_mode = #tpu.pipeline_mode<synchronous>, transform_indices = @transform_4, window_bounds = array<i64: 3, 32, 32>}, {pipeline_mode = #tpu.pipeline_mode<synchronous>, transform_indices = @transform_5, window_bounds = array<i64: 3, 1, 32>}, {pipeline_mode = #tpu.pipeline_mode<synchronous>, transform_indices = @transform_6, window_bounds = array<i64: 4, 8, 32>}, {pipeline_mode = #tpu.pipeline_mode<synchronous>, transform_indices = @transform_7, window_bounds = array<i64: 1, 32>}, {pipeline_mode = #tpu.pipeline_mode<synchronous>, transform_indices = @transform_8, window_bounds = array<i64: 3, 32, 16>}, {pipeline_mode = #tpu.pipeline_mode<synchronous>, transform_indices = @transform_9, window_bounds = array<i64: 3, 1, 16>}, {pipeline_mode = #tpu.pipeline_mode<synchronous>, transform_indices = @transform_10, window_bounds = array<i64: 4, 4, 32>}, {pipeline_mode = #tpu.pipeline_mode<synchronous>, transform_indices = @transform_11, window_bounds = array<i64: 1, 32>}, {pipeline_mode = #tpu.pipeline_mode<synchronous>, transform_indices = @transform_12, window_bounds = array<i64: 32, 64>}, {pipeline_mode = #tpu.pipeline_mode<synchronous>, transform_indices = @transform_13, window_bounds = array<i64: 1, 64>}, {pipeline_mode = #tpu.pipeline_mode<synchronous>, transform_indices = @transform_14, window_bounds = array<i64: 64, 32>}, {pipeline_mode = #tpu.pipeline_mode<synchronous>, transform_indices = @transform_15, window_bounds = array<i64: 1, 32>}, {pipeline_mode = #tpu.pipeline_mode<synchronous>, transform_indices = @transform_16, window_bounds = array<i64: 3, 32, 16>}, {pipeline_mode = #tpu.pipeline_mode<synchronous>, transform_indices = @transform_17, window_bounds = array<i64: 3, 1, 16>}, {pipeline_mode = #tpu.pipeline_mode<synchronous>, transform_indices = @transform_18, window_bounds = array<i64: 4, 4, 32>}, {pipeline_mode = #tpu.pipeline_mode<synchronous>, transform_indices = @transform_19, window_bounds = array<i64: 1, 32>}, {pipeline_mode = #tpu.pipeline_mode<synchronous>, transform_indices = @transform_20, window_bounds = array<i64: 4, 32>}, {pipeline_mode = #tpu.pipeline_mode<synchronous>, transform_indices = @transform_21, window_bounds = array<i64: 4, 32>}, {transform_indices = @transform_22, window_bounds = array<i64: 1, 8, 32>}, {transform_indices = @transform_23, window_bounds = array<i64: 1, 64, 32>}]} {
    %c0 = arith.constant 0 : index
    %c0_0 = arith.constant 0 : index
    %c0_1 = arith.constant 0 : index
    %0 = vector.load %arg1[%c0, %c0_0, %c0_1] : memref<1x8x32xf32, #tpu.memory_space<vmem>>, vector<1x8x32xf32>
    %1 = vector.shape_cast %0 : vector<1x8x32xf32> to vector<8x32xf32>
    %c0_2 = arith.constant 0 : index
    %c0_3 = arith.constant 0 : index
    %c0_4 = arith.constant 0 : index
    %2 = vector.load %arg2[%c0_2, %c0_3, %c0_4] : memref<1x64x32xf32, #tpu.memory_space<vmem>>, vector<1x64x32xf32>
    %3 = vector.shape_cast %2 : vector<1x64x32xf32> to vector<64x32xf32>
    %c0_5 = arith.constant 0 : index
    %c0_6 = arith.constant 0 : index
    %c0_7 = arith.constant 0 : index
    %4 = vector.load %arg3[%c0_5, %c0_6, %c0_7] : memref<1x8x32xf32, #tpu.memory_space<vmem>>, vector<1x8x32xf32>
    %5 = vector.shape_cast %4 : vector<1x8x32xf32> to vector<8x32xf32>
    %c0_8 = arith.constant 0 : index
    %c0_9 = arith.constant 0 : index
    %c0_10 = arith.constant 0 : index
    %6 = vector.load %arg4[%c0_8, %c0_9, %c0_10] : memref<1x64x32xf32, #tpu.memory_space<vmem>>, vector<1x64x32xf32>
    %7 = vector.shape_cast %6 : vector<1x64x32xf32> to vector<64x32xf32>
    %c0_11 = arith.constant 0 : index
    %c0_12 = arith.constant 0 : index
    %8 = vector.load %arg21[%c0_11, %c0_12] : memref<4x32xf32, #tpu.memory_space<vmem>>, vector<4x32xf32>
    %c0_13 = arith.constant 0 : index
    %c0_14 = arith.constant 0 : index
    %9 = vector.load %arg22[%c0_13, %c0_14] : memref<4x32xf32, #tpu.memory_space<vmem>>, vector<4x32xf32>
    %10 = arith.addf %1, %5 : vector<8x32xf32>
    %c0_15 = arith.constant 0 : index
    %c0_16 = arith.constant 0 : index
    %c0_17 = arith.constant 0 : index
    %11 = vector.load %arg5[%c0_15, %c0_16, %c0_17] : memref<3x32x32xf32, #tpu.memory_space<vmem>>, vector<1x32x32xf32>
    %12 = vector.shape_cast %11 : vector<1x32x32xf32> to vector<32x32xf32>
    %cst = arith.constant dense<0.000000e+00> : vector<8x32xf32>
    %13 = tpu.matmul %10, %12, %cst {dimension_numbers = #tpu.dot_dimension_numbers<[1], [0], [0], [1], [0, 0, 1, 1], [], []>} : vector<8x32xf32>, vector<32x32xf32>, vector<8x32xf32> -> vector<8x32xf32>
    %c0_18 = arith.constant 0 : index
    %c0_19 = arith.constant 0 : index
    %c0_20 = arith.constant 0 : index
    %14 = vector.load %arg6[%c0_18, %c0_19, %c0_20] : memref<3x1x32xf32, #tpu.memory_space<vmem>>, vector<1x1x32xf32>
    %15 = vector.shape_cast %14 : vector<1x1x32xf32> to vector<1x32xf32>
    %16 = vector.broadcast %15 : vector<1x32xf32> to vector<8x32xf32>
    %17 = arith.addf %13, %16 : vector<8x32xf32>
    %c1 = arith.constant 1 : index
    %c0_21 = arith.constant 0 : index
    %c0_22 = arith.constant 0 : index
    %18 = vector.load %arg5[%c1, %c0_21, %c0_22] : memref<3x32x32xf32, #tpu.memory_space<vmem>>, vector<1x32x32xf32>
    %19 = vector.shape_cast %18 : vector<1x32x32xf32> to vector<32x32xf32>
    %cst_23 = arith.constant dense<0.000000e+00> : vector<8x32xf32>
    %20 = tpu.matmul %10, %19, %cst_23 {dimension_numbers = #tpu.dot_dimension_numbers<[1], [0], [0], [1], [0, 0, 1, 1], [], []>} : vector<8x32xf32>, vector<32x32xf32>, vector<8x32xf32> -> vector<8x32xf32>
    %c1_24 = arith.constant 1 : index
    %c0_25 = arith.constant 0 : index
    %c0_26 = arith.constant 0 : index
    %21 = vector.load %arg6[%c1_24, %c0_25, %c0_26] : memref<3x1x32xf32, #tpu.memory_space<vmem>>, vector<1x1x32xf32>
    %22 = vector.shape_cast %21 : vector<1x1x32xf32> to vector<1x32xf32>
    %23 = vector.broadcast %22 : vector<1x32xf32> to vector<8x32xf32>
    %24 = arith.addf %20, %23 : vector<8x32xf32>
    %c2 = arith.constant 2 : index
    %c0_27 = arith.constant 0 : index
    %c0_28 = arith.constant 0 : index
    %25 = vector.load %arg5[%c2, %c0_27, %c0_28] : memref<3x32x32xf32, #tpu.memory_space<vmem>>, vector<1x32x32xf32>
    %26 = vector.shape_cast %25 : vector<1x32x32xf32> to vector<32x32xf32>
    %cst_29 = arith.constant dense<0.000000e+00> : vector<8x32xf32>
    %27 = tpu.matmul %1, %26, %cst_29 {dimension_numbers = #tpu.dot_dimension_numbers<[1], [0], [0], [1], [0, 0, 1, 1], [], []>} : vector<8x32xf32>, vector<32x32xf32>, vector<8x32xf32> -> vector<8x32xf32>
    %c2_30 = arith.constant 2 : index
    %c0_31 = arith.constant 0 : index
    %c0_32 = arith.constant 0 : index
    %28 = vector.load %arg6[%c2_30, %c0_31, %c0_32] : memref<3x1x32xf32, #tpu.memory_space<vmem>>, vector<1x1x32xf32>
    %29 = vector.shape_cast %28 : vector<1x1x32xf32> to vector<1x32xf32>
    %30 = vector.broadcast %29 : vector<1x32xf32> to vector<8x32xf32>
    %31 = arith.addf %27, %30 : vector<8x32xf32>
    %32 = vector.shape_cast %17 : vector<8x32xf32> to vector<8x4x8xf32>
    %33 = tpu.transpose %32, [1, 0, 2] : vector<8x4x8xf32> -> vector<4x8x8xf32>
    %34 = vector.shape_cast %24 : vector<8x32xf32> to vector<8x4x8xf32>
    %35 = tpu.transpose %34, [1, 0, 2] : vector<8x4x8xf32> -> vector<4x8x8xf32>
    %36 = vector.shape_cast %31 : vector<8x32xf32> to vector<8x4x8xf32>
    %37 = tpu.transpose %36, [1, 0, 2] : vector<8x4x8xf32> -> vector<4x8x8xf32>
    %cst_33 = arith.constant dense<0.000000e+00> : vector<4x8x8xf32>
    %38 = tpu.matmul %33, %35, %cst_33 {dimension_numbers = #tpu.dot_dimension_numbers<[2], [2], [1], [1], [0, 0, 0, 1, 1, 1], [0], [0]>} : vector<4x8x8xf32>, vector<4x8x8xf32>, vector<4x8x8xf32> -> vector<4x8x8xf32>
    %cst_34 = arith.constant 0.353553385 : f32
    %39 = vector.broadcast %cst_34 : f32 to vector<4x8x8xf32>
    %40 = arith.mulf %38, %39 : vector<4x8x8xf32>
    %cst_35 = arith.constant dense<0xFF800000> : vector<4x8xf32>
    %41 = vector.multi_reduction <maximumf>, %40, %cst_35 [2] : vector<4x8x8xf32> to vector<4x8xf32>
    %42 = vector.shape_cast %41 : vector<4x8xf32> to vector<4x8x1xf32>
    %43 = vector.broadcast %42 : vector<4x8x1xf32> to vector<4x8x8xf32>
    %44 = arith.subf %40, %43 : vector<4x8x8xf32>
    %45 = math.exp %44 : vector<4x8x8xf32>
    %cst_36 = arith.constant dense<0.000000e+00> : vector<4x8xf32>
    %46 = vector.multi_reduction <add>, %45, %cst_36 [2] : vector<4x8x8xf32> to vector<4x8xf32>
    %47 = vector.shape_cast %46 : vector<4x8xf32> to vector<4x8x1xf32>
    %48 = vector.broadcast %47 : vector<4x8x1xf32> to vector<4x8x8xf32>
    %49 = arith.divf %45, %48 : vector<4x8x8xf32>
    %cst_37 = arith.constant dense<0.000000e+00> : vector<4x8x8xf32>
    %50 = tpu.matmul %49, %37, %cst_37 {dimension_numbers = #tpu.dot_dimension_numbers<[2], [1], [1], [2], [0, 0, 0, 1, 1, 2], [0], [0]>} : vector<4x8x8xf32>, vector<4x8x8xf32>, vector<4x8x8xf32> -> vector<4x8x8xf32>
    %c0_38 = arith.constant 0 : index
    %c0_39 = arith.constant 0 : index
    %c0_40 = arith.constant 0 : index
    %51 = vector.load %arg7[%c0_38, %c0_39, %c0_40] : memref<4x8x32xf32, #tpu.memory_space<vmem>>, vector<4x8x32xf32>
    %cst_41 = arith.constant dense<0.000000e+00> : vector<4x8x32xf32>
    %52 = tpu.matmul %50, %51, %cst_41 {dimension_numbers = #tpu.dot_dimension_numbers<[2], [1], [1], [2], [0, 0, 0, 1, 1, 2], [0], [0]>} : vector<4x8x8xf32>, vector<4x8x32xf32>, vector<4x8x32xf32> -> vector<4x8x32xf32>
    %cst_42 = arith.constant dense<0.000000e+00> : vector<8x32xf32>
    %53 = vector.multi_reduction <add>, %52, %cst_42 [0] : vector<4x8x32xf32> to vector<8x32xf32>
    %c0_43 = arith.constant 0 : index
    %c0_44 = arith.constant 0 : index
    %54 = vector.load %arg8[%c0_43, %c0_44] : memref<1x32xf32, #tpu.memory_space<vmem>>, vector<1x32xf32>
    %55 = vector.broadcast %54 : vector<1x32xf32> to vector<8x32xf32>
    %56 = arith.addf %53, %55 : vector<8x32xf32>
    %57 = arith.addf %1, %56 : vector<8x32xf32>
    %cst_45 = arith.constant dense<0.000000e+00> : vector<8xf32>
    %58 = vector.multi_reduction <add>, %57, %cst_45 [1] : vector<8x32xf32> to vector<8xf32>
    %59 = vector.shape_cast %58 : vector<8xf32> to vector<8x1xf32>
    %cst_46 = arith.constant 3.200000e+01 : f32
    %60 = vector.broadcast %cst_46 : f32 to vector<8x1xf32>
    %61 = arith.divf %59, %60 : vector<8x1xf32>
    %62 = vector.broadcast %61 : vector<8x1xf32> to vector<8x32xf32>
    %63 = arith.subf %57, %62 : vector<8x32xf32>
    %64 = arith.mulf %63, %63 : vector<8x32xf32>
    %cst_47 = arith.constant dense<0.000000e+00> : vector<8xf32>
    %65 = vector.multi_reduction <add>, %64, %cst_47 [1] : vector<8x32xf32> to vector<8xf32>
    %66 = vector.shape_cast %65 : vector<8xf32> to vector<8x1xf32>
    %cst_48 = arith.constant 3.200000e+01 : f32
    %67 = vector.broadcast %cst_48 : f32 to vector<8x1xf32>
    %68 = arith.divf %66, %67 : vector<8x1xf32>
    %69 = vector.broadcast %61 : vector<8x1xf32> to vector<8x32xf32>
    %70 = arith.subf %57, %69 : vector<8x32xf32>
    %cst_49 = arith.constant 9.99999974E-6 : f32
    %71 = vector.broadcast %cst_49 : f32 to vector<8x1xf32>
    %72 = arith.addf %68, %71 : vector<8x1xf32>
    %73 = math.rsqrt %72 : vector<8x1xf32>
    %74 = vector.broadcast %73 : vector<8x1xf32> to vector<8x32xf32>
    %75 = arith.mulf %70, %74 : vector<8x32xf32>
    %76 = vector.extract_strided_slice %8 {offsets = [0, 0], sizes = [1, 32], strides = [1, 1]} : vector<4x32xf32> to vector<1x32xf32>
    %77 = vector.broadcast %76 : vector<1x32xf32> to vector<8x32xf32>
    %78 = arith.mulf %75, %77 : vector<8x32xf32>
    %79 = vector.extract_strided_slice %9 {offsets = [0, 0], sizes = [1, 32], strides = [1, 1]} : vector<4x32xf32> to vector<1x32xf32>
    %80 = vector.broadcast %79 : vector<1x32xf32> to vector<8x32xf32>
    %81 = arith.addf %78, %80 : vector<8x32xf32>
    %82 = arith.addf %81, %5 : vector<8x32xf32>
    %83 = arith.addf %3, %7 : vector<64x32xf32>
    %c0_50 = arith.constant 0 : index
    %c0_51 = arith.constant 0 : index
    %c0_52 = arith.constant 0 : index
    %84 = vector.load %arg9[%c0_50, %c0_51, %c0_52] : memref<3x32x16xf32, #tpu.memory_space<vmem>>, vector<1x32x16xf32>
    %85 = vector.shape_cast %84 : vector<1x32x16xf32> to vector<32x16xf32>
    %cst_53 = arith.constant dense<0.000000e+00> : vector<8x16xf32>
    %86 = tpu.matmul %82, %85, %cst_53 {dimension_numbers = #tpu.dot_dimension_numbers<[1], [0], [0], [1], [0, 0, 1, 1], [], []>} : vector<8x32xf32>, vector<32x16xf32>, vector<8x16xf32> -> vector<8x16xf32>
    %c0_54 = arith.constant 0 : index
    %c0_55 = arith.constant 0 : index
    %c0_56 = arith.constant 0 : index
    %87 = vector.load %arg10[%c0_54, %c0_55, %c0_56] : memref<3x1x16xf32, #tpu.memory_space<vmem>>, vector<1x1x16xf32>
    %88 = vector.shape_cast %87 : vector<1x1x16xf32> to vector<1x16xf32>
    %89 = vector.broadcast %88 : vector<1x16xf32> to vector<8x16xf32>
    %90 = arith.addf %86, %89 : vector<8x16xf32>
    %c1_57 = arith.constant 1 : index
    %c0_58 = arith.constant 0 : index
    %c0_59 = arith.constant 0 : index
    %91 = vector.load %arg9[%c1_57, %c0_58, %c0_59] : memref<3x32x16xf32, #tpu.memory_space<vmem>>, vector<1x32x16xf32>
    %92 = vector.shape_cast %91 : vector<1x32x16xf32> to vector<32x16xf32>
    %cst_60 = arith.constant dense<0.000000e+00> : vector<64x16xf32>
    %93 = tpu.matmul %83, %92, %cst_60 {dimension_numbers = #tpu.dot_dimension_numbers<[1], [0], [0], [1], [0, 0, 1, 1], [], []>} : vector<64x32xf32>, vector<32x16xf32>, vector<64x16xf32> -> vector<64x16xf32>
    %c1_61 = arith.constant 1 : index
    %c0_62 = arith.constant 0 : index
    %c0_63 = arith.constant 0 : index
    %94 = vector.load %arg10[%c1_61, %c0_62, %c0_63] : memref<3x1x16xf32, #tpu.memory_space<vmem>>, vector<1x1x16xf32>
    %95 = vector.shape_cast %94 : vector<1x1x16xf32> to vector<1x16xf32>
    %96 = vector.broadcast %95 : vector<1x16xf32> to vector<64x16xf32>
    %97 = arith.addf %93, %96 : vector<64x16xf32>
    %c2_64 = arith.constant 2 : index
    %c0_65 = arith.constant 0 : index
    %c0_66 = arith.constant 0 : index
    %98 = vector.load %arg9[%c2_64, %c0_65, %c0_66] : memref<3x32x16xf32, #tpu.memory_space<vmem>>, vector<1x32x16xf32>
    %99 = vector.shape_cast %98 : vector<1x32x16xf32> to vector<32x16xf32>
    %cst_67 = arith.constant dense<0.000000e+00> : vector<64x16xf32>
    %100 = tpu.matmul %3, %99, %cst_67 {dimension_numbers = #tpu.dot_dimension_numbers<[1], [0], [0], [1], [0, 0, 1, 1], [], []>} : vector<64x32xf32>, vector<32x16xf32>, vector<64x16xf32> -> vector<64x16xf32>
    %c2_68 = arith.constant 2 : index
    %c0_69 = arith.constant 0 : index
    %c0_70 = arith.constant 0 : index
    %101 = vector.load %arg10[%c2_68, %c0_69, %c0_70] : memref<3x1x16xf32, #tpu.memory_space<vmem>>, vector<1x1x16xf32>
    %102 = vector.shape_cast %101 : vector<1x1x16xf32> to vector<1x16xf32>
    %103 = vector.broadcast %102 : vector<1x16xf32> to vector<64x16xf32>
    %104 = arith.addf %100, %103 : vector<64x16xf32>
    %105 = vector.shape_cast %90 : vector<8x16xf32> to vector<8x4x4xf32>
    %106 = tpu.transpose %105, [1, 0, 2] : vector<8x4x4xf32> -> vector<4x8x4xf32>
    %107 = vector.shape_cast %97 : vector<64x16xf32> to vector<64x4x4xf32>
    %108 = tpu.transpose %107, [1, 0, 2] : vector<64x4x4xf32> -> vector<4x64x4xf32>
    %109 = vector.shape_cast %104 : vector<64x16xf32> to vector<64x4x4xf32>
    %110 = tpu.transpose %109, [1, 0, 2] : vector<64x4x4xf32> -> vector<4x64x4xf32>
    %cst_71 = arith.constant dense<0.000000e+00> : vector<4x8x64xf32>
    %111 = tpu.matmul %106, %108, %cst_71 {dimension_numbers = #tpu.dot_dimension_numbers<[2], [2], [1], [1], [0, 0, 0, 1, 1, 1], [0], [0]>} : vector<4x8x4xf32>, vector<4x64x4xf32>, vector<4x8x64xf32> -> vector<4x8x64xf32>
    %cst_72 = arith.constant 5.000000e-01 : f32
    %112 = vector.broadcast %cst_72 : f32 to vector<4x8x64xf32>
    %113 = arith.mulf %111, %112 : vector<4x8x64xf32>
    %cst_73 = arith.constant dense<0xFF800000> : vector<4x8xf32>
    %114 = vector.multi_reduction <maximumf>, %113, %cst_73 [2] : vector<4x8x64xf32> to vector<4x8xf32>
    %115 = vector.shape_cast %114 : vector<4x8xf32> to vector<4x8x1xf32>
    %116 = vector.broadcast %115 : vector<4x8x1xf32> to vector<4x8x64xf32>
    %117 = arith.subf %113, %116 : vector<4x8x64xf32>
    %118 = math.exp %117 : vector<4x8x64xf32>
    %cst_74 = arith.constant dense<0.000000e+00> : vector<4x8xf32>
    %119 = vector.multi_reduction <add>, %118, %cst_74 [2] : vector<4x8x64xf32> to vector<4x8xf32>
    %120 = vector.shape_cast %119 : vector<4x8xf32> to vector<4x8x1xf32>
    %121 = vector.broadcast %120 : vector<4x8x1xf32> to vector<4x8x64xf32>
    %122 = arith.divf %118, %121 : vector<4x8x64xf32>
    %cst_75 = arith.constant dense<0.000000e+00> : vector<4x8x4xf32>
    %123 = tpu.matmul %122, %110, %cst_75 {dimension_numbers = #tpu.dot_dimension_numbers<[2], [1], [1], [2], [0, 0, 0, 1, 1, 2], [0], [0]>} : vector<4x8x64xf32>, vector<4x64x4xf32>, vector<4x8x4xf32> -> vector<4x8x4xf32>
    %c0_76 = arith.constant 0 : index
    %c0_77 = arith.constant 0 : index
    %c0_78 = arith.constant 0 : index
    %124 = vector.load %arg11[%c0_76, %c0_77, %c0_78] : memref<4x4x32xf32, #tpu.memory_space<vmem>>, vector<4x4x32xf32>
    %cst_79 = arith.constant dense<0.000000e+00> : vector<4x8x32xf32>
    %125 = tpu.matmul %123, %124, %cst_79 {dimension_numbers = #tpu.dot_dimension_numbers<[2], [1], [1], [2], [0, 0, 0, 1, 1, 2], [0], [0]>} : vector<4x8x4xf32>, vector<4x4x32xf32>, vector<4x8x32xf32> -> vector<4x8x32xf32>
    %cst_80 = arith.constant dense<0.000000e+00> : vector<8x32xf32>
    %126 = vector.multi_reduction <add>, %125, %cst_80 [0] : vector<4x8x32xf32> to vector<8x32xf32>
    %c0_81 = arith.constant 0 : index
    %c0_82 = arith.constant 0 : index
    %127 = vector.load %arg12[%c0_81, %c0_82] : memref<1x32xf32, #tpu.memory_space<vmem>>, vector<1x32xf32>
    %128 = vector.broadcast %127 : vector<1x32xf32> to vector<8x32xf32>
    %129 = arith.addf %126, %128 : vector<8x32xf32>
    %130 = arith.addf %81, %129 : vector<8x32xf32>
    %cst_83 = arith.constant dense<0.000000e+00> : vector<8xf32>
    %131 = vector.multi_reduction <add>, %130, %cst_83 [1] : vector<8x32xf32> to vector<8xf32>
    %132 = vector.shape_cast %131 : vector<8xf32> to vector<8x1xf32>
    %cst_84 = arith.constant 3.200000e+01 : f32
    %133 = vector.broadcast %cst_84 : f32 to vector<8x1xf32>
    %134 = arith.divf %132, %133 : vector<8x1xf32>
    %135 = vector.broadcast %134 : vector<8x1xf32> to vector<8x32xf32>
    %136 = arith.subf %130, %135 : vector<8x32xf32>
    %137 = arith.mulf %136, %136 : vector<8x32xf32>
    %cst_85 = arith.constant dense<0.000000e+00> : vector<8xf32>
    %138 = vector.multi_reduction <add>, %137, %cst_85 [1] : vector<8x32xf32> to vector<8xf32>
    %139 = vector.shape_cast %138 : vector<8xf32> to vector<8x1xf32>
    %cst_86 = arith.constant 3.200000e+01 : f32
    %140 = vector.broadcast %cst_86 : f32 to vector<8x1xf32>
    %141 = arith.divf %139, %140 : vector<8x1xf32>
    %142 = vector.broadcast %134 : vector<8x1xf32> to vector<8x32xf32>
    %143 = arith.subf %130, %142 : vector<8x32xf32>
    %cst_87 = arith.constant 9.99999974E-6 : f32
    %144 = vector.broadcast %cst_87 : f32 to vector<8x1xf32>
    %145 = arith.addf %141, %144 : vector<8x1xf32>
    %146 = math.rsqrt %145 : vector<8x1xf32>
    %147 = vector.broadcast %146 : vector<8x1xf32> to vector<8x32xf32>
    %148 = arith.mulf %143, %147 : vector<8x32xf32>
    %149 = vector.extract_strided_slice %8 {offsets = [1, 0], sizes = [1, 32], strides = [1, 1]} : vector<4x32xf32> to vector<1x32xf32>
    %150 = vector.broadcast %149 : vector<1x32xf32> to vector<8x32xf32>
    %151 = arith.mulf %148, %150 : vector<8x32xf32>
    %152 = vector.extract_strided_slice %9 {offsets = [1, 0], sizes = [1, 32], strides = [1, 1]} : vector<4x32xf32> to vector<1x32xf32>
    %153 = vector.broadcast %152 : vector<1x32xf32> to vector<8x32xf32>
    %154 = arith.addf %151, %153 : vector<8x32xf32>
    %c0_88 = arith.constant 0 : index
    %c0_89 = arith.constant 0 : index
    %155 = vector.load %arg13[%c0_88, %c0_89] : memref<32x64xf32, #tpu.memory_space<vmem>>, vector<32x64xf32>
    %cst_90 = arith.constant dense<0.000000e+00> : vector<8x64xf32>
    %156 = tpu.matmul %154, %155, %cst_90 {dimension_numbers = #tpu.dot_dimension_numbers<[1], [0], [0], [1], [0, 0, 1, 1], [], []>} : vector<8x32xf32>, vector<32x64xf32>, vector<8x64xf32> -> vector<8x64xf32>
    %c0_91 = arith.constant 0 : index
    %c0_92 = arith.constant 0 : index
    %157 = vector.load %arg14[%c0_91, %c0_92] : memref<1x64xf32, #tpu.memory_space<vmem>>, vector<1x64xf32>
    %158 = vector.broadcast %157 : vector<1x64xf32> to vector<8x64xf32>
    %159 = arith.addf %156, %158 : vector<8x64xf32>
    %cst_93 = arith.constant 0.000000e+00 : f32
    %160 = vector.broadcast %cst_93 : f32 to vector<8x64xf32>
    %161 = arith.maximumf %159, %160 : vector<8x64xf32>
    %c0_94 = arith.constant 0 : index
    %c0_95 = arith.constant 0 : index
    %162 = vector.load %arg15[%c0_94, %c0_95] : memref<64x32xf32, #tpu.memory_space<vmem>>, vector<64x32xf32>
    %cst_96 = arith.constant dense<0.000000e+00> : vector<8x32xf32>
    %163 = tpu.matmul %161, %162, %cst_96 {dimension_numbers = #tpu.dot_dimension_numbers<[1], [0], [0], [1], [0, 0, 1, 1], [], []>} : vector<8x64xf32>, vector<64x32xf32>, vector<8x32xf32> -> vector<8x32xf32>
    %c0_97 = arith.constant 0 : index
    %c0_98 = arith.constant 0 : index
    %164 = vector.load %arg16[%c0_97, %c0_98] : memref<1x32xf32, #tpu.memory_space<vmem>>, vector<1x32xf32>
    %165 = vector.broadcast %164 : vector<1x32xf32> to vector<8x32xf32>
    %166 = arith.addf %163, %165 : vector<8x32xf32>
    %167 = arith.addf %154, %166 : vector<8x32xf32>
    %cst_99 = arith.constant dense<0.000000e+00> : vector<8xf32>
    %168 = vector.multi_reduction <add>, %167, %cst_99 [1] : vector<8x32xf32> to vector<8xf32>
    %169 = vector.shape_cast %168 : vector<8xf32> to vector<8x1xf32>
    %cst_100 = arith.constant 3.200000e+01 : f32
    %170 = vector.broadcast %cst_100 : f32 to vector<8x1xf32>
    %171 = arith.divf %169, %170 : vector<8x1xf32>
    %172 = vector.broadcast %171 : vector<8x1xf32> to vector<8x32xf32>
    %173 = arith.subf %167, %172 : vector<8x32xf32>
    %174 = arith.mulf %173, %173 : vector<8x32xf32>
    %cst_101 = arith.constant dense<0.000000e+00> : vector<8xf32>
    %175 = vector.multi_reduction <add>, %174, %cst_101 [1] : vector<8x32xf32> to vector<8xf32>
    %176 = vector.shape_cast %175 : vector<8xf32> to vector<8x1xf32>
    %cst_102 = arith.constant 3.200000e+01 : f32
    %177 = vector.broadcast %cst_102 : f32 to vector<8x1xf32>
    %178 = arith.divf %176, %177 : vector<8x1xf32>
    %179 = vector.broadcast %171 : vector<8x1xf32> to vector<8x32xf32>
    %180 = arith.subf %167, %179 : vector<8x32xf32>
    %cst_103 = arith.constant 9.99999974E-6 : f32
    %181 = vector.broadcast %cst_103 : f32 to vector<8x1xf32>
    %182 = arith.addf %178, %181 : vector<8x1xf32>
    %183 = math.rsqrt %182 : vector<8x1xf32>
    %184 = vector.broadcast %183 : vector<8x1xf32> to vector<8x32xf32>
    %185 = arith.mulf %180, %184 : vector<8x32xf32>
    %186 = vector.extract_strided_slice %8 {offsets = [2, 0], sizes = [1, 32], strides = [1, 1]} : vector<4x32xf32> to vector<1x32xf32>
    %187 = vector.broadcast %186 : vector<1x32xf32> to vector<8x32xf32>
    %188 = arith.mulf %185, %187 : vector<8x32xf32>
    %189 = vector.extract_strided_slice %9 {offsets = [2, 0], sizes = [1, 32], strides = [1, 1]} : vector<4x32xf32> to vector<1x32xf32>
    %190 = vector.broadcast %189 : vector<1x32xf32> to vector<8x32xf32>
    %191 = arith.addf %188, %190 : vector<8x32xf32>
    %192 = arith.addf %191, %5 : vector<8x32xf32>
    %193 = arith.addf %3, %7 : vector<64x32xf32>
    %c0_104 = arith.constant 0 : index
    %c0_105 = arith.constant 0 : index
    %c0_106 = arith.constant 0 : index
    %194 = vector.load %arg17[%c0_104, %c0_105, %c0_106] : memref<3x32x16xf32, #tpu.memory_space<vmem>>, vector<1x32x16xf32>
    %195 = vector.shape_cast %194 : vector<1x32x16xf32> to vector<32x16xf32>
    %cst_107 = arith.constant dense<0.000000e+00> : vector<64x16xf32>
    %196 = tpu.matmul %193, %195, %cst_107 {dimension_numbers = #tpu.dot_dimension_numbers<[1], [0], [0], [1], [0, 0, 1, 1], [], []>} : vector<64x32xf32>, vector<32x16xf32>, vector<64x16xf32> -> vector<64x16xf32>
    %c0_108 = arith.constant 0 : index
    %c0_109 = arith.constant 0 : index
    %c0_110 = arith.constant 0 : index
    %197 = vector.load %arg18[%c0_108, %c0_109, %c0_110] : memref<3x1x16xf32, #tpu.memory_space<vmem>>, vector<1x1x16xf32>
    %198 = vector.shape_cast %197 : vector<1x1x16xf32> to vector<1x16xf32>
    %199 = vector.broadcast %198 : vector<1x16xf32> to vector<64x16xf32>
    %200 = arith.addf %196, %199 : vector<64x16xf32>
    %c1_111 = arith.constant 1 : index
    %c0_112 = arith.constant 0 : index
    %c0_113 = arith.constant 0 : index
    %201 = vector.load %arg17[%c1_111, %c0_112, %c0_113] : memref<3x32x16xf32, #tpu.memory_space<vmem>>, vector<1x32x16xf32>
    %202 = vector.shape_cast %201 : vector<1x32x16xf32> to vector<32x16xf32>
    %cst_114 = arith.constant dense<0.000000e+00> : vector<8x16xf32>
    %203 = tpu.matmul %192, %202, %cst_114 {dimension_numbers = #tpu.dot_dimension_numbers<[1], [0], [0], [1], [0, 0, 1, 1], [], []>} : vector<8x32xf32>, vector<32x16xf32>, vector<8x16xf32> -> vector<8x16xf32>
    %c1_115 = arith.constant 1 : index
    %c0_116 = arith.constant 0 : index
    %c0_117 = arith.constant 0 : index
    %204 = vector.load %arg18[%c1_115, %c0_116, %c0_117] : memref<3x1x16xf32, #tpu.memory_space<vmem>>, vector<1x1x16xf32>
    %205 = vector.shape_cast %204 : vector<1x1x16xf32> to vector<1x16xf32>
    %206 = vector.broadcast %205 : vector<1x16xf32> to vector<8x16xf32>
    %207 = arith.addf %203, %206 : vector<8x16xf32>
    %c2_118 = arith.constant 2 : index
    %c0_119 = arith.constant 0 : index
    %c0_120 = arith.constant 0 : index
    %208 = vector.load %arg17[%c2_118, %c0_119, %c0_120] : memref<3x32x16xf32, #tpu.memory_space<vmem>>, vector<1x32x16xf32>
    %209 = vector.shape_cast %208 : vector<1x32x16xf32> to vector<32x16xf32>
    %cst_121 = arith.constant dense<0.000000e+00> : vector<8x16xf32>
    %210 = tpu.matmul %191, %209, %cst_121 {dimension_numbers = #tpu.dot_dimension_numbers<[1], [0], [0], [1], [0, 0, 1, 1], [], []>} : vector<8x32xf32>, vector<32x16xf32>, vector<8x16xf32> -> vector<8x16xf32>
    %c2_122 = arith.constant 2 : index
    %c0_123 = arith.constant 0 : index
    %c0_124 = arith.constant 0 : index
    %211 = vector.load %arg18[%c2_122, %c0_123, %c0_124] : memref<3x1x16xf32, #tpu.memory_space<vmem>>, vector<1x1x16xf32>
    %212 = vector.shape_cast %211 : vector<1x1x16xf32> to vector<1x16xf32>
    %213 = vector.broadcast %212 : vector<1x16xf32> to vector<8x16xf32>
    %214 = arith.addf %210, %213 : vector<8x16xf32>
    %215 = vector.shape_cast %200 : vector<64x16xf32> to vector<64x4x4xf32>
    %216 = tpu.transpose %215, [1, 0, 2] : vector<64x4x4xf32> -> vector<4x64x4xf32>
    %217 = vector.shape_cast %207 : vector<8x16xf32> to vector<8x4x4xf32>
    %218 = tpu.transpose %217, [1, 0, 2] : vector<8x4x4xf32> -> vector<4x8x4xf32>
    %219 = vector.shape_cast %214 : vector<8x16xf32> to vector<8x4x4xf32>
    %220 = tpu.transpose %219, [1, 0, 2] : vector<8x4x4xf32> -> vector<4x8x4xf32>
    %cst_125 = arith.constant dense<0.000000e+00> : vector<4x8x64xf32>
    %221 = tpu.matmul %218, %216, %cst_125 {dimension_numbers = #tpu.dot_dimension_numbers<[2], [2], [1], [1], [0, 0, 0, 1, 1, 1], [0], [0]>} : vector<4x8x4xf32>, vector<4x64x4xf32>, vector<4x8x64xf32> -> vector<4x8x64xf32>
    %cst_126 = arith.constant 5.000000e-01 : f32
    %222 = vector.broadcast %cst_126 : f32 to vector<4x8x64xf32>
    %223 = arith.mulf %221, %222 : vector<4x8x64xf32>
    %cst_127 = arith.constant dense<0xFF800000> : vector<4x64xf32>
    %224 = vector.multi_reduction <maximumf>, %223, %cst_127 [1] : vector<4x8x64xf32> to vector<4x64xf32>
    %225 = vector.shape_cast %224 : vector<4x64xf32> to vector<4x1x64xf32>
    %226 = vector.broadcast %225 : vector<4x1x64xf32> to vector<4x8x64xf32>
    %227 = arith.subf %223, %226 : vector<4x8x64xf32>
    %228 = math.exp %227 : vector<4x8x64xf32>
    %cst_128 = arith.constant dense<0.000000e+00> : vector<4x64xf32>
    %229 = vector.multi_reduction <add>, %228, %cst_128 [1] : vector<4x8x64xf32> to vector<4x64xf32>
    %230 = vector.shape_cast %229 : vector<4x64xf32> to vector<4x1x64xf32>
    %231 = vector.broadcast %230 : vector<4x1x64xf32> to vector<4x8x64xf32>
    %232 = arith.divf %228, %231 : vector<4x8x64xf32>
    %233 = tpu.transpose %232, [0, 2, 1] : vector<4x8x64xf32> -> vector<4x64x8xf32>
    %cst_129 = arith.constant dense<0.000000e+00> : vector<4x64x4xf32>
    %234 = tpu.matmul %233, %220, %cst_129 {dimension_numbers = #tpu.dot_dimension_numbers<[2], [1], [1], [2], [0, 0, 0, 1, 1, 2], [0], [0]>} : vector<4x64x8xf32>, vector<4x8x4xf32>, vector<4x64x4xf32> -> vector<4x64x4xf32>
    %c0_130 = arith.constant 0 : index
    %c0_131 = arith.constant 0 : index
    %c0_132 = arith.constant 0 : index
    %235 = vector.load %arg19[%c0_130, %c0_131, %c0_132] : memref<4x4x32xf32, #tpu.memory_space<vmem>>, vector<4x4x32xf32>
    %cst_133 = arith.constant dense<0.000000e+00> : vector<4x64x32xf32>
    %236 = tpu.matmul %234, %235, %cst_133 {dimension_numbers = #tpu.dot_dimension_numbers<[2], [1], [1], [2], [0, 0, 0, 1, 1, 2], [0], [0]>} : vector<4x64x4xf32>, vector<4x4x32xf32>, vector<4x64x32xf32> -> vector<4x64x32xf32>
    %cst_134 = arith.constant dense<0.000000e+00> : vector<64x32xf32>
    %237 = vector.multi_reduction <add>, %236, %cst_134 [0] : vector<4x64x32xf32> to vector<64x32xf32>
    %c0_135 = arith.constant 0 : index
    %c0_136 = arith.constant 0 : index
    %238 = vector.load %arg20[%c0_135, %c0_136] : memref<1x32xf32, #tpu.memory_space<vmem>>, vector<1x32xf32>
    %239 = vector.broadcast %238 : vector<1x32xf32> to vector<64x32xf32>
    %240 = arith.addf %237, %239 : vector<64x32xf32>
    %241 = arith.addf %3, %240 : vector<64x32xf32>
    %cst_137 = arith.constant dense<0.000000e+00> : vector<64xf32>
    %242 = vector.multi_reduction <add>, %241, %cst_137 [1] : vector<64x32xf32> to vector<64xf32>
    %243 = vector.shape_cast %242 : vector<64xf32> to vector<64x1xf32>
    %cst_138 = arith.constant 3.200000e+01 : f32
    %244 = vector.broadcast %cst_138 : f32 to vector<64x1xf32>
    %245 = arith.divf %243, %244 : vector<64x1xf32>
    %246 = vector.broadcast %245 : vector<64x1xf32> to vector<64x32xf32>
    %247 = arith.subf %241, %246 : vector<64x32xf32>
    %248 = arith.mulf %247, %247 : vector<64x32xf32>
    %cst_139 = arith.constant dense<0.000000e+00> : vector<64xf32>
    %249 = vector.multi_reduction <add>, %248, %cst_139 [1] : vector<64x32xf32> to vector<64xf32>
    %250 = vector.shape_cast %249 : vector<64xf32> to vector<64x1xf32>
    %cst_140 = arith.constant 3.200000e+01 : f32
    %251 = vector.broadcast %cst_140 : f32 to vector<64x1xf32>
    %252 = arith.divf %250, %251 : vector<64x1xf32>
    %253 = vector.broadcast %245 : vector<64x1xf32> to vector<64x32xf32>
    %254 = arith.subf %241, %253 : vector<64x32xf32>
    %cst_141 = arith.constant 9.99999974E-6 : f32
    %255 = vector.broadcast %cst_141 : f32 to vector<64x1xf32>
    %256 = arith.addf %252, %255 : vector<64x1xf32>
    %257 = math.rsqrt %256 : vector<64x1xf32>
    %258 = vector.broadcast %257 : vector<64x1xf32> to vector<64x32xf32>
    %259 = arith.mulf %254, %258 : vector<64x32xf32>
    %260 = vector.extract_strided_slice %8 {offsets = [3, 0], sizes = [1, 32], strides = [1, 1]} : vector<4x32xf32> to vector<1x32xf32>
    %261 = vector.broadcast %260 : vector<1x32xf32> to vector<64x32xf32>
    %262 = arith.mulf %259, %261 : vector<64x32xf32>
    %263 = vector.extract_strided_slice %9 {offsets = [3, 0], sizes = [1, 32], strides = [1, 1]} : vector<4x32xf32> to vector<1x32xf32>
    %264 = vector.broadcast %263 : vector<1x32xf32> to vector<64x32xf32>
    %265 = arith.addf %262, %264 : vector<64x32xf32>
    %c0_142 = arith.constant 0 : index
    %c0_143 = arith.constant 0 : index
    %c0_144 = arith.constant 0 : index
    %266 = vector.load %arg23[%c0_142, %c0_143, %c0_144] : memref<1x8x32xf32, #tpu.memory_space<vmem>>, vector<1x8x32xf32>
    %267 = vector.shape_cast %266 : vector<1x8x32xf32> to vector<8x32xf32>
    %268 = vector.shape_cast %191 : vector<8x32xf32> to vector<1x8x32xf32>
    tpu.vector_store %arg23[%c0_142, %c0_143, %c0_144], %268 {strides = array<i32>} : memref<1x8x32xf32, #tpu.memory_space<vmem>>, vector<1x8x32xf32>,
    %c0_145 = arith.constant 0 : index
    %c0_146 = arith.constant 0 : index
    %c0_147 = arith.constant 0 : index
    %269 = vector.load %arg24[%c0_145, %c0_146, %c0_147] : memref<1x64x32xf32, #tpu.memory_space<vmem>>, vector<1x64x32xf32>
    %270 = vector.shape_cast %269 : vector<1x64x32xf32> to vector<64x32xf32>
    %271 = vector.shape_cast %265 : vector<64x32xf32> to vector<1x64x32xf32>
    tpu.vector_store %arg24[%c0_145, %c0_146, %c0_147], %271 {strides = array<i32>} : memref<1x64x32xf32, #tpu.memory_space<vmem>>, vector<1x64x32xf32>,
    return
  }
  func.func @transform_0(%arg0: i32) -> (i32, i32, i32) {
    %c0_i32 = arith.constant 0 : i32
    %c0_i32_0 = arith.constant 0 : i32
    %c0_i32_1 = arith.constant 0 : i32
    return %arg0, %c0_i32, %c0_i32_0 : i32, i32, i32
  }
  func.func @transform_1(%arg0: i32) -> (i32, i32, i32) {
    %c0_i32 = arith.constant 0 : i32
    %c0_i32_0 = arith.constant 0 : i32
    %c0_i32_1 = arith.constant 0 : i32
    return %arg0, %c0_i32, %c0_i32_0 : i32, i32, i32
  }
  func.func @transform_2(%arg0: i32) -> (i32, i32, i32) {
    %c0_i32 = arith.constant 0 : i32
    %c0_i32_0 = arith.constant 0 : i32
    %c0_i32_1 = arith.constant 0 : i32
    return %arg0, %c0_i32, %c0_i32_0 : i32, i32, i32
  }
  func.func @transform_3(%arg0: i32) -> (i32, i32, i32) {
    %c0_i32 = arith.constant 0 : i32
    %c0_i32_0 = arith.constant 0 : i32
    %c0_i32_1 = arith.constant 0 : i32
    return %arg0, %c0_i32, %c0_i32_0 : i32, i32, i32
  }
  func.func @transform_4(%arg0: i32) -> (i32, i32, i32) {
    %c0_i32 = arith.constant 0 : i32
    %c0_i32_0 = arith.constant 0 : i32
    %c0_i32_1 = arith.constant 0 : i32
    %c0_i32_2 = arith.constant 0 : i32
    return %c0_i32, %c0_i32_0, %c0_i32_1 : i32, i32, i32
  }
  func.func @transform_5(%arg0: i32) -> (i32, i32, i32) {
    %c0_i32 = arith.constant 0 : i32
    %c0_i32_0 = arith.constant 0 : i32
    %c0_i32_1 = arith.constant 0 : i32
    %c0_i32_2 = arith.constant 0 : i32
    return %c0_i32, %c0_i32_0, %c0_i32_1 : i32, i32, i32
  }
  func.func @transform_6(%arg0: i32) -> (i32, i32, i32) {
    %c0_i32 = arith.constant 0 : i32
    %c0_i32_0 = arith.constant 0 : i32
    %c0_i32_1 = arith.constant 0 : i32
    %c0_i32_2 = arith.constant 0 : i32
    return %c0_i32, %c0_i32_0, %c0_i32_1 : i32, i32, i32
  }
  func.func @transform_7(%arg0: i32) -> (i32, i32) {
    %c0_i32 = arith.constant 0 : i32
    %c0_i32_0 = arith.constant 0 : i32
    %c0_i32_1 = arith.constant 0 : i32
    return %c0_i32, %c0_i32_0 : i32, i32
  }
  func.func @transform_8(%arg0: i32) -> (i32, i32, i32) {
    %c0_i32 = arith.constant 0 : i32
    %c0_i32_0 = arith.constant 0 : i32
    %c0_i32_1 = arith.constant 0 : i32
    %c0_i32_2 = arith.constant 0 : i32
    return %c0_i32, %c0_i32_0, %c0_i32_1 : i32, i32, i32
  }
  func.func @transform_9(%arg0: i32) -> (i32, i32, i32) {
    %c0_i32 = arith.constant 0 : i32
    %c0_i32_0 = arith.constant 0 : i32
    %c0_i32_1 = arith.constant 0 : i32
    %c0_i32_2 = arith.constant 0 : i32
    return %c0_i32, %c0_i32_0, %c0_i32_1 : i32, i32, i32
  }
  func.func @transform_10(%arg0: i32) -> (i32, i32, i32) {
    %c0_i32 = arith.constant 0 : i32
    %c0_i32_0 = arith.constant 0 : i32
    %c0_i32_1 = arith.constant 0 : i32
    %c0_i32_2 = arith.constant 0 : i32
    return %c0_i32, %c0_i32_0, %c0_i32_1 : i32, i32, i32
  }
  func.func @transform_11(%arg0: i32) -> (i32, i32) {
    %c0_i32 = arith.constant 0 : i32
    %c0_i32_0 = arith.constant 0 : i32
    %c0_i32_1 = arith.constant 0 : i32
    return %c0_i32, %c0_i32_0 : i32, i32
  }
  func.func @transform_12(%arg0: i32) -> (i32, i32) {
    %c0_i32 = arith.constant 0 : i32
    %c0_i32_0 = arith.constant 0 : i32
    %c0_i32_1 = arith.constant 0 : i32
    return %c0_i32, %c0_i32_0 : i32, i32
  }
  func.func @transform_13(%arg0: i32) -> (i32, i32) {
    %c0_i32 = arith.constant 0 : i32
    %c0_i32_0 = arith.constant 0 : i32
    %c0_i32_1 = arith.constant 0 : i32
    return %c0_i32, %c0_i32_0 : i32, i32
  }
  func.func @transform_14(%arg0: i32) -> (i32, i32) {
    %c0_i32 = arith.constant 0 : i32
    %c0_i32_0 = arith.constant 0 : i32
    %c0_i32_1 = arith.constant 0 : i32
    return %c0_i32, %c0_i32_0 : i32, i32
  }
  func.func @transform_15(%arg0: i32) -> (i32, i32) {
    %c0_i32 = arith.constant 0 : i32
    %c0_i32_0 = arith.constant 0 : i32
    %c0_i32_1 = arith.constant 0 : i32
    return %c0_i32, %c0_i32_0 : i32, i32
  }
  func.func @transform_16(%arg0: i32) -> (i32, i32, i32) {
    %c0_i32 = arith.constant 0 : i32
    %c0_i32_0 = arith.constant 0 : i32
    %c0_i32_1 = arith.constant 0 : i32
    %c0_i32_2 = arith.constant 0 : i32
    return %c0_i32, %c0_i32_0, %c0_i32_1 : i32, i32, i32
  }
  func.func @transform_17(%arg0: i32) -> (i32, i32, i32) {
    %c0_i32 = arith.constant 0 : i32
    %c0_i32_0 = arith.constant 0 : i32
    %c0_i32_1 = arith.constant 0 : i32
    %c0_i32_2 = arith.constant 0 : i32
    return %c0_i32, %c0_i32_0, %c0_i32_1 : i32, i32, i32
  }
  func.func @transform_18(%arg0: i32) -> (i32, i32, i32) {
    %c0_i32 = arith.constant 0 : i32
    %c0_i32_0 = arith.constant 0 : i32
    %c0_i32_1 = arith.constant 0 : i32
    %c0_i32_2 = arith.constant 0 : i32
    return %c0_i32, %c0_i32_0, %c0_i32_1 : i32, i32, i32
  }
  func.func @transform_19(%arg0: i32) -> (i32, i32) {
    %c0_i32 = arith.constant 0 : i32
    %c0_i32_0 = arith.constant 0 : i32
    %c0_i32_1 = arith.constant 0 : i32
    return %c0_i32, %c0_i32_0 : i32, i32
  }
  func.func @transform_20(%arg0: i32) -> (i32, i32) {
    %c0_i32 = arith.constant 0 : i32
    %c0_i32_0 = arith.constant 0 : i32
    %c0_i32_1 = arith.constant 0 : i32
    return %c0_i32, %c0_i32_0 : i32, i32
  }
  func.func @transform_21(%arg0: i32) -> (i32, i32) {
    %c0_i32 = arith.constant 0 : i32
    %c0_i32_0 = arith.constant 0 : i32
    %c0_i32_1 = arith.constant 0 : i32
    return %c0_i32, %c0_i32_0 : i32, i32
  }
  func.func @transform_22(%arg0: i32) -> (i32, i32, i32) {
    %c0_i32 = arith.constant 0 : i32
    %c0_i32_0 = arith.constant 0 : i32
    %c0_i32_1 = arith.constant 0 : i32
    return %arg0, %c0_i32, %c0_i32_0 : i32, i32, i32
  }
  func.func @transform_23(%arg0: i32) -> (i32, i32, i32) {
    %c0_i32 = arith.constant 0 : i32
    %c0_i32_0 = arith.constant 0 : i32
    %c0_i32_1 = arith.constant 0 : i32
    return %arg0, %c0_i32, %c0_i32_0 : i32, i32, i32
  }
}

</mosaic_0001>

<bundles_post_ra>
// kernel: tpu_custom_call.1
= control target key start
LH: loop header
LB: loop body
LE: loop exit
PB: predicated region body
PF: predicated region fallthrough
CT: control target
= control target key end

     0   :  { %s14419_s0 = inlined_call_operand.vmem [shape: f32[2,8,32], index: 0, kind: input, shape index: {}]   ;;  %s14420_s1 = inlined_call_operand.vmem [shape: f32[2,64,32], index: 1, kind: input, shape index: {}]   ;;  %s14421_s2 = inlined_call_operand.vmem [shape: f32[2,8,32], index: 2, kind: input, shape index: {}]   ;;  %s14422_s3 = inlined_call_operand.vmem [shape: f32[2,64,32], index: 3, kind: input, shape index: {}]   ;;  %s14423_s4 = inlined_call_operand.vmem [shape: f32[3,32,32], index: 4, kind: input, shape index: {}]   ;;  %s14424_s5 = inlined_call_operand.vmem [shape: f32[3,1,32], index: 5, kind: input, shape index: {}]   ;;  %s14425_s6 = inlined_call_operand.vmem [shape: f32[4,8,32], index: 6, kind: input, shape index: {}]   ;;  %s14426_s7 = inlined_call_operand.vmem [shape: f32[1,32], index: 7, kind: input, shape index: {}]   ;;  %s14427_s8 = inlined_call_operand.vmem [shape: f32[3,32,16], index: 8, kind: input, shape index: {}]   ;;  %s14428_s9 = inlined_call_operand.vmem [shape: f32[3,1,16], index: 9, kind: input, shape index: {}]   ;;  %s14429_s10 = inlined_call_operand.vmem [shape: f32[4,4,32], index: 10, kind: input, shape index: {}]   ;;  %s14430_s11 = inlined_call_operand.vmem [shape: f32[1,32], index: 11, kind: input, shape index: {}]   ;;  %s14431_s12 = inlined_call_operand.vmem [shape: f32[32,64], index: 12, kind: input, shape index: {}]   ;;  %s14432_s13 = inlined_call_operand.vmem [shape: f32[1,64], index: 13, kind: input, shape index: {}]   ;;  %s14433_s14 = inlined_call_operand.vmem [shape: f32[64,32], index: 14, kind: input, shape index: {}]   ;;  %s14434_s15 = inlined_call_operand.vmem [shape: f32[1,32], index: 15, kind: input, shape index: {}]   ;;  %s14435_s16 = inlined_call_operand.vmem [shape: f32[3,32,16], index: 16, kind: input, shape index: {}]   ;;  %s14436_s17 = inlined_call_operand.vmem [shape: f32[3,1,16], index: 17, kind: input, shape index: {}]   ;;  %s14437_s18 = inlined_call_operand.vmem [shape: f32[4,4,32], index: 18, kind: input, shape index: {}]   ;;  %s14438_s19 = inlined_call_operand.vmem [shape: f32[1,32], index: 19, kind: input, shape index: {}]   ;;  %s14439_s20 = inlined_call_operand.vmem [shape: f32[4,32], index: 20, kind: input, shape index: {}]   ;;  %s14440_s21 = inlined_call_operand.vmem [shape: f32[4,32], index: 21, kind: input, shape index: {}]   ;;  %s14441_s22 = inlined_call_operand.hbm [shape: f32[2,8,32], index: 22, kind: output, shape index: {0}]   ;;  %s14442_s23 = inlined_call_operand.vmem [shape: f32[2,64,32], index: 23, kind: output, shape index: {1}]  }
   0x1   :  { %14464 = sst [smem:[#allocation12_spill]] %s14419_s0 }
   0x2   :  { %14465 = sst [smem:[#allocation13_spill]] %s14420_s1 }
   0x3   :  { %14466 = sst [smem:[#allocation14_spill]] %s14421_s2 }
   0x4   :  { %14467 = sst [smem:[#allocation15_spill]] %s14422_s3 }
   0x5   :  { %14468 = sst [smem:[#allocation16_spill]] %s14423_s4 }
   0x6   :  { %14469 = sst [smem:[#allocation17_spill]] %s14424_s5 }
   0x7   :  { %14470 = sst [smem:[#allocation18_spill]] %s14425_s6 }
   0x8   :  { %14471 = sst [smem:[#allocation19_spill]] %s14426_s7 }
   0x9   :  { %14472 = sst [smem:[#allocation20_spill]] %s14427_s8 }
   0xa   :  { %14473 = sst [smem:[#allocation21_spill]] %s14441_s22 }
   0xb   :  { %14474 = sst [smem:[#allocation22_spill]] %s14442_s23 }
   0xc   :  { %29 = vsyncpa [#allocation3], 0 }
   0xd   :  { %31 = vsyncpa [#allocation3 + $0x1], 0  ;;  %s12128_s4 = smov 0   ;;  %s12130_s30 = smov 0  }
   0xe   :  { %s12132_s24 = smov 0   ;;  %s12134_s25 = smov 0  }
   0xf LB: > { %14475 = sst [smem:[#allocation5_spill]] %s11983_s4  ;;  %s12149_s5 = sadd.s32 4294967295, %s11995_s25   ;;  %s11995_s25 = sphi %s12134_s25, %s14504_s25   ;;  %s11991_s24 = sphi %s12132_s24, %s14506_s24   ;;  %s11987_s30 = sphi %s12130_s30, %s14508_s30   ;;  %s11983_s4 = sphi %s12128_s4, %s14507_s4  }
  0x10   : > { %14476 = sst [smem:[#allocation6_spill]] %s11991_s24  ;;  %s10355_s1 = sadd.s32 4294967294, %s11995_s25  }
  0x11   : > { %14477 = sst [smem:[#allocation7_spill]] %s11995_s25  ;;  %s12153_s26 = sadd.s32 1, %s11995_s25  }
  0x12   : > { %14478 = sst [smem:[#allocation8_spill]] %s12153_s26  ;;  %s526_s2 = sadd.s32 1, %s11991_s24 }
  0x13   : > { %s523_s6 = ssub.s32 %s11995_s25, %s12153_s26  ;;  %p536_p0 = scmp.ne.s32.totalorder %s11991_s24, %s11987_s30 }
  0x14   : > { %p524_p1 = scmp.eq.s32.totalorder %s523_s6, 0  ;;  %p537_p2 = scmp.eq.s32.totalorder %s12149_s5, 1 }
  0x15   : > { %p542_p3 = scmp.ne.s32.totalorder %s11987_s30, %s11983_s4  ;;  %p543_p4 = scmp.eq.s32.totalorder %s10355_s1, 1 }
  0x16   : > { %s12164_s27 = scalar_select %p524_p1, %s11991_s24, %s526_s2  }
  0x17   : > { %p12166_p5 = por %p537_p2, %p536_p0  ;;  %p12170_p6 = por %p543_p4, %p542_p3 }
  0x18   : > { %14479 = sst [smem:[#allocation9_spill]] %s12164_s27  ;;  %p10358_p7 = scmp.ge.s32.totalorder %s11995_s25, 1 }
  0x19   : > { %s14480_s7 = scalar_select %p12166_p5, 1, 0 }
  0x1a   : > { %s14482_s28 = scalar_select %p12170_p6, 1, 0 }
  0x1b   : > { %14481 = sst [smem:[#allocation10_spill]] %s14480_s7  ;;  %p671_p8 = scmp.lt.s32.totalorder %s11995_s25, 3 }
  0x1c   : > { %14483 = sst [smem:[#allocation11_spill]] %s14482_s28 }
  0x1d   : > { %p672_p9 = pnand %p10358_p7, %p671_p8 }
  0x1e   : > { %s14484_s0 = sld [smem:[#allocation16_spill]] (!%p672_p9)  ;;  %v11997_v3 = vmov (!%p672_p9), 0.0|0.0   ;;  %p753_p10 = scmp.lt.s32.totalorder (!%p672_p9), %s12149_s5, 1  ;;  %vm11998_vm0 = vmmov (!%p672_p9), 0   ;;  %v11999_v9 = vmov (!%p672_p9), 0.0   ;;  %vm808_vm1 = vcmask (!%p672_p9), 261120  }
  0x1f   : > { %675 = sbr.rel (%p672_p9) target bundleno = 5687 (0x1637), region = 108  ;;  %11553 = vmatprep.subr.bf16.mxu1 (!%p672_p9), %v11997_v3  ;;  %11547 = vmatprep.subr.bf16.mxu0 (!%p672_p9), %v11997_v3  ;;  %s14485_s27 = sld [smem:[#allocation12_spill]] (!%p672_p9)  ;;  %v12003_v31 = vmov (!%p672_p9), 1983009808   ;;  %v1066_v33 = vlaneseq (!%p672_p9)  ;;  %v12004_v34 = vmov (!%p672_p9), 1934713408  }
  0x20   : > { %10990 = vmatprep.mubr.msk.f32.mxu1 (!%p672_p9), %vm11998_vm0, %v11999_v9  ;;  %10979 = vmatprep.mubr.msk.f32.mxu0 (!%p672_p9), %vm11998_vm0, %v11999_v9  ;;  %s14486_s28 = sld [smem:[#allocation14_spill]] (!%p672_p9)  ;;  %s14487_s1 = sld [smem:[#allocation17_spill]] (!%p672_p9)  ;;  %v1064_v32 = vunpack.c.l.s4 (!%p672_p9), %v12003_v31  ;;  %v1096_v35 = vunpack.c.l.s4 (!%p672_p9), %v12004_v34  ;;  %vm1489_vm2 = vcmask (!%p672_p9), 64512   ;;  %vm5329_vm3 = vcmask (!%p672_p9), 31744  }
  0x21   : > { %s14455_s24 = smov (!%p672_p9), 120   ;;  %s12002_s26 = smov (!%p672_p9), 112   ;;  %v12266_v37 = vshrl.u32 (!%p672_p9), %v1066_v33, 7  ;;  %vm12783_vm4 = vmpackc.low (!%p672_p9), %vm5329_vm3, %vm5329_vm3  ;;  %vm5722_vm5 = vcmask (!%p672_p9), 523264   ;;  %vm6066_vm6 = vcmask (!%p672_p9), 1043456  }
  0x22   : > { %v1065_v36 = vunpack.c.0.s8 (!%p672_p9), %v1064_v32  ;;  %v1097_v40 = vunpack.c.0.s8 (!%p672_p9), %v1096_v35  ;;  %s14489_s8 = sld [smem:[#allocation20_spill]] (!%p672_p9)  ;;  %s14490_s25 = sld [smem:[#allocation19_spill]] (!%p672_p9) }
  0x23   : > { %s14492_s22 = sld [smem:[#allocation15_spill]] (!%p672_p9) }
  0x24   : > { %v10370_v0 = vld [vmem:[%s14484_s0 + $0x20] sm:$0xff] (!%p672_p9)  ;;  %v10371_v1 = vld [vmem:[%s14484_s0 + $0x28] sm:$0xff] (!%p672_p9)  ;;  %v10372_v6 = vld [vmem:[%s14484_s0 + $0x30] sm:$0xff] (!%p672_p9)  ;;  %v12269_v41 = vsub.s32 (!%p672_p9), %v1065_v36, %v12266_v37  ;;  %v12272_v48 = vsub.s32 (!%p672_p9), %v1097_v40, %v12266_v37 }
  0x25   : > { %v797_v2 = vld [vmem:[%s14484_s0] sm:$0xff] (!%p672_p9)  ;;  %v11554_v4 = vpack.c.bf16 (!%p672_p9), %v10371_v1, %v10370_v0  ;;  %v798_v5 = vld [vmem:[%s14484_s0 + $0x8] sm:$0xff] (!%p672_p9)  ;;  %v10373_v7 = vld [vmem:[%s14484_s0 + $0x38] sm:$0xff] (!%p672_p9) }
  0x26   : > { %v11548_v8 = vpack.c.bf16 %v798_v5, %v797_v2  ;;  %v799_v10 = vld [vmem:[%s14484_s0 + $0x10] sm:$0xff]  ;;  %v800_v11 = vld [vmem:[%s14484_s0 + $0x18] sm:$0xff]  ;;  %v11557_v12 = vpack.c.bf16 %v10373_v7, %v10372_v6  ;;  %s12208_s29 = scalar_select %p753_p10, %s12149_s5, 1  ;;  %v10375_v17 = vld [vmem:[%s14487_s1 + $0x1] ss:$0 sm:$0xff] }
  0x27   : > { %11555 = vmatpush3.bf16.msra.mxu1 %v11554_v4  ;;  %v11551_v13 = vpack.c.bf16 %v800_v11, %v799_v10  ;;  %v10368_v19 = vld [vmem:[%s14487_s1] ss:$0 sm:$0xff]  ;;  %v10378_v26 = vld [vmem:[%s14484_s0 + $0x48] sm:$0xff]  ;;  %v10379_v27 = vld [vmem:[%s14484_s0 + $0x50] sm:$0xff] }
  0x28   : > { %11549 = vmatpush3.bf16.msra.mxu0 %v11548_v8  ;;  %11556 = vmatprep.subr.bf16.mxu1 %v11997_v3  ;;  %s10360_s3 = sshll.u32 %s12208_s29, 3  ;;  %v10377_v25 = vld [vmem:[%s14484_s0 + $0x40] sm:$0xff]  ;;  %v10380_v29 = vld [vmem:[%s14484_s0 + $0x58] sm:$0xff]  ;;  %s12432_s7 = sshll.u32 %s12208_s29, 6 }
  0x29   : > { %11550 = vmatprep.subr.bf16.mxu0 %v11997_v3  ;;  %s756_s6 = scalar_lea.vmem %s14485_s27, %s10360_s3  ;;  %s12219_s4 = scalar_lea.vmem %s14486_s28, %s10360_s3  ;;  %v11560_v28 = vpack.c.bf16 %v10378_v26, %v10377_v25  ;;  %v11563_v30 = vpack.c.bf16 %v10380_v29, %v10379_v27 }
  0x2a   : > { %v12221_v14 = vld [vmem:[%s756_s6] sm:$0xff]  ;;  %s12000_s6 = smov 104   ;;  %s14491_s3 = sld [smem:[#allocation13_spill]] }
  0x2b   : > { %11558 = vmatpush3.bf16.msra.mxu1 %v11557_v12  ;;  %v12224_v15 = vld [vmem:[%s12219_s4] sm:$0xff]  ;;  %s770_s23 = scalar_lea.vmem %s14492_s22, %s12432_s7  ;;  %s14493_s27 = smov 120  }
  0x2c   : > { %11552 = vmatpush3.bf16.msra.mxu0 %v11551_v13  ;;  %11004 = vmatprep.subr.mxu1 %v11999_v9  ;;  %v796_v16 = vadd.f32 %v12224_v15, %v12221_v14  ;;  %s14457_s22 = smov 116   ;;  %s14497_s29 = smov 116  }
  0x2d   : > { %11559 = vmatprep.subr.bf16.mxu0 %v11997_v3 }
  0x2e   : > { %10991 = vmatmul.mubr.msk.f32.vlgmr.msra.gmra.mrb[0].mxu1 %vm808_vm1, %v796_v16 }
  0x2f   : > { %10980 = vmatmul.mubr.msk.f32.vlgmr.msra.gmra.mrb[0].mxu0 %vm808_vm1, %v796_v16  ;;  %11006 = vmatprep.mubr.msk.f32.mxu1 %vm11998_vm0, %v11999_v9 }
  0x30   : > { %11001 = vmatprep.mubr.msk.f32.mxu0 %vm11998_vm0, %v11999_v9  ;;  %11561 = vmatpush3.bf16.msra.mxu0 %v11560_v28  ;;  %s12438_s2 = scalar_lea.vmem %s14491_s3, %s12432_s7  ;;  %s14459_s3 = smov 124  }
  0x31   : > { %11562 = vmatprep.subr.bf16.mxu0 %v11997_v3 }
  0x34   : > { %11564 = vmatpush3.bf16.msra.mxu0 %v11563_v30 }
  0x35   : > { %11024 = vmatprep.subr.mxu0 %v11999_v9 }
  0x37   : > { %11002 = vmatmul.mubr.msk.f32.vlgmr.msra.gmra.mrb[2].mxu0 %vm808_vm1, %v12221_v14 }
  0x38   : > { %11026 = vmatprep.mubr.msk.f32.mxu0 %vm11998_vm0, %v11999_v9 }
 0x101   : > { %v961_v18 = vpop.f32.mrb[0].mxu1 }
 0x102   : > { %v878_v20 = vpop.f32.mrb[0].mxu0  ;;  %v962_v21 = vadd.f32 %v10375_v17, %v961_v18  ;;  %v10992_v22 = vpop.f32.mrb[1].mxu1 }
 0x103   : > { %v10981_v23 = vpop.f32.mrb[1].mxu0  ;;  %v879_v24 = vadd.f32 %v10368_v19, %v878_v20 }
 0x104   : > { %1204 = vrot.lane.b32.xlu1 %v962_v21, %s12000_s6  ;;  %1198 = vrot.lane.b32.xlu0 %v962_v21, %s14455_s24 }
 0x108   : > { %1201 = vrot.lane.b32.xlu0 %v962_v21, %s12002_s26  ;;  %1052 = vrot.lane.b32.xlu1 %v879_v24, %s14455_s24 }
 0x10c   : > { %1055 = vrot.lane.b32.xlu0 %v879_v24, %s12002_s26  ;;  %1058 = vrot.lane.b32.xlu1 %v879_v24, %s12000_s6 }
 0x176   : > { %v1205_v38 = vpop.permute.xlu1 %1204  ;;  %v1199_v39 = vpop.permute.xlu0 %1198 }
 0x177   : > { %v1223_v42 = vcombine.low %v1199_v39, %v1205_v38  ;;  %v1224_v43 = vcombine.high %v1199_v39, %v1205_v38 }
 0x179   : > { %v1231_v49 = vrot.slane %v1223_v42, %v12269_v41  ;;  %v1238_v50 = vrot.slane %v1224_v43, %v12269_v41 }
 0x17a   : > { %v1202_v44 = vpop.permute.xlu0 %1201  ;;  %v1053_v45 = vpop.permute.xlu1 %1052 }
 0x17b   : > { %v1207_v46 = vcombine.low %v962_v21, %v1202_v44  ;;  %v1208_v47 = vcombine.high %v962_v21, %v1202_v44 }
 0x17d   : > { %v1215_v51 = vrot.slane %v1207_v46, %v12269_v41  ;;  %v1222_v52 = vrot.slane %v1208_v47, %v12269_v41 }
 0x17e   : > { %v1056_v53 = vpop.permute.xlu0 %1055  ;;  %v1059_v54 = vpop.permute.xlu1 %1058 }
 0x17f   : > { %v1239_v55 = vcombine.low %v1215_v51, %v1231_v49  ;;  %v1240_v56 = vcombine.high %v1215_v51, %v1231_v49  ;;  %v1255_v57 = vcombine.low %v1222_v52, %v1238_v50  ;;  %v1256_v58 = vcombine.high %v1222_v52, %v1238_v50 }
 0x180   : > { %v1061_v59 = vcombine.low %v879_v24, %v1056_v53  ;;  %v1062_v60 = vcombine.high %v879_v24, %v1056_v53  ;;  %v1077_v61 = vcombine.low %v1053_v45, %v1059_v54  ;;  %v1078_v62 = vcombine.high %v1053_v45, %v1059_v54 }
 0x181   : > { %v1247_v63 = vrot.slane %v1239_v55, %v12272_v48  ;;  %v1254_v0 = vrot.slane %v1240_v56, %v12272_v48  ;;  %v1263_v1 = vrot.slane %v1255_v57, %v12272_v48  ;;  %v1270_v2 = vrot.slane %v1256_v58, %v12272_v48 }
 0x182   : > { %v1069_v4 = vrot.slane %v1061_v59, %v12269_v41  ;;  %v1076_v5 = vrot.slane %v1062_v60, %v12269_v41  ;;  %v1085_v6 = vrot.slane %v1077_v61, %v12269_v41  ;;  %v1092_v7 = vrot.slane %v1078_v62, %v12269_v41  ;;  %v1047_v62 = vpop.f32.mrb[2].mxu0 }
 0x183   : > { %v1275_v8 = vcombine.low %v1247_v63, %v1254_v0  ;;  %v10386_v10 = vcombine.high %v1247_v63, %v1254_v0  ;;  %v1291_v11 = vcombine.low %v1263_v1, %v1270_v2  ;;  %v10387_v12 = vcombine.high %v1263_v1, %v1270_v2  ;;  %v11003_v63 = vpop.f32.mrb[3].mxu0 }
 0x184   : > { %v1093_v13 = vcombine.low %v1069_v4, %v1085_v6  ;;  %v1094_v16 = vcombine.high %v1069_v4, %v1085_v6  ;;  %v1109_v17 = vcombine.low %v1076_v5, %v1092_v7  ;;  %v1110_v18 = vcombine.high %v1076_v5, %v1092_v7 }
 0x185   : > { %v1282_v19 = vrot.slane %v1275_v8, %v12269_v41  ;;  %v1290_v20 = vrot.slane %v10386_v10, %v12269_v41  ;;  %v1298_v21 = vrot.slane %v1291_v11, %v12269_v41  ;;  %v1306_v22 = vrot.slane %v10387_v12, %v12269_v41 }
 0x186   : > { %v1101_v23 = vrot.slane %v1093_v13, %v12272_v48  ;;  %v1108_v24 = vrot.slane %v1094_v16, %v12272_v48  ;;  %v1117_v25 = vrot.slane %v1109_v17, %v12272_v48  ;;  %v1124_v26 = vrot.slane %v1110_v18, %v12272_v48 }
 0x187   : > { %v1307_v27 = vcombine.low %v1282_v19, %v1290_v20  ;;  %v1323_v28 = vcombine.low %v1298_v21, %v1306_v22  ;;  %v1308_v44 = vcombine.high %v1282_v19, %v1290_v20  ;;  %v1324_v45 = vcombine.high %v1298_v21, %v1306_v22  ;;  %v10382_v20 = vld [vmem:[%s14487_s1 + $0x2] ss:$0 sm:$0xff] }
 0x188   : > { %v1129_v29 = vcombine.low %v1101_v23, %v1108_v24  ;;  %v10384_v30 = vcombine.high %v1101_v23, %v1108_v24  ;;  %v1145_v31 = vcombine.low %v1117_v25, %v1124_v26  ;;  %v10385_v32 = vcombine.high %v1117_v25, %v1124_v26 }
 0x189   : > { %v1315_v33 = vrot.slane %v1307_v27, %v12272_v48  ;;  %v1331_v34 = vrot.slane %v1323_v28, %v12272_v48  ;;  %v1322_v53 = vrot.slane %v1308_v44, %v12272_v48  ;;  %v1338_v54 = vrot.slane %v1324_v45, %v12272_v48 }
 0x18a   : > { %v1136_v35 = vrot.slane %v1129_v29, %v12269_v41  ;;  %v1144_v36 = vrot.slane %v10384_v30, %v12269_v41  ;;  %v1152_v38 = vrot.slane %v1145_v31, %v12269_v41  ;;  %v1160_v39 = vrot.slane %v10385_v32, %v12269_v41 }
 0x18b   : > { %v1339_v40 = vcombine.low %v1315_v33, %v1331_v34  ;;  %v1340_v52 = vcombine.high %v1315_v33, %v1331_v34  ;;  %v1341_v58 = vcombine.low %v1322_v53, %v1338_v54  ;;  %v1342_v60 = vcombine.high %v1322_v53, %v1338_v54 }
 0x18c   : > { %v1161_v42 = vcombine.low %v1136_v35, %v1144_v36  ;;  %v1177_v43 = vcombine.low %v1152_v38, %v1160_v39  ;;  %v1162_v49 = vcombine.high %v1136_v35, %v1144_v36  ;;  %v1178_v50 = vcombine.high %v1152_v38, %v1160_v39 }
 0x18d   : > { %11005 = vmatpush3.xpose.msk.msra.mxu1 %vm1489_vm2, %v1339_v40  ;;  %v1048_v21 = vadd.f32 %v10382_v20, %v1047_v62 }
 0x18e   : > { %11009 = vmatprep.subr.mxu1 %v11999_v9  ;;  %v1169_v46 = vrot.slane %v1161_v42, %v12272_v48  ;;  %v1185_v47 = vrot.slane %v1177_v43, %v12272_v48  ;;  %v1176_v56 = vrot.slane %v1162_v49, %v12272_v48  ;;  %v1192_v57 = vrot.slane %v1178_v50, %v12272_v48 }
 0x190   : > { %v1193_v51 = vcombine.low %v1169_v46, %v1185_v47  ;;  %v1194_v55 = vcombine.high %v1169_v46, %v1185_v47  ;;  %v1195_v59 = vcombine.low %v1176_v56, %v1192_v57  ;;  %v1196_v61 = vcombine.high %v1176_v56, %v1192_v57 }
 0x192   : > { %11007 = vmatmul.mubr.msk.f32.vlgmr.msra.gmra.mrb[2].mxu1 %vm1489_vm2, %v1193_v51 }
 0x193   : > { %11010 = vmatpush3.xpose.msk.msra.mxu1 %vm1489_vm2, %v1340_v52  ;;  %11011 = vmatprep.mubr.msk.f32.mxu1 %vm11998_vm0, %v11999_v9 }
 0x194   : > { %11014 = vmatprep.subr.mxu1 %v11999_v9 }
 0x196   : > { %11012 = vmatmul.mubr.msk.f32.vlgmr.msra.gmra.mrb[4].mxu1 %vm1489_vm2, %v1194_v55 }
 0x197   : > { %11015 = vmatpush3.xpose.msk.msra.mxu1 %vm1489_vm2, %v1341_v58  ;;  %11016 = vmatprep.mubr.msk.f32.mxu1 %vm11998_vm0, %v11999_v9 }
 0x198   : > { %11019 = vmatprep.subr.mxu1 %v11999_v9 }
 0x19a   : > { %11017 = vmatmul.mubr.msk.f32.vlgmr.msra.gmra.mrb[6].mxu1 %vm1489_vm2, %v1195_v59 }
 0x19b   : > { %11020 = vmatpush3.xpose.msk.msra.mxu1 %vm1489_vm2, %v1342_v60  ;;  %11021 = vmatprep.mubr.msk.f32.mxu1 %vm11998_vm0, %v11999_v9 }
 0x19c   : > { %11029 = vmatprep.subr.mxu1 %v11999_v9 }
 0x19e   : > { %11022 = vmatmul.mubr.msk.f32.vlgmr.msra.gmra.mrb[8].mxu1 %vm1489_vm2, %v1196_v61 }
 0x19f   : > { %11031 = vmatprep.mubr.msk.f32.mxu1 %vm11998_vm0, %v11999_v9 }
 0x265   : > { %v1562_v0 = vpop.f32.mrb[2].mxu1 }
 0x266   : > { %v1794_v1 = vmul.f32 0.35355338, %v1562_v0  ;;  %v11008_v2 = vpop.f32.mrb[3].mxu1 }
 0x268   : > { %v1798_v4 = vsel %vm1489_vm2, %v1794_v1, -inf }
 0x269   : > { %1799 = vmax.xlane.f32.xlu0 %v1798_v4  ;;  %v1638_v5 = vpop.f32.mrb[4].mxu1 }
 0x26a   : > { %v1795_v6 = vmul.f32 0.35355338, %v1638_v5  ;;  %v11013_v7 = vpop.f32.mrb[5].mxu1 }
 0x26c   : > { %v1801_v8 = vsel %vm1489_vm2, %v1795_v6, -inf }
 0x26d   : > { %1802 = vmax.xlane.f32.xlu1 %v1801_v8  ;;  %v1714_v10 = vpop.f32.mrb[6].mxu1 }
 0x26e   : > { %v1796_v11 = vmul.f32 0.35355338, %v1714_v10  ;;  %v11018_v12 = vpop.f32.mrb[7].mxu1 }
 0x270   : > { %v1804_v13 = vsel %vm1489_vm2, %v1796_v11, -inf }
 0x271   : > { %1805 = vmax.xlane.f32.xlu0 %v1804_v13  ;;  %v1790_v16 = vpop.f32.mrb[8].mxu1 }
 0x272   : > { %v1797_v17 = vmul.f32 0.35355338, %v1790_v16  ;;  %v11023_v18 = vpop.f32.mrb[9].mxu1 }
 0x274   : > { %v1807_v19 = vsel %vm1489_vm2, %v1797_v17, -inf }
 0x275   : > { %1808 = vmax.xlane.f32.xlu0 %v1807_v19 }
 0x27e   : > { %1344 = vrot.lane.b32.xlu1 %v1048_v21, %s14455_s24 }
 0x2f6   : > { %v1800_v22 = vpop.xlane.xlu0 %1799 }
 0x2f7   : > { %v1810_v23 = vsub.f32 %v1794_v1, %v1800_v22 }
 0x2f9   : > { %v1814_v24 = vmul.f32 1.442695, %v1810_v23 }
 0x2fa   : > { %v1803_v25 = vpop.xlane.xlu1 %1802 }
 0x2fb   : > { %11850 = vpow2.f32 %v1814_v24  ;;  %v1811_v26 = vsub.f32 %v1795_v6, %v1803_v25 }
 0x2fd   : > { %v1816_v27 = vmul.f32 1.442695, %v1811_v26 }
 0x2fe   : > { %v1806_v28 = vpop.xlane.xlu0 %1805  ;;  %v1345_v44 = vpop.permute.xlu1 %1344 }
 0x2ff   : > { %11852 = vpow2.f32 %v1816_v27  ;;  %v1812_v29 = vsub.f32 %v1796_v11, %v1806_v28 }
 0x301   : > { %v1818_v30 = vmul.f32 1.442695, %v1812_v29 }
 0x302   : > { %v1809_v31 = vpop.xlane.xlu0 %1808 }
 0x303   : > { %11854 = vpow2.f32 %v1818_v30  ;;  %v1813_v32 = vsub.f32 %v1797_v17, %v1809_v31 }
 0x305   : > { %v12334_v33 = vpop.eup %11850  ;;  %v1820_v34 = vmul.f32 1.442695, %v1813_v32 }
 0x306   : > { %v1822_v35 = vsel %vm1489_vm2, %v12334_v33, 0.0 }
 0x307   : > { %11856 = vpow2.f32 %v1820_v34  ;;  %1823 = vadd.xlane.f32.xlu1 %v1822_v35 }
 0x309   : > { %v11853_v36 = vpop.eup %11852 }
 0x30a   : > { %v1825_v38 = vsel %vm1489_vm2, %v11853_v36, 0.0 }
 0x30b   : > { %1826 = vadd.xlane.f32.xlu0 %v1825_v38 }
 0x30d   : > { %v12339_v39 = vpop.eup %11854 }
 0x30e   : > { %v1828_v40 = vsel %vm1489_vm2, %v12339_v39, 0.0 }
 0x30f   : > { %1829 = vadd.xlane.f32.xlu1 %v1828_v40 }
 0x311   : > { %v12343_v42 = vpop.eup %11856 }
 0x312   : > { %v1831_v43 = vsel %vm1489_vm2, %v12343_v42, 0.0 }
 0x313   : > { %1832 = vadd.xlane.f32.xlu0 %v1831_v43 }
 0x320   : > { %1350 = vrot.lane.b32.xlu1 %v1048_v21, %s12000_s6  ;;  %s14488_s6 = sld [smem:[#allocation18_spill]] }
 0x326   : > { %v2137_v43 = vld [vmem:[%s14488_s6 + $0x18] sm:$0xff] }
 0x329   : > { %1347 = vrot.lane.b32.xlu0 %v1048_v21, %s12002_s26 }
 0x394   : > { %v1824_v45 = vpop.xlane.xlu1 %1823 }
 0x395   : > { %11858 = vrcp.f32 %v1824_v45 }
 0x398   : > { %v1827_v46 = vpop.xlane.xlu0 %1826 }
 0x399   : > { %11860 = vrcp.f32 %v1827_v46 }
 0x39c   : > { %v1830_v47 = vpop.xlane.xlu1 %1829 }
 0x39d   : > { %11862 = vrcp.f32 %v1830_v47 }
 0x39f   : > { %v11859_v16 = vpop.eup %11858 }
 0x3a0   : > { %v1833_v49 = vpop.xlane.xlu0 %1832  ;;  %v1351_v50 = vpop.permute.xlu1 %1350  ;;  %v1835_v30 = vmul.f32 %v11859_v16, %v12334_v33  ;;  %v2134_v33 = vld [vmem:[%s14488_s6] sm:$0xff] }
 0x3a1   : > { %v1369_v51 = vcombine.low %v1345_v44, %v1351_v50  ;;  %v1370_v52 = vcombine.high %v1345_v44, %v1351_v50  ;;  %11864 = vrcp.f32 %v1833_v49  ;;  %v786_v16 = vld [vmem:[%s770_s23] sm:$0xff] }
 0x3a3   : > { %v1377_v56 = vrot.slane %v1369_v51, %v12269_v41  ;;  %v1384_v57 = vrot.slane %v1370_v52, %v12269_v41  ;;  %v10409_v51 = vld [vmem:[%s14489_s8 + $0x20] sm:$0xff]  ;;  %v10410_v52 = vld [vmem:[%s14489_s8 + $0x28] sm:$0xff] }
 0x3a4   : > { %v1348_v53 = vpop.permute.xlu0 %1347 }
 0x3a5   : > { %v1353_v54 = vcombine.low %v1048_v21, %v1348_v53  ;;  %v1354_v55 = vcombine.high %v1048_v21, %v1348_v53  ;;  %v11861_v21 = vpop.eup %11860  ;;  %v10411_v53 = vld [vmem:[%s14489_s8 + $0x30] sm:$0xff] }
 0x3a6   : > { %v1837_v31 = vmul.f32 %v11861_v21, %v11853_v36  ;;  %v2135_v36 = vld [vmem:[%s14488_s6 + $0x8] sm:$0xff]  ;;  %v12461_v21 = vld [vmem:[%s12438_s2 + $0x10] sm:$0xff] }
 0x3a7   : > { %v1361_v58 = vrot.slane %v1353_v54, %v12269_v41  ;;  %v1368_v59 = vrot.slane %v1354_v55, %v12269_v41  ;;  %v11863_v24 = vpop.eup %11862  ;;  %v11571_v54 = vpack.c.bf16 %v10410_v52, %v10409_v51  ;;  %v10412_v55 = vld [vmem:[%s14489_s8 + $0x38] sm:$0xff] }
 0x3a8   : > { %v1839_v38 = vmul.f32 %v11863_v24, %v12339_v39  ;;  %v2136_v39 = vld [vmem:[%s14488_s6 + $0x10] sm:$0xff]  ;;  %v2482_v51 = vld [vmem:[%s14489_s8 + $0x18] sm:$0xff]  ;;  %s10673_s6 = sshll.u32 %s12149_s5, 7 }
 0x3a9   : > { %v1385_v60 = vcombine.low %v1361_v58, %v1377_v56  ;;  %v1386_v61 = vcombine.high %v1361_v58, %v1377_v56  ;;  %v1401_v62 = vcombine.low %v1368_v59, %v1384_v57  ;;  %v1402_v63 = vcombine.high %v1368_v59, %v1384_v57 }
 0x3aa   : > { %v11575_v56 = vpack.c.bf16 %v10412_v55, %v10411_v53  ;;  %v10423_v53 = vld [vmem:[%s14489_s8 + $0x40] sm:$0xff] }
 0x3ab   : > { %v1393_v0 = vrot.slane %v1385_v60, %v12272_v48  ;;  %v1400_v1 = vrot.slane %v1386_v61, %v12272_v48  ;;  %v1409_v2 = vrot.slane %v1401_v62, %v12272_v48  ;;  %v1416_v4 = vrot.slane %v1402_v63, %v12272_v48  ;;  %v11865_v29 = vpop.eup %11864 }
 0x3ac   : > { %v1841_v35 = vmul.f32 %v11865_v29, %v12343_v42 }
 0x3ad   : > { %v1421_v5 = vcombine.low %v1393_v0, %v1400_v1  ;;  %v10388_v6 = vcombine.high %v1393_v0, %v1400_v1  ;;  %v1437_v7 = vcombine.low %v1409_v2, %v1416_v4  ;;  %v10389_v8 = vcombine.high %v1409_v2, %v1416_v4 }
 0x3af   : > { %v1428_v10 = vrot.slane %v1421_v5, %v12269_v41  ;;  %v1436_v11 = vrot.slane %v10388_v6, %v12269_v41  ;;  %v1444_v12 = vrot.slane %v1437_v7, %v12269_v41  ;;  %v1452_v13 = vrot.slane %v10389_v8, %v12269_v41  ;;  %v10406_v8 = vld [vmem:[%s14490_s25] ss:$0 sm:$0xff] }
 0x3b1   : > { %v1453_v17 = vcombine.low %v1428_v10, %v1436_v11  ;;  %v1469_v18 = vcombine.low %v1444_v12, %v1452_v13  ;;  %v1454_v19 = vcombine.high %v1428_v10, %v1436_v11  ;;  %v1470_v20 = vcombine.high %v1444_v12, %v1452_v13 }
 0x3b3   : > { %v1461_v22 = vrot.slane %v1453_v17, %v12272_v48  ;;  %v1477_v23 = vrot.slane %v1469_v18, %v12272_v48  ;;  %v1468_v25 = vrot.slane %v1454_v19, %v12272_v48  ;;  %v1484_v26 = vrot.slane %v1470_v20, %v12272_v48  ;;  %v12451_v18 = vld [vmem:[%s12438_s2 + $0x8] sm:$0xff] }
 0x3b4   : > { %v787_v19 = vld [vmem:[%s770_s23 + $0x8] sm:$0xff] }
 0x3b5   : > { %v1485_v27 = vcombine.low %v1461_v22, %v1477_v23  ;;  %v1486_v28 = vcombine.high %v1461_v22, %v1477_v23  ;;  %v1487_v32 = vcombine.low %v1468_v25, %v1484_v26  ;;  %v1488_v34 = vcombine.high %v1468_v25, %v1484_v26  ;;  %v788_v22 = vld [vmem:[%s770_s23 + $0x10] sm:$0xff]  ;;  %v12464_v23 = vld [vmem:[%s12438_s2 + $0x18] sm:$0xff]  ;;  %v12470_v26 = vld [vmem:[%s12438_s2 + $0x20] sm:$0xff] }
 0x3b6   : > { %v12454_v20 = vadd.f32 %v787_v19, %v12451_v18  ;;  %v12467_v24 = vadd.f32 %v788_v22, %v12461_v21  ;;  %v789_v25 = vld [vmem:[%s770_s23 + $0x18] sm:$0xff]  ;;  %v794_v19 = vld [vmem:[%s14439_s20] sm:$0xf] }
 0x3b7   : > { %11025 = vmatpush3.msra.mxu0 %v1485_v27  ;;  %11030 = vmatpush3.msra.mxu1 %v1486_v28  ;;  %v790_v27 = vld [vmem:[%s770_s23 + $0x20] sm:$0xff]  ;;  %v12473_v28 = vadd.f32 %v789_v25, %v12464_v23 }
 0x3b8   : > { %11027 = vmatmul.mubr.msk.f32.vlgmr.msra.gmra.mrb[4].mxu0 %vm1489_vm2, %v1835_v30  ;;  %11032 = vmatmul.mubr.msk.f32.vlgmr.msra.gmra.mrb[10].mxu1 %vm1489_vm2, %v1837_v31  ;;  %v12476_v29 = vadd.f32 %v790_v27, %v12470_v26  ;;  %v12479_v30 = vld [vmem:[%s12438_s2 + $0x28] sm:$0xff]  ;;  %v795_v22 = vld [vmem:[%s14440_s21] sm:$0xf] }
 0x3b9   : > { %11034 = vmatprep.subr.mxu0 %v11999_v9  ;;  %11039 = vmatprep.subr.mxu1 %v11999_v9  ;;  %v791_v31 = vld [vmem:[%s770_s23 + $0x28] sm:$0xff] }
 0x3ba   : > { %11035 = vmatpush3.msra.mxu0 %v1487_v32  ;;  %11040 = vmatpush3.msra.mxu1 %v1488_v34  ;;  %v12482_v32 = vld [vmem:[%s12438_s2 + $0x30] sm:$0xff] }
 0x3bb   : > { %11036 = vmatprep.mubr.msk.f32.mxu0 %vm11998_vm0, %v11999_v9  ;;  %11041 = vmatprep.mubr.msk.f32.mxu1 %vm11998_vm0, %v11999_v9  ;;  %v792_v34 = vld [vmem:[%s770_s23 + $0x30] sm:$0xff] }
 0x3bc   : > { %11037 = vmatmul.mubr.msk.f32.vlgmr.msra.gmra.mrb[6].mxu0 %vm1489_vm2, %v1839_v38  ;;  %11042 = vmatmul.mubr.msk.f32.vlgmr.msra.gmra.mrb[12].mxu1 %vm1489_vm2, %v1841_v35  ;;  %v12489_v35 = vadd.f32 %v791_v31, %v12479_v30  ;;  %v12494_v38 = vadd.f32 %v792_v34, %v12482_v32 }
 0x3bd   : > { %11044 = vmatprep.subr.mxu0 %v11999_v9  ;;  %11049 = vmatprep.subr.mxu1 %v11999_v9 }
 0x3be   : > { %11046 = vmatprep.mubr.msk.f32.mxu0 %vm11998_vm0, %v11999_v9  ;;  %11051 = vmatprep.mubr.msk.f32.mxu1 %vm11998_vm0, %v11999_v9 }
 0x3bf   : > { %11045 = vmatpush3.msra.mxu0 %v2134_v33  ;;  %11050 = vmatpush3.msra.mxu1 %v2135_v36  ;;  %v12497_v33 = vld [vmem:[%s12438_s2 + $0x38] sm:$0xff] }
 0x3c0   : > { %11054 = vmatprep.subr.mxu0 %v11999_v9  ;;  %11059 = vmatprep.subr.mxu1 %v11999_v9  ;;  %v793_v36 = vld [vmem:[%s770_s23 + $0x38] sm:$0xff]  ;;  %s14496_s23 = smov 124  }
 0x48b   : > { %v1911_v40 = vpop.f32.mrb[4].mxu0  ;;  %v1984_v42 = vpop.f32.mrb[10].mxu1 }
 0x48c   : > { %v11028_v44 = vpop.f32.mrb[5].mxu0  ;;  %v11033_v45 = vpop.f32.mrb[11].mxu1  ;;  %11047 = vmatmul.mubr.msk.f32.vlgmr.msra.gmra.mrb[8].mxu0 %vm1489_vm2, %v1911_v40  ;;  %11052 = vmatmul.mubr.msk.f32.vlgmr.msra.gmra.mrb[14].mxu1 %vm1489_vm2, %v1984_v42 }
 0x48d   : > { %11055 = vmatpush3.msra.mxu0 %v2136_v39  ;;  %11056 = vmatprep.mubr.msk.f32.mxu0 %vm11998_vm0, %v11999_v9  ;;  %v12502_v39 = vadd.f32 %v793_v36, %v12497_v33 }
 0x48e   : > { %11060 = vmatpush3.msra.mxu1 %v2137_v43  ;;  %11061 = vmatprep.mubr.msk.f32.mxu1 %vm11998_vm0, %v11999_v9 }
 0x48f   : > { %v2057_v46 = vpop.f32.mrb[6].mxu0  ;;  %v2130_v47 = vpop.f32.mrb[12].mxu1  ;;  %11565 = vmatprep.subr.bf16.mxu0 %v11997_v3  ;;  %11572 = vmatprep.subr.bf16.mxu1 %v11571_v54 }
 0x490   : > { %v11038_v49 = vpop.f32.mrb[7].mxu0  ;;  %v11043_v50 = vpop.f32.mrb[13].mxu1  ;;  %11057 = vmatmul.mubr.msk.f32.vlgmr.msra.gmra.mrb[10].mxu0 %vm1489_vm2, %v2057_v46  ;;  %11062 = vmatmul.mubr.msk.f32.vlgmr.msra.gmra.mrb[16].mxu1 %vm1489_vm2, %v2130_v47  ;;  %v2479_v46 = vld [vmem:[%s14489_s8] sm:$0xff]  ;;  %v2480_v47 = vld [vmem:[%s14489_s8 + $0x8] sm:$0xff] }
 0x491   : > { %11072 = vmatprep.mubr.msk.f32.mxu0 %vm11998_vm0, %v11999_v9  ;;  %11574 = vmatpush3.bf16.msra.mxu1 %v11571_v54  ;;  %v11566_v49 = vpack.c.bf16 %v2480_v47, %v2479_v46  ;;  %v2481_v50 = vld [vmem:[%s14489_s8 + $0x10] sm:$0xff]  ;;  %v10424_v54 = vld [vmem:[%s14489_s8 + $0x48] sm:$0xff] }
 0x492   : > { %11576 = vmatprep.subr.bf16.mxu1 %v11575_v56  ;;  %v11569_v52 = vpack.c.bf16 %v2482_v51, %v2481_v50  ;;  %v12534_v55 = vpack.c.bf16 %v10424_v54, %v10423_v53 }
 0x493   : > { %11567 = vmatpush3.bf16.msra.mxu0 %v11566_v49 }
 0x494   : > { %11568 = vmatprep.subr.bf16.mxu0 %v11997_v3 }
 0x495   : > { %11578 = vmatpush3.bf16.msra.mxu1 %v11575_v56  ;;  %v10414_v56 = vld [vmem:[%s14428_s9 + $0x1] ss:$0 sm:$0xff] }
 0x496   : > { %11587 = vmatprep.subr.bf16.mxu1 %v11997_v3 }
 0x497   : > { %11570 = vmatpush3.bf16.msra.mxu0 %v11569_v52 }
 0x498   : > { %11580 = vmatprep.subr.bf16.mxu0 %v12534_v55 }
 0x55f   : > { %v2207_v57 = vpop.f32.mrb[8].mxu0  ;;  %v2280_v58 = vpop.f32.mrb[14].mxu1 }
 0x560   : > { %v2430_v59 = vsel %vm808_vm1, %v2207_v57, 0.0  ;;  %v2431_v60 = vsel %vm808_vm1, %v2280_v58, 0.0  ;;  %v11048_v61 = vpop.f32.mrb[9].mxu0  ;;  %v11053_v62 = vpop.f32.mrb[15].mxu1 }
 0x561   : > { %v2432_v63 = vadd.f32 %v2431_v60, %v2430_v59 }
 0x563   : > { %v2353_v0 = vpop.f32.mrb[10].mxu0  ;;  %v2426_v1 = vpop.f32.mrb[16].mxu1 }
 0x564   : > { %v2433_v2 = vsel %vm808_vm1, %v2353_v0, 0.0  ;;  %v11058_v4 = vpop.f32.mrb[11].mxu0  ;;  %v11063_v5 = vpop.f32.mrb[17].mxu1  ;;  %v2435_v7 = vsel %vm808_vm1, %v2426_v1, 0.0 }
 0x565   : > { %v2434_v6 = vadd.f32 %v2433_v2, %v2432_v63 }
 0x567   : > { %v2436_v10 = vadd.f32 %v2435_v7, %v2434_v6 }
 0x569   : > { %v2444_v11 = vadd.f32 %v10406_v8, %v2436_v10 }
 0x56b   : > { %v2445_v12 = vadd.f32 %v2444_v11, %v12221_v14  ;;  %v12445_v14 = vld [vmem:[%s12438_s2] sm:$0xff] }
 0x56c   : > { %v12448_v17 = vadd.f32 %v786_v16, %v12445_v14  ;;  %v2462_v16 = vsub.s32 0, %v12266_v37 }
 0x56d   : > { %v2446_v13 = vsel %vm808_vm1, %v2445_v12, 0.0 }
 0x56e   : > { %2447 = vadd.xlane.f32.xlu1 %v2446_v13  ;;  %11083 = vmatprep.mubr.msk.f32.mxu1 %vm808_vm1, %v12448_v17  ;;  %v2463_v25 = vrot.slane %v794_v19, %v2462_v16  ;;  %v2468_v34 = vrot.slane %v795_v22, %v2462_v16 }
 0x56f   : > { %11084 = vmatmul.mubr.msk.f32.vlgmr.msra.gmra.mrb[18].mxu1 %vm808_vm1, %v12454_v20 }
 0x570   : > { %11086 = vmatprep.mubr.msk.f32.mxu1 %vm808_vm1, %v12467_v24 }
 0x573   : > { %11087 = vmatmul.mubr.msk.f32.gmra.mrb[20].mxu1 %vm808_vm1, %v12473_v28 }
 0x574   : > { %11089 = vmatprep.mubr.msk.f32.mxu1 %vm808_vm1, %v12476_v29 }
 0x577   : > { %11090 = vmatmul.mubr.msk.f32.gmra.mrb[22].mxu1 %vm808_vm1, %v12489_v35 }
 0x578   : > { %11092 = vmatprep.mubr.msk.f32.mxu1 %vm808_vm1, %v12494_v38 }
 0x57b   : > { %11093 = vmatmul.mubr.msk.f32.gmra.mrb[24].mxu1 %vm808_vm1, %v12502_v39 }
 0x57c   : > { %11131 = vmatprep.mubr.msk.f32.mxu1 %vm11998_vm0, %v11999_v9 }
 0x5fb   : > { %v2448_v40 = vpop.xlane.xlu1 %2447 }
 0x5fc   : > { %v2450_v42 = vmul.f32 0.03125, %v2448_v40  ;;  %v10425_v40 = vld [vmem:[%s14489_s8 + $0x50] sm:$0xff] }
 0x5fe   : > { %v12510_v43 = vsub.f32 %v2445_v12, %v2450_v42  ;;  %v10426_v42 = vld [vmem:[%s14489_s8 + $0x58] sm:$0xff]  ;;  %s743_s8 = sand.u32 1, %s11987_s30  }
 0x5ff   : > { %v11583_v46 = vpack.c.bf16 %v10426_v42, %v10425_v40  ;;  %s13660_s28 = sshll.u32 %s743_s8, 3  ;;  %s10214_s25 = scalar_lea.sflag [#allocation3], %s743_s8 }
 0x600   : > { %v2452_v44 = vmul.f32 %v12510_v43, %v12510_v43 }
 0x602   : > { %v2453_v45 = vsel %vm808_vm1, %v2452_v44, 0.0 }
 0x603   : > { %2454 = vadd.xlane.f32.xlu0 %v2453_v45 }
 0x642   : > { %v11085_v57 = vpop.f32.mrb[18].mxu1 }
 0x643   : > { %v12540_v58 = vadd.f32 %v11085_v57, %v10414_v56  ;;  %v2666_v59 = vpop.f32.mrb[19].mxu1 }
 0x644   : > { %v12542_v60 = vadd.f32 %v10414_v56, %v2666_v59 }
 0x645   : > { %3003 = vrot.lane.b32.xlu1 %v12540_v58, %s14459_s3 }
 0x646   : > { %3001 = vrot.lane.b32.xlu0 %v12542_v60, %s14459_s3  ;;  %v11088_v61 = vpop.f32.mrb[20].mxu1 }
 0x647   : > { %v12556_v62 = vadd.f32 %v11088_v61, %v10414_v56  ;;  %v2676_v63 = vpop.f32.mrb[21].mxu1 }
 0x648   : > { %v12558_v0 = vadd.f32 %v10414_v56, %v2676_v63 }
 0x649   : > { %3025 = vrot.lane.b32.xlu1 %v12542_v60, %s14493_s27 }
 0x64a   : > { %3027 = vrot.lane.b32.xlu0 %v12540_v58, %s14493_s27  ;;  %v11091_v1 = vpop.f32.mrb[22].mxu1 }
 0x64b   : > { %v2686_v2 = vpop.f32.mrb[23].mxu1  ;;  %v12568_v6 = vadd.f32 %v11091_v1, %v10414_v56 }
 0x64c   : > { %v12574_v7 = vadd.f32 %v10414_v56, %v2686_v2 }
 0x64d   : > { %3049 = vrot.lane.b32.xlu1 %v12542_v60, %s14457_s22 }
 0x64e   : > { %3051 = vrot.lane.b32.xlu0 %v12540_v58, %s14457_s22  ;;  %v11094_v4 = vpop.f32.mrb[24].mxu1 }
 0x64f   : > { %v2696_v5 = vpop.f32.mrb[25].mxu1  ;;  %v12584_v8 = vadd.f32 %v11094_v4, %v10414_v56 }
 0x650   : > { %v12590_v10 = vadd.f32 %v10414_v56, %v2696_v5 }
 0x651   : > { %3005 = vrot.lane.b32.xlu1 %v12558_v0, %s14459_s3 }
 0x652   : > { %3007 = vrot.lane.b32.xlu0 %v12556_v62, %s14459_s3 }
 0x655   : > { %3029 = vrot.lane.b32.xlu1 %v12558_v0, %s14493_s27 }
 0x656   : > { %3031 = vrot.lane.b32.xlu0 %v12556_v62, %s14493_s27 }
 0x659   : > { %3053 = vrot.lane.b32.xlu1 %v12558_v0, %s14457_s22 }
 0x65a   : > { %3055 = vrot.lane.b32.xlu0 %v12556_v62, %s14457_s22 }
 0x65d   : > { %3009 = vrot.lane.b32.xlu1 %v12574_v7, %s14459_s3 }
 0x65e   : > { %3011 = vrot.lane.b32.xlu0 %v12568_v6, %s14459_s3 }
 0x661   : > { %3033 = vrot.lane.b32.xlu1 %v12574_v7, %s14493_s27 }
 0x662   : > { %3035 = vrot.lane.b32.xlu0 %v12568_v6, %s14493_s27 }
 0x665   : > { %3057 = vrot.lane.b32.xlu1 %v12574_v7, %s14457_s22 }
 0x666   : > { %3059 = vrot.lane.b32.xlu0 %v12568_v6, %s14457_s22 }
 0x669   : > { %3013 = vrot.lane.b32.xlu1 %v12590_v10, %s14459_s3 }
 0x66a   : > { %3015 = vrot.lane.b32.xlu0 %v12584_v8, %s14459_s3  ;;  %s745_s3 = scalar_lea.vmem [#allocation2], %s13660_s28 }
 0x66b   : > { %s10232_s24 = sshll.u32 %s745_s3, 4  ;;  %s10233_s24 = int_to_ptr.vmem [resolvable:$true] %s10232_s24 }
 0x66c   : > { %s11933_s26 = scalar_lea.vmem %s10233_s24, 128 }
 0x66d   : > { %3037 = vrot.lane.b32.xlu1 %v12590_v10, %s14493_s27  ;;  %p11934_p11 = scmp.ne.s32.totalorder %s10233_s24, %s11933_s26 }
 0x66e   : > { %3039 = vrot.lane.b32.xlu0 %v12584_v8, %s14493_s27 }
 0x66f   : > { %p11935_p12 = pnand %p11934_p11, %p12166_p5 }
 0x671   : > { %3061 = vrot.lane.b32.xlu1 %v12590_v10, %s14457_s22  ;;  %p11936_p13 = pneg %p11935_p12 }
 0x672   : > { %3063 = vrot.lane.b32.xlu0 %v12584_v8, %s14457_s22 }
 0x690   : > { %v2455_v11 = vpop.xlane.xlu0 %2454 }
 0x691   : > { %v2456_v12 = vmul.f32 0.03125, %v2455_v11 }
 0x693   : > { %v2457_v13 = vadd.f32 1e-05, %v2456_v12 }
 0x695   : > { %11866 = vrsqrt.f32 %v2457_v13 }
 0x69f   : > { %v11867_v27 = vpop.eup %11866 }
 0x6a0   : > { %v2459_v31 = vmul.f32 %v11867_v27, %v12510_v43 }
 0x6a2   : > { %v2464_v36 = vmul.f32 %v2463_v25, %v2459_v31 }
 0x6a4   : > { %v12618_v44 = vadd.f32 %v2468_v34, %v2464_v36 }
 0x6a6   : > { %v2470_v45 = vadd.f32 %v12618_v44, %v12224_v15 }
 0x6a8   : > { %11073 = vmatmul.mubr.msk.f32.vlgmr.msra.gmra.mrb[12].mxu0 %vm808_vm1, %v2470_v45 }
 0x6a9   : > { %11582 = vmatpush3.bf16.msra.mxu0 %v12534_v55  ;;  %11103 = vmatprep.mubr.msk.f32.mxu0 %vm808_vm1, %v12445_v14 }
 0x6aa   : > { %11584 = vmatprep.subr.bf16.mxu0 %v11583_v46 }
 0x6ad   : > { %11586 = vmatpush3.bf16.msra.mxu0 %v11583_v46 }
 0x6ae   : > { %11603 = vmatprep.subr.bf16.mxu0 %v11997_v3 }
 0x6b0   : > { %11104 = vmatmul.mubr.msk.f32.vlgmr.msra.gmra.mrb[14].mxu0 %vm808_vm1, %v12451_v18 }
 0x6b1   : > { %11106 = vmatprep.mubr.msk.f32.mxu0 %vm808_vm1, %v12461_v21 }
 0x6b4   : > { %11107 = vmatmul.mubr.msk.f32.gmra.mrb[16].mxu0 %vm808_vm1, %v12464_v23 }
 0x6b5   : > { %11109 = vmatprep.mubr.msk.f32.mxu0 %vm808_vm1, %v12470_v26 }
 0x6b7   : > { %v3004_v15 = vpop.permute.xlu1 %3003 }
 0x6b8   : > { %11110 = vmatmul.mubr.msk.f32.gmra.mrb[18].mxu0 %vm808_vm1, %v12479_v30  ;;  %v3002_v14 = vpop.permute.xlu0 %3001 }
 0x6b9   : > { %11112 = vmatprep.mubr.msk.f32.mxu0 %vm808_vm1, %v12482_v32 }
 0x6bb   : > { %v3026_v18 = vpop.permute.xlu1 %3025 }
 0x6bc   : > { %11113 = vmatmul.mubr.msk.f32.gmra.mrb[20].mxu0 %vm808_vm1, %v12497_v33  ;;  %v3028_v21 = vpop.permute.xlu0 %3027  ;;  %v3073_v23 = vcombine.low %v12542_v60, %v3026_v18  ;;  %v3074_v26 = vcombine.high %v12542_v60, %v3026_v18 }
 0x6bd   : > { %11150 = vmatprep.mubr.msk.f32.mxu0 %vm11998_vm0, %v11999_v9  ;;  %v3141_v43 = vcombine.low %v12540_v58, %v3028_v21  ;;  %v3142_v30 = vcombine.high %v12540_v58, %v3028_v21 }
 0x6be   : > { %v3081_v32 = vrot.slane %v3073_v23, %v12269_v41  ;;  %v3088_v33 = vrot.slane %v3074_v26, %v12269_v41 }
 0x6bf   : > { %v3050_v47 = vpop.permute.xlu1 %3049  ;;  %v3149_v52 = vrot.slane %v3141_v43, %v12269_v41  ;;  %v3156_v53 = vrot.slane %v3142_v30, %v12269_v41 }
 0x6c0   : > { %v3052_v49 = vpop.permute.xlu0 %3051  ;;  %v3089_v50 = vcombine.low %v3002_v14, %v3050_v47  ;;  %v3090_v51 = vcombine.high %v3002_v14, %v3050_v47 }
 0x6c1   : > { %v3157_v54 = vcombine.low %v3004_v15, %v3052_v49  ;;  %v3158_v55 = vcombine.high %v3004_v15, %v3052_v49 }
 0x6c2   : > { %v3097_v56 = vrot.slane %v3089_v50, %v12269_v41  ;;  %v3104_v57 = vrot.slane %v3090_v51, %v12269_v41 }
 0x6c3   : > { %v3165_v58 = vrot.slane %v3157_v54, %v12269_v41  ;;  %v3172_v59 = vrot.slane %v3158_v55, %v12269_v41  ;;  %v12657_v4 = vpop.permute.xlu1 %3005 }
 0x6c4   : > { %v3105_v60 = vcombine.low %v3081_v32, %v3097_v56  ;;  %v3106_v61 = vcombine.high %v3081_v32, %v3097_v56  ;;  %v3121_v63 = vcombine.low %v3088_v33, %v3104_v57  ;;  %v3122_v1 = vcombine.high %v3088_v33, %v3104_v57  ;;  %v12655_v2 = vpop.permute.xlu0 %3007 }
 0x6c5   : > { %v3173_v5 = vcombine.low %v3149_v52, %v3165_v58  ;;  %v3174_v11 = vcombine.high %v3149_v52, %v3165_v58  ;;  %v3189_v12 = vcombine.low %v3156_v53, %v3172_v59  ;;  %v3190_v13 = vcombine.high %v3156_v53, %v3172_v59 }
 0x6c6   : > { %v3113_v16 = vrot.slane %v3105_v60, %v12272_v48  ;;  %v3120_v19 = vrot.slane %v3106_v61, %v12272_v48  ;;  %v3129_v22 = vrot.slane %v3121_v63, %v12272_v48  ;;  %v3136_v25 = vrot.slane %v3122_v1, %v12272_v48 }
 0x6c7   : > { %v3181_v27 = vrot.slane %v3173_v5, %v12272_v48  ;;  %v3188_v31 = vrot.slane %v3174_v11, %v12272_v48  ;;  %v3197_v34 = vrot.slane %v3189_v12, %v12272_v48  ;;  %v3204_v36 = vrot.slane %v3190_v13, %v12272_v48  ;;  %v3030_v14 = vpop.permute.xlu1 %3029 }
 0x6c8   : > { %v3617_v40 = vcombine.low %v3113_v16, %v3120_v19  ;;  %v10439_v42 = vcombine.high %v3113_v16, %v3120_v19  ;;  %v3633_v45 = vcombine.low %v3129_v22, %v3136_v25  ;;  %v10440_v46 = vcombine.high %v3129_v22, %v3136_v25  ;;  %v3032_v15 = vpop.permute.xlu0 %3031 }
 0x6c9   : > { %v3685_v18 = vcombine.low %v3181_v27, %v3188_v31  ;;  %v10441_v21 = vcombine.high %v3181_v27, %v3188_v31  ;;  %v3701_v23 = vcombine.low %v3197_v34, %v3204_v36  ;;  %v10442_v26 = vcombine.high %v3197_v34, %v3204_v36 }
 0x6ca   : > { %v3624_v43 = vrot.slane %v3617_v40, %v12269_v41  ;;  %v3632_v30 = vrot.slane %v10439_v42, %v12269_v41  ;;  %v3640_v47 = vrot.slane %v3633_v45, %v12269_v41  ;;  %v3648_v32 = vrot.slane %v10440_v46, %v12269_v41 }
 0x6cb   : > { %v3692_v33 = vrot.slane %v3685_v18, %v12269_v41  ;;  %v3700_v49 = vrot.slane %v10441_v21, %v12269_v41  ;;  %v3708_v50 = vrot.slane %v3701_v23, %v12269_v41  ;;  %v3716_v51 = vrot.slane %v10442_v26, %v12269_v41  ;;  %v3054_v11 = vpop.permute.xlu1 %3053 }
 0x6cc   : > { %v3649_v52 = vcombine.low %v3624_v43, %v3632_v30  ;;  %v3650_v53 = vcombine.high %v3624_v43, %v3632_v30  ;;  %v3665_v54 = vcombine.low %v3640_v47, %v3648_v32  ;;  %v3666_v55 = vcombine.high %v3640_v47, %v3648_v32  ;;  %v3056_v56 = vpop.permute.xlu0 %3055 }
 0x6cd   : > { %v3717_v57 = vcombine.low %v3692_v33, %v3700_v49  ;;  %v3718_v58 = vcombine.high %v3692_v33, %v3700_v49  ;;  %v3733_v59 = vcombine.low %v3708_v50, %v3716_v51  ;;  %v3734_v60 = vcombine.high %v3708_v50, %v3716_v51 }
 0x6ce   : > { %v12676_v61 = vrot.slane %v3649_v52, %v12272_v48  ;;  %v12679_v63 = vrot.slane %v3650_v53, %v12272_v48  ;;  %v12682_v1 = vrot.slane %v3665_v54, %v12272_v48  ;;  %v12685_v5 = vrot.slane %v3666_v55, %v12272_v48 }
 0x6cf   : > { %v12688_v12 = vrot.slane %v3717_v57, %v12272_v48  ;;  %v12691_v13 = vrot.slane %v3718_v58, %v12272_v48  ;;  %v12694_v16 = vrot.slane %v3733_v59, %v12272_v48  ;;  %v12697_v19 = vrot.slane %v3734_v60, %v12272_v48  ;;  %v12717_v23 = vpop.permute.xlu1 %3009 }
 0x6d0   : > { %v3277_v22 = vcombine.low %v12556_v62, %v3032_v15  ;;  %v3278_v25 = vcombine.high %v12556_v62, %v3032_v15  ;;  %v3209_v27 = vcombine.low %v12558_v0, %v3030_v14  ;;  %v3210_v31 = vcombine.high %v12558_v0, %v3030_v14  ;;  %v12703_v34 = vpop.permute.xlu0 %3011 }
 0x6d1   : > { %v3293_v36 = vcombine.low %v12655_v2, %v3056_v56  ;;  %v3294_v40 = vcombine.high %v12655_v2, %v3056_v56  ;;  %v3225_v42 = vcombine.low %v12657_v4, %v3054_v11  ;;  %v3226_v45 = vcombine.high %v12657_v4, %v3054_v11 }
 0x6d2   : > { %v3285_v46 = vrot.slane %v3277_v22, %v12269_v41  ;;  %v3292_v18 = vrot.slane %v3278_v25, %v12269_v41  ;;  %v3217_v62 = vrot.slane %v3209_v27, %v12269_v41  ;;  %v3224_v15 = vrot.slane %v3210_v31, %v12269_v41 }
 0x6d3   : > { %v3301_v0 = vrot.slane %v3293_v36, %v12269_v41  ;;  %v3308_v14 = vrot.slane %v3294_v40, %v12269_v41  ;;  %v3233_v21 = vrot.slane %v3225_v42, %v12269_v41  ;;  %v3240_v2 = vrot.slane %v3226_v45, %v12269_v41  ;;  %v3034_v42 = vpop.permute.xlu1 %3033 }
 0x6d4   : > { %v12719_v26 = vpop.permute.xlu0 %3035  ;;  %v3681_v4 = vcombine.low %v12676_v61, %v12682_v1  ;;  %v3749_v43 = vcombine.low %v12688_v12, %v12694_v16  ;;  %v3682_v30 = vcombine.high %v12676_v61, %v12682_v1  ;;  %v3750_v47 = vcombine.high %v12688_v12, %v12694_v16 }
 0x6d5   : > { %v3309_v32 = vcombine.low %v3285_v46, %v3301_v0  ;;  %v3310_v33 = vcombine.high %v3285_v46, %v3301_v0  ;;  %v3325_v49 = vcombine.low %v3292_v18, %v3308_v14  ;;  %v3326_v50 = vcombine.high %v3292_v18, %v3308_v14 }
 0x6d6   : > { %v3241_v51 = vcombine.low %v3217_v62, %v3233_v21  ;;  %v3242_v52 = vcombine.high %v3217_v62, %v3233_v21  ;;  %v3257_v53 = vcombine.low %v3224_v15, %v3240_v2  ;;  %v3258_v54 = vcombine.high %v3224_v15, %v3240_v2 }
 0x6d7   : > { %v3317_v55 = vrot.slane %v3309_v32, %v12272_v48  ;;  %v3324_v56 = vrot.slane %v3310_v33, %v12272_v48  ;;  %v3333_v57 = vrot.slane %v3325_v49, %v12272_v48  ;;  %v3340_v58 = vrot.slane %v3326_v50, %v12272_v48 }
 0x6d8   : > { %v3249_v59 = vrot.slane %v3241_v51, %v12272_v48  ;;  %v3256_v60 = vrot.slane %v3242_v52, %v12272_v48  ;;  %v3265_v61 = vrot.slane %v3257_v53, %v12272_v48  ;;  %v3272_v1 = vrot.slane %v3258_v54, %v12272_v48  ;;  %v3060_v11 = vpop.permute.xlu0 %3059 }
 0x6d9   : > { %v3821_v12 = vcombine.low %v3317_v55, %v3324_v56  ;;  %v10445_v16 = vcombine.high %v3317_v55, %v3324_v56  ;;  %v3837_v22 = vcombine.low %v3333_v57, %v3340_v58  ;;  %v10446_v25 = vcombine.high %v3333_v57, %v3340_v58 }
 0x6da   : > { %v3753_v27 = vcombine.low %v3249_v59, %v3256_v60  ;;  %v10443_v31 = vcombine.high %v3249_v59, %v3256_v60  ;;  %v3769_v36 = vcombine.low %v3265_v61, %v3272_v1  ;;  %v10444_v40 = vcombine.high %v3265_v61, %v3272_v1 }
 0x6db   : > { %v3828_v45 = vrot.slane %v3821_v12, %v12269_v41  ;;  %v3836_v46 = vrot.slane %v10445_v16, %v12269_v41  ;;  %v3844_v18 = vrot.slane %v3837_v22, %v12269_v41  ;;  %v3852_v62 = vrot.slane %v10446_v25, %v12269_v41  ;;  %v3058_v16 = vpop.permute.xlu1 %3057 }
 0x6dc   : > { %v12742_v15 = vrot.slane %v3753_v27, %v12269_v41  ;;  %v12745_v0 = vrot.slane %v10443_v31, %v12269_v41  ;;  %v12748_v14 = vrot.slane %v3769_v36, %v12269_v41  ;;  %v12751_v21 = vrot.slane %v10444_v40, %v12269_v41  ;;  %v12753_v50 = vpop.permute.xlu0 %3015 }
 0x6dd   : > { %v3853_v2 = vcombine.low %v3828_v45, %v3836_v46  ;;  %v3854_v32 = vcombine.high %v3828_v45, %v3836_v46  ;;  %v3869_v33 = vcombine.low %v3844_v18, %v3852_v62  ;;  %v3870_v49 = vcombine.high %v3844_v18, %v3852_v62 }
 0x6de   : > { %v3785_v51 = vcombine.low %v12742_v15, %v12745_v0  ;;  %v3786_v52 = vcombine.high %v12742_v15, %v12745_v0  ;;  %v3801_v53 = vcombine.low %v12748_v14, %v12751_v21  ;;  %v3802_v54 = vcombine.high %v12748_v14, %v12751_v21 }
 0x6df   : > { %v12764_v55 = vrot.slane %v3853_v2, %v12272_v48  ;;  %v12767_v56 = vrot.slane %v3854_v32, %v12272_v48  ;;  %v12770_v57 = vrot.slane %v3869_v33, %v12272_v48  ;;  %v12773_v58 = vrot.slane %v3870_v49, %v12272_v48  ;;  %v12807_v32 = vpop.permute.xlu1 %3013 }
 0x6e0   : > { %v3413_v59 = vcombine.low %v12568_v6, %v12719_v26  ;;  %v3414_v60 = vcombine.high %v12568_v6, %v12719_v26  ;;  %v3345_v61 = vcombine.low %v12574_v7, %v3034_v42  ;;  %v3346_v1 = vcombine.high %v12574_v7, %v3034_v42 }
 0x6e1   : > { %v11588_v22 = vpack.c.bf16 %v3749_v43, %v3681_v4  ;;  %v11604_v25 = vpack.c.bf16 %v3750_v47, %v3682_v30  ;;  %v3429_v27 = vcombine.low %v12703_v34, %v3060_v11  ;;  %v3430_v31 = vcombine.high %v12703_v34, %v3060_v11  ;;  %v3040_v30 = vpop.permute.xlu0 %3039 }
 0x6e2   : > { %v3421_v36 = vrot.slane %v3413_v59, %v12269_v41  ;;  %v3428_v6 = vrot.slane %v3414_v60, %v12269_v41  ;;  %v3353_v26 = vrot.slane %v3345_v61, %v12269_v41  ;;  %v3360_v7 = vrot.slane %v3346_v1, %v12269_v41 }
 0x6e3   : > { %11590 = vmatpush3.bf16.xpose.msk.msra.mxu1 %vm12783_vm4, %v11588_v22  ;;  %11606 = vmatpush3.bf16.xpose.msk.msra.mxu0 %vm12783_vm4, %v11604_v25  ;;  %v3437_v4 = vrot.slane %v3429_v27, %v12269_v41  ;;  %v3444_v43 = vrot.slane %v3430_v31, %v12269_v41  ;;  %v3361_v34 = vcombine.low %v12717_v23, %v3058_v16 }
 0x6e4   : > { %v3362_v47 = vcombine.high %v12717_v23, %v3058_v16  ;;  %v3549_v11 = vcombine.low %v12584_v8, %v3040_v30  ;;  %v3550_v40 = vcombine.high %v12584_v8, %v3040_v30  ;;  %11591 = vmatprep.subr.bf16.mxu1 %v11997_v3  ;;  %11607 = vmatprep.subr.bf16.mxu0 %v11997_v3 }
 0x6e5   : > { %v3445_v42 = vcombine.low %v3421_v36, %v3437_v4  ;;  %v3446_v45 = vcombine.high %v3421_v36, %v3437_v4  ;;  %v3461_v46 = vcombine.low %v3428_v6, %v3444_v43  ;;  %v3462_v18 = vcombine.high %v3428_v6, %v3444_v43 }
 0x6e6   : > { %v3369_v62 = vrot.slane %v3361_v34, %v12269_v41  ;;  %v3376_v2 = vrot.slane %v3362_v47, %v12269_v41  ;;  %v12810_v23 = vrot.slane %v3549_v11, %v12269_v41  ;;  %v12813_v33 = vrot.slane %v3550_v40, %v12269_v41 }
 0x6e7   : > { %v3453_v8 = vrot.slane %v3445_v42, %v12272_v48  ;;  %v3460_v49 = vrot.slane %v3446_v45, %v12272_v48  ;;  %v3469_v59 = vrot.slane %v3461_v46, %v12272_v48  ;;  %v3476_v60 = vrot.slane %v3462_v18, %v12272_v48  ;;  %v3038_v46 = vpop.permute.xlu1 %3037 }
 0x6e8   : > { %v3377_v61 = vcombine.low %v3353_v26, %v3369_v62  ;;  %v3378_v1 = vcombine.high %v3353_v26, %v3369_v62  ;;  %v3393_v16 = vcombine.low %v3360_v7, %v3376_v2  ;;  %v3394_v22 = vcombine.high %v3360_v7, %v3376_v2 }
 0x6e9   : > { %v3957_v25 = vcombine.low %v3453_v8, %v3460_v49  ;;  %v10449_v27 = vcombine.high %v3453_v8, %v3460_v49  ;;  %v3973_v31 = vcombine.low %v3469_v59, %v3476_v60  ;;  %v10450_v36 = vcombine.high %v3469_v59, %v3476_v60 }
 0x6ea   : > { %v3385_v6 = vrot.slane %v3377_v61, %v12272_v48  ;;  %v3392_v4 = vrot.slane %v3378_v1, %v12272_v48  ;;  %v3401_v43 = vrot.slane %v3393_v16, %v12272_v48  ;;  %v3408_v34 = vrot.slane %v3394_v22, %v12272_v48 }
 0x6eb   : > { %v3964_v30 = vrot.slane %v3957_v25, %v12269_v41  ;;  %v3972_v47 = vrot.slane %v10449_v27, %v12269_v41  ;;  %v3980_v26 = vrot.slane %v3973_v31, %v12269_v41  ;;  %v3988_v7 = vrot.slane %v10450_v36, %v12269_v41 }
 0x6ec   : > { %v3889_v11 = vcombine.low %v3385_v6, %v3392_v4  ;;  %v10447_v40 = vcombine.high %v3385_v6, %v3392_v4  ;;  %v3905_v42 = vcombine.low %v3401_v43, %v3408_v34  ;;  %v10448_v45 = vcombine.high %v3401_v43, %v3408_v34 }
 0x6ed   : > { %v3989_v18 = vcombine.low %v3964_v30, %v3972_v47  ;;  %v3990_v62 = vcombine.high %v3964_v30, %v3972_v47  ;;  %v4005_v2 = vcombine.low %v3980_v26, %v3988_v7  ;;  %v4006_v8 = vcombine.high %v3980_v26, %v3988_v7  ;;  %v3064_v47 = vpop.permute.xlu0 %3063 }
 0x6ee   : > { %v3896_v49 = vrot.slane %v3889_v11, %v12269_v41  ;;  %v3904_v59 = vrot.slane %v10447_v40, %v12269_v41  ;;  %v3912_v60 = vrot.slane %v3905_v42, %v12269_v41  ;;  %v3920_v61 = vrot.slane %v10448_v45, %v12269_v41  ;;  %v3062_v40 = vpop.permute.xlu1 %3061 }
 0x6ef   : > { %v12832_v1 = vrot.slane %v3989_v18, %v12272_v48  ;;  %v12835_v16 = vrot.slane %v3990_v62, %v12272_v48  ;;  %v12838_v22 = vrot.slane %v4005_v2, %v12272_v48  ;;  %v12841_v25 = vrot.slane %v4006_v8, %v12272_v48 }
 0x6f0   : > { %v3921_v27 = vcombine.low %v3896_v49, %v3904_v59  ;;  %v3922_v31 = vcombine.high %v3896_v49, %v3904_v59  ;;  %v3937_v36 = vcombine.low %v3912_v60, %v3920_v61  ;;  %v3938_v6 = vcombine.high %v3912_v60, %v3920_v61 }
 0x6f1   : > { %v3481_v4 = vcombine.low %v12590_v10, %v3038_v46  ;;  %v3482_v43 = vcombine.high %v12590_v10, %v3038_v46  ;;  %v3793_v34 = vrot.slane %v3785_v51, %v12272_v48  ;;  %v3809_v30 = vrot.slane %v3801_v53, %v12272_v48 }
 0x6f2   : > { %v12854_v26 = vrot.slane %v3921_v27, %v12272_v48  ;;  %v12857_v7 = vrot.slane %v3922_v31, %v12272_v48  ;;  %v12860_v11 = vrot.slane %v3937_v36, %v12272_v48  ;;  %v12863_v10 = vrot.slane %v3938_v6, %v12272_v48 }
 0x6f3   : > { %v3489_v51 = vrot.slane %v3481_v4, %v12269_v41  ;;  %v3496_v42 = vrot.slane %v3482_v43, %v12269_v41  ;;  %v3817_v45 = vcombine.low %v3793_v34, %v3809_v30  ;;  %v3885_v53 = vcombine.low %v12764_v55, %v12770_v57 }
 0x6f4   : > { %v3818_v46 = vcombine.high %v3793_v34, %v3809_v30  ;;  %v3886_v18 = vcombine.high %v12764_v55, %v12770_v57  ;;  %v3565_v62 = vcombine.low %v12753_v50, %v3064_v47  ;;  %v3566_v2 = vcombine.high %v12753_v50, %v3064_v47 }
 0x6f5   : > { %v11592_v8 = vpack.c.bf16 %v3885_v53, %v3817_v45  ;;  %v3497_v49 = vcombine.low %v12807_v32, %v3062_v40  ;;  %v3498_v59 = vcombine.high %v12807_v32, %v3062_v40  ;;  %v3953_v60 = vcombine.low %v12854_v26, %v12860_v11 }
 0x6f6   : > { %v11608_v61 = vpack.c.bf16 %v3886_v18, %v3818_v46  ;;  %v3573_v27 = vrot.slane %v3565_v62, %v12269_v41  ;;  %v3580_v31 = vrot.slane %v3566_v2, %v12269_v41  ;;  %v4021_v55 = vcombine.low %v12832_v1, %v12838_v22 }
 0x6f7   : > { %11594 = vmatpush3.bf16.xpose.msk.msra.mxu1 %vm12783_vm4, %v11592_v8  ;;  %v3505_v50 = vrot.slane %v3497_v49, %v12269_v41  ;;  %v3512_v57 = vrot.slane %v3498_v59, %v12269_v41  ;;  %v3954_v32 = vcombine.high %v12854_v26, %v12860_v11  ;;  %v4022_v36 = vcombine.high %v12832_v1, %v12838_v22 }
 0x6f8   : > { %11610 = vmatpush3.bf16.xpose.msk.msra.mxu0 %vm12783_vm4, %v11608_v61  ;;  %v3581_v6 = vcombine.low %v12810_v23, %v3573_v27  ;;  %v3582_v4 = vcombine.high %v12810_v23, %v3573_v27  ;;  %v3597_v43 = vcombine.low %v12813_v33, %v3580_v31  ;;  %v3598_v34 = vcombine.high %v12813_v33, %v3580_v31 }
 0x6f9   : > { %v3513_v30 = vcombine.low %v3489_v51, %v3505_v50  ;;  %v3514_v47 = vcombine.high %v3489_v51, %v3505_v50  ;;  %v3529_v40 = vcombine.low %v3496_v42, %v3512_v57  ;;  %v3530_v45 = vcombine.high %v3496_v42, %v3512_v57  ;;  %11595 = vmatprep.subr.bf16.mxu1 %v11997_v3 }
 0x6fa   : > { %v3589_v26 = vrot.slane %v3581_v6, %v12272_v48  ;;  %v3596_v1 = vrot.slane %v3582_v4, %v12272_v48  ;;  %v3605_v22 = vrot.slane %v3597_v43, %v12272_v48  ;;  %v3612_v11 = vrot.slane %v3598_v34, %v12272_v48  ;;  %11611 = vmatprep.subr.bf16.mxu0 %v11997_v3 }
 0x6fb   : > { %v3521_v23 = vrot.slane %v3513_v30, %v12272_v48  ;;  %v3528_v33 = vrot.slane %v3514_v47, %v12272_v48  ;;  %v3537_v51 = vrot.slane %v3529_v40, %v12272_v48  ;;  %v3544_v42 = vrot.slane %v3530_v45, %v12272_v48 }
 0x6fc   : > { %v4093_v53 = vcombine.low %v3589_v26, %v3596_v1  ;;  %v10453_v46 = vcombine.high %v3589_v26, %v3596_v1  ;;  %v4109_v18 = vcombine.low %v3605_v22, %v3612_v11  ;;  %v10454_v62 = vcombine.high %v3605_v22, %v3612_v11 }
 0x6fd   : > { %v4025_v2 = vcombine.low %v3521_v23, %v3528_v33  ;;  %v10451_v8 = vcombine.high %v3521_v23, %v3528_v33  ;;  %v4041_v49 = vcombine.low %v3537_v51, %v3544_v42  ;;  %v10452_v59 = vcombine.high %v3537_v51, %v3544_v42 }
 0x6fe   : > { %v4100_v61 = vrot.slane %v4093_v53, %v12269_v41  ;;  %v4108_v27 = vrot.slane %v10453_v46, %v12269_v41  ;;  %v4116_v31 = vrot.slane %v4109_v18, %v12269_v41  ;;  %v4124_v50 = vrot.slane %v10454_v62, %v12269_v41 }
 0x6ff   : > { %v4032_v57 = vrot.slane %v4025_v2, %v12269_v41  ;;  %v4040_v6 = vrot.slane %v10451_v8, %v12269_v41  ;;  %v4048_v4 = vrot.slane %v4041_v49, %v12269_v41  ;;  %v4056_v43 = vrot.slane %v10452_v59, %v12269_v41 }
 0x700   : > { %v4125_v34 = vcombine.low %v4100_v61, %v4108_v27  ;;  %v4126_v30 = vcombine.high %v4100_v61, %v4108_v27  ;;  %v4141_v47 = vcombine.low %v4116_v31, %v4124_v50  ;;  %v4142_v40 = vcombine.high %v4116_v31, %v4124_v50 }
 0x701   : > { %v4057_v45 = vcombine.low %v4032_v57, %v4040_v6  ;;  %v4058_v26 = vcombine.high %v4032_v57, %v4040_v6  ;;  %v4073_v1 = vcombine.low %v4048_v4, %v4056_v43  ;;  %v4074_v22 = vcombine.high %v4048_v4, %v4056_v43 }
 0x702   : > { %v4133_v11 = vrot.slane %v4125_v34, %v12272_v48  ;;  %v4140_v23 = vrot.slane %v4126_v30, %v12272_v48  ;;  %v4149_v33 = vrot.slane %v4141_v47, %v12272_v48  ;;  %v4156_v51 = vrot.slane %v4142_v40, %v12272_v48 }
 0x703   : > { %v4065_v42 = vrot.slane %v4057_v45, %v12272_v48  ;;  %v4072_v53 = vrot.slane %v4058_v26, %v12272_v48  ;;  %v4081_v46 = vrot.slane %v4073_v1, %v12272_v48  ;;  %v4088_v18 = vrot.slane %v4074_v22, %v12272_v48  ;;  %v10428_v1 = vld [vmem:[%s14428_s9 + $0x2] ss:$0 sm:$0xff] }
 0x704   : > { %v11596_v62 = vpack.c.bf16 %v4021_v55, %v3953_v60  ;;  %v11612_v2 = vpack.c.bf16 %v4022_v36, %v3954_v32  ;;  %v4157_v8 = vcombine.low %v4133_v11, %v4149_v33  ;;  %v4158_v49 = vcombine.high %v4133_v11, %v4149_v33 }
 0x705   : > { %v4089_v59 = vcombine.low %v4065_v42, %v4081_v46  ;;  %v4090_v61 = vcombine.high %v4065_v42, %v4081_v46  ;;  %v3683_v27 = vcombine.low %v12679_v63, %v12685_v5  ;;  %v3751_v31 = vcombine.low %v12691_v13, %v12697_v19 }
 0x706   : > { %11598 = vmatpush3.bf16.xpose.msk.msra.mxu1 %vm12783_vm4, %v11596_v62  ;;  %11614 = vmatpush3.bf16.xpose.msk.msra.mxu0 %vm12783_vm4, %v11612_v2  ;;  %v3684_v60 = vcombine.high %v12679_v63, %v12685_v5  ;;  %v3752_v55 = vcombine.high %v12691_v13, %v12697_v19  ;;  %v3800_v32 = vrot.slane %v3786_v52, %v12272_v48 }
 0x707   : > { %11599 = vmatprep.subr.bf16.mxu1 %v11997_v3  ;;  %11615 = vmatprep.subr.bf16.mxu0 %v11997_v3  ;;  %v11600_v36 = vpack.c.bf16 %v4157_v8, %v4089_v59  ;;  %v11616_v50 = vpack.c.bf16 %v4158_v49, %v4090_v61  ;;  %v12939_v57 = vpack.c.bf16 %v3751_v31, %v3683_v27 }
 0x708   : > { %v12941_v6 = vpack.c.bf16 %v3752_v55, %v3684_v60  ;;  %v3816_v63 = vrot.slane %v3802_v54, %v12272_v48  ;;  %v3887_v5 = vcombine.low %v12767_v56, %v12773_v58  ;;  %v3888_v13 = vcombine.high %v12767_v56, %v12773_v58 }
 0x709   : > { %v3955_v19 = vcombine.low %v12857_v7, %v12863_v10  ;;  %v4023_v15 = vcombine.low %v12835_v16, %v12841_v25  ;;  %v3956_v0 = vcombine.high %v12857_v7, %v12863_v10  ;;  %v4024_v52 = vcombine.high %v12835_v16, %v12841_v25  ;;  %v10407_v16 = vld [vmem:[%s14428_s9] ss:$0 sm:$0xff] }
 0x70a   : > { %v3819_v14 = vcombine.low %v3800_v32, %v3816_v63  ;;  %v3820_v21 = vcombine.high %v3800_v32, %v3816_v63  ;;  %v4091_v54 = vcombine.low %v4072_v53, %v4088_v18  ;;  %v4159_v4 = vcombine.low %v4140_v23, %v4156_v51 }
 0x70b   : > { %v12959_v43 = vpack.c.bf16 %v4023_v15, %v3955_v19  ;;  %v12961_v34 = vpack.c.bf16 %v4024_v52, %v3956_v0  ;;  %v4092_v56 = vcombine.high %v4072_v53, %v4088_v18  ;;  %v4160_v58 = vcombine.high %v4140_v23, %v4156_v51 }
 0x70c   : > { %v12963_v30 = vpack.c.bf16 %v3887_v5, %v3819_v14  ;;  %v12965_v47 = vpack.c.bf16 %v3888_v13, %v3820_v21  ;;  %v12967_v40 = vpack.c.bf16 %v4159_v4, %v4091_v54 }
 0x70d   : > { %v12969_v7 = vpack.c.bf16 %v4160_v58, %v4092_v56 }
 0x70e   : > { %11602 = vmatpush3.bf16.xpose.msk.msra.mxu1 %vm12783_vm4, %v11600_v36  ;;  %11618 = vmatpush3.bf16.xpose.msk.msra.mxu0 %vm12783_vm4, %v11616_v50 }
 0x70f   : > { %11619 = vmatprep.subr.bf16.mxu1 %v11997_v3  ;;  %11635 = vmatprep.subr.bf16.mxu0 %v11997_v3 }
 0x77b   : > { %v2559_v25 = vpop.f32.mrb[12].mxu0 }
 0x77c   : > { %v2560_v10 = vadd.f32 %v10407_v16, %v2559_v25  ;;  %v11074_v45 = vpop.f32.mrb[13].mxu0 }
 0x77e   : > { %2851 = vrot.lane.b32.xlu0 %v2560_v10, %s14493_s27  ;;  %2848 = vrot.lane.b32.xlu1 %v2560_v10, %s14496_s23 }
 0x782   : > { %2854 = vrot.lane.b32.xlu1 %v2560_v10, %s14497_s29 }
 0x783   : > { %v11105_v26 = vpop.f32.mrb[14].mxu0 }
 0x784   : > { %v12986_v22 = vadd.f32 %v11105_v26, %v10428_v1  ;;  %v2808_v11 = vpop.f32.mrb[15].mxu0 }
 0x785   : > { %v12994_v23 = vadd.f32 %v10428_v1, %v2808_v11 }
 0x786   : > { %4195 = vrot.lane.b32.xlu1 %v12986_v22, %s14493_s27  ;;  %4171 = vrot.lane.b32.xlu0 %v12986_v22, %s14496_s23 }
 0x787   : > { %v11108_v33 = vpop.f32.mrb[16].mxu0 }
 0x788   : > { %v13002_v51 = vadd.f32 %v11108_v33, %v10428_v1  ;;  %v2818_v42 = vpop.f32.mrb[17].mxu0 }
 0x789   : > { %v13004_v53 = vadd.f32 %v10428_v1, %v2818_v42 }
 0x78a   : > { %4219 = vrot.lane.b32.xlu1 %v12986_v22, %s14497_s29  ;;  %4217 = vrot.lane.b32.xlu0 %v12994_v23, %s14497_s29 }
 0x78b   : > { %v11111_v46 = vpop.f32.mrb[18].mxu0 }
 0x78c   : > { %v2828_v18 = vpop.f32.mrb[19].mxu0  ;;  %v13014_v62 = vadd.f32 %v11111_v46, %v10428_v1 }
 0x78d   : > { %v13020_v2 = vadd.f32 %v10428_v1, %v2828_v18 }
 0x78e   : > { %4169 = vrot.lane.b32.xlu1 %v12994_v23, %s14496_s23  ;;  %4173 = vrot.lane.b32.xlu0 %v13004_v53, %s14496_s23 }
 0x78f   : > { %v11114_v8 = vpop.f32.mrb[20].mxu0 }
 0x790   : > { %v13032_v49 = vadd.f32 %v11114_v8, %v10428_v1  ;;  %v2838_v59 = vpop.f32.mrb[21].mxu0 }
 0x791   : > { %v13038_v61 = vadd.f32 %v10428_v1, %v2838_v59 }
 0x792   : > { %4193 = vrot.lane.b32.xlu1 %v12994_v23, %s14493_s27  ;;  %4197 = vrot.lane.b32.xlu0 %v13004_v53, %s14493_s27 }
 0x796   : > { %4175 = vrot.lane.b32.xlu1 %v13002_v51, %s14496_s23  ;;  %4221 = vrot.lane.b32.xlu0 %v13004_v53, %s14497_s29 }
 0x79a   : > { %4199 = vrot.lane.b32.xlu1 %v13002_v51, %s14493_s27  ;;  %4177 = vrot.lane.b32.xlu0 %v13020_v2, %s14496_s23 }
 0x79e   : > { %4223 = vrot.lane.b32.xlu1 %v13002_v51, %s14497_s29  ;;  %4201 = vrot.lane.b32.xlu0 %v13020_v2, %s14493_s27 }
 0x7a2   : > { %4179 = vrot.lane.b32.xlu1 %v13014_v62, %s14496_s23  ;;  %4225 = vrot.lane.b32.xlu0 %v13020_v2, %s14497_s29 }
 0x7a6   : > { %4203 = vrot.lane.b32.xlu1 %v13014_v62, %s14493_s27  ;;  %4181 = vrot.lane.b32.xlu0 %v13038_v61, %s14496_s23 }
 0x7aa   : > { %4227 = vrot.lane.b32.xlu1 %v13014_v62, %s14497_s29 }
 0x7ae   : > { %4183 = vrot.lane.b32.xlu1 %v13032_v49, %s14496_s23 }
 0x7f0   : > { %v2852_v27 = vpop.permute.xlu0 %2851  ;;  %v2849_v31 = vpop.permute.xlu1 %2848 }
 0x7f1   : > { %v2857_v60 = vcombine.low %v2560_v10, %v2852_v27  ;;  %v2858_v55 = vcombine.high %v2560_v10, %v2852_v27 }
 0x7f3   : > { %v2865_v63 = vrot.slane %v2857_v60, %v12269_v41  ;;  %v2872_v5 = vrot.slane %v2858_v55, %v12269_v41 }
 0x7f4   : > { %v2855_v32 = vpop.permute.xlu1 %2854 }
 0x7f5   : > { %v2873_v36 = vcombine.low %v2849_v31, %v2855_v32  ;;  %v2874_v50 = vcombine.high %v2849_v31, %v2855_v32 }
 0x7f7   : > { %v2881_v13 = vrot.slane %v2873_v36, %v12269_v41  ;;  %v2888_v19 = vrot.slane %v2874_v50, %v12269_v41 }
 0x7f8   : > { %v4196_v27 = vpop.permute.xlu1 %4195  ;;  %v4172_v55 = vpop.permute.xlu0 %4171 }
 0x7f9   : > { %v2889_v15 = vcombine.low %v2865_v63, %v2881_v13  ;;  %v2890_v0 = vcombine.high %v2865_v63, %v2881_v13  ;;  %v2905_v52 = vcombine.low %v2872_v5, %v2888_v19  ;;  %v2906_v14 = vcombine.high %v2872_v5, %v2888_v19 }
 0x7fa   : > { %v4309_v31 = vcombine.low %v12986_v22, %v4196_v27  ;;  %v4310_v60 = vcombine.high %v12986_v22, %v4196_v27 }
 0x7fb   : > { %v2897_v21 = vrot.slane %v2889_v15, %v12272_v48  ;;  %v2904_v54 = vrot.slane %v2890_v0, %v12272_v48  ;;  %v2913_v4 = vrot.slane %v2905_v52, %v12272_v48  ;;  %v2920_v56 = vrot.slane %v2906_v14, %v12272_v48 }
 0x7fc   : > { %v4317_v32 = vrot.slane %v4309_v31, %v12269_v41  ;;  %v4220_v22 = vpop.permute.xlu1 %4219  ;;  %v4324_v36 = vrot.slane %v4310_v60, %v12269_v41  ;;  %v4218_v13 = vpop.permute.xlu0 %4217 }
 0x7fd   : > { %v2925_v58 = vcombine.low %v2897_v21, %v2904_v54  ;;  %v10437_v16 = vcombine.high %v2897_v21, %v2904_v54  ;;  %v2941_v25 = vcombine.low %v2913_v4, %v2920_v56  ;;  %v10438_v10 = vcombine.high %v2913_v4, %v2920_v56 }
 0x7fe   : > { %v4326_v50 = vcombine.high %v4172_v55, %v4220_v22 }
 0x7ff   : > { %v13051_v45 = vrot.slane %v2925_v58, %v12269_v41  ;;  %v13054_v26 = vrot.slane %v10437_v16, %v12269_v41  ;;  %v13057_v1 = vrot.slane %v2941_v25, %v12269_v41  ;;  %v13060_v11 = vrot.slane %v10438_v10, %v12269_v41 }
 0x800   : > { %v4170_v5 = vpop.permute.xlu1 %4169 }
 0x801   : > { %v2957_v33 = vcombine.low %v13051_v45, %v13054_v26  ;;  %v2973_v42 = vcombine.low %v13057_v1, %v13060_v11  ;;  %v4257_v14 = vcombine.low %v4170_v5, %v4218_v13  ;;  %v4258_v21 = vcombine.high %v4170_v5, %v4218_v13 }
 0x803   : > { %v2965_v46 = vrot.slane %v2957_v33, %v12272_v48  ;;  %v2981_v18 = vrot.slane %v2973_v42, %v12272_v48  ;;  %v4265_v16 = vrot.slane %v4257_v14, %v12269_v41 }
 0x804   : > { %v4194_v25 = vpop.permute.xlu1 %4193 }
 0x805   : > { %v2989_v8 = vcombine.low %v2965_v46, %v2981_v18  ;;  %v2990_v59 = vcombine.high %v2965_v46, %v2981_v18  ;;  %v4242_v42 = vcombine.high %v12994_v23, %v4194_v25 }
 0x807   : > { %11132 = vmatmul.mubr.msk.f32.vlgmr.msra.gmra.mrb[26].mxu1 %vm5329_vm3, %v2989_v8  ;;  %11151 = vmatmul.mubr.msk.f32.vlgmr.msra.gmra.mrb[22].mxu0 %vm5329_vm3, %v2990_v59  ;;  %v4256_v31 = vrot.slane %v4242_v42, %v12269_v41 }
 0x808   : > { %11622 = vmatpush3.bf16.xpose.msk.msra.mxu1 %vm12783_vm4, %v12939_v57  ;;  %11638 = vmatpush3.bf16.xpose.msk.msra.mxu0 %vm12783_vm4, %v12941_v6  ;;  %v4325_v57 = vcombine.low %v4172_v55, %v4220_v22  ;;  %v4340_v6 = vrot.slane %v4326_v50, %v12269_v41  ;;  %v4176_v14 = vpop.permute.xlu1 %4175 }
 0x809   : > { %11623 = vmatprep.subr.bf16.mxu1 %v11997_v3  ;;  %11639 = vmatprep.subr.bf16.mxu0 %v11997_v3 }
 0x80a   : > { %11169 = vmatprep.mubr.msk.f32.mxu1 %vm11998_vm0, %v11999_v9  ;;  %11188 = vmatprep.mubr.msk.f32.mxu0 %vm11998_vm0, %v11999_v9  ;;  %v4333_v63 = vrot.slane %v4325_v57, %v12269_v41  ;;  %v4357_v0 = vcombine.low %v4324_v36, %v4340_v6  ;;  %v4358_v52 = vcombine.high %v4324_v36, %v4340_v6 }
 0x80c   : > { %v4341_v19 = vcombine.low %v4317_v32, %v4333_v63  ;;  %v4342_v15 = vcombine.high %v4317_v32, %v4333_v63  ;;  %v4365_v56 = vrot.slane %v4357_v0, %v12272_v48  ;;  %v4372_v58 = vrot.slane %v4358_v52, %v12272_v48 }
 0x80e   : > { %v4349_v54 = vrot.slane %v4341_v19, %v12272_v48  ;;  %v4356_v4 = vrot.slane %v4342_v15, %v12272_v48  ;;  %v4869_v46 = vcombine.low %v4365_v56, %v4372_v58  ;;  %v10458_v18 = vcombine.high %v4365_v56, %v4372_v58  ;;  %v4174_v58 = vpop.permute.xlu0 %4173 }
 0x80f   : > { %v2958_v19 = vcombine.high %v13051_v45, %v13054_v26 }
 0x810   : > { %11626 = vmatpush3.bf16.xpose.msk.msra.mxu1 %vm12783_vm4, %v12963_v30  ;;  %11642 = vmatpush3.bf16.xpose.msk.msra.mxu0 %vm12783_vm4, %v12965_v47  ;;  %v4272_v30 = vrot.slane %v4258_v21, %v12269_v41  ;;  %v4853_v10 = vcombine.low %v4349_v54, %v4356_v4  ;;  %v10457_v33 = vcombine.high %v4349_v54, %v4356_v4 }
 0x811   : > { %11627 = vmatprep.subr.bf16.mxu1 %v11997_v3  ;;  %11643 = vmatprep.subr.bf16.mxu0 %v11997_v3  ;;  %v4241_v47 = vcombine.low %v12994_v23, %v4194_v25  ;;  %v13113_v60 = vrot.slane %v4869_v46, %v12269_v41  ;;  %v13116_v55 = vrot.slane %v10458_v18, %v12269_v41 }
 0x812   : > { %v13105_v8 = vrot.slane %v4853_v10, %v12269_v41  ;;  %v13108_v59 = vrot.slane %v10457_v33, %v12269_v41  ;;  %v4289_v22 = vcombine.low %v4256_v31, %v4272_v30  ;;  %v4290_v36 = vcombine.high %v4256_v31, %v4272_v30  ;;  %v4200_v30 = vpop.permute.xlu1 %4199 }
 0x813   : > { %v4249_v27 = vrot.slane %v4241_v47, %v12269_v41  ;;  %v4901_v50 = vcombine.low %v13113_v60, %v13116_v55  ;;  %v2972_v26 = vrot.slane %v2958_v19, %v12272_v48  ;;  %v4198_v47 = vpop.permute.xlu0 %4197  ;;  %v4445_v42 = vcombine.low %v13002_v51, %v4200_v30 }
 0x814   : > { %v4885_v57 = vcombine.low %v13105_v8, %v13108_v59  ;;  %v4297_v5 = vrot.slane %v4289_v22, %v12272_v48  ;;  %v4304_v13 = vrot.slane %v4290_v36, %v12272_v48  ;;  %v4446_v46 = vcombine.high %v13002_v51, %v4200_v30 }
 0x815   : > { %v4273_v32 = vcombine.low %v4249_v27, %v4265_v16  ;;  %v4274_v23 = vcombine.high %v4249_v27, %v4265_v16  ;;  %v4909_v54 = vrot.slane %v4901_v50, %v12272_v48  ;;  %v4377_v27 = vcombine.low %v13004_v53, %v4198_v47 }
 0x816   : > { %v4801_v0 = vcombine.low %v4297_v5, %v4304_v13  ;;  %v10456_v52 = vcombine.high %v4297_v5, %v4304_v13  ;;  %v4893_v21 = vrot.slane %v4885_v57, %v12272_v48  ;;  %v4378_v31 = vcombine.high %v13004_v53, %v4198_v47  ;;  %v4224_v57 = vpop.permute.xlu1 %4223 }
 0x817   : > { %v4281_v63 = vrot.slane %v4273_v32, %v12272_v48  ;;  %v4288_v6 = vrot.slane %v4274_v23, %v12272_v48  ;;  %v4460_v22 = vrot.slane %v4446_v46, %v12269_v41  ;;  %v4385_v51 = vrot.slane %v4377_v27, %v12269_v41  ;;  %v4222_v53 = vpop.permute.xlu0 %4221 }
 0x818   : > { %11630 = vmatpush3.bf16.xpose.msk.msra.mxu1 %vm12783_vm4, %v12959_v43  ;;  %11646 = vmatpush3.bf16.xpose.msk.msra.mxu0 %vm12783_vm4, %v12961_v34  ;;  %v2974_v43 = vcombine.high %v13057_v1, %v13060_v11  ;;  %v4808_v16 = vrot.slane %v4801_v0, %v12269_v41  ;;  %v4816_v45 = vrot.slane %v10456_v52, %v12269_v41 }
 0x819   : > { %11631 = vmatprep.subr.bf16.mxu1 %v11997_v3  ;;  %11647 = vmatprep.subr.bf16.mxu0 %v11997_v3  ;;  %v4785_v15 = vcombine.low %v4281_v63, %v4288_v6  ;;  %v10455_v34 = vcombine.high %v4281_v63, %v4288_v6  ;;  %v4917_v10 = vcombine.low %v4893_v21, %v4909_v54 }
 0x81a   : > { %v2988_v1 = vrot.slane %v2974_v43, %v12272_v48  ;;  %v4833_v25 = vcombine.low %v4808_v16, %v4816_v45  ;;  %v4918_v33 = vcombine.high %v4893_v21, %v4909_v54  ;;  %v4392_v36 = vrot.slane %v4378_v31, %v12269_v41 }
 0x81b   : > { %v4792_v4 = vrot.slane %v4785_v15, %v12269_v41  ;;  %v4800_v56 = vrot.slane %v10455_v34, %v12269_v41  ;;  %v4461_v6 = vcombine.low %v4176_v14, %v4224_v57  ;;  %v4462_v5 = vcombine.high %v4176_v14, %v4224_v57  ;;  %v4178_v30 = vpop.permute.xlu0 %4177 }
 0x81c   : > { %v2991_v32 = vcombine.low %v2972_v26, %v2988_v1  ;;  %v2992_v23 = vcombine.high %v2972_v26, %v2988_v1  ;;  %v4834_v19 = vcombine.high %v4808_v16, %v4816_v45  ;;  %v4393_v43 = vcombine.low %v4174_v58, %v4222_v53 }
 0x81d   : > { %v4817_v11 = vcombine.low %v4792_v4, %v4800_v56  ;;  %v4818_v13 = vcombine.high %v4792_v4, %v4800_v56  ;;  %v4394_v15 = vcombine.high %v4174_v58, %v4222_v53  ;;  %v4469_v52 = vrot.slane %v4461_v6, %v12269_v41  ;;  %v4180_v56 = vpop.permute.xlu1 %4179 }
 0x81e   : > { %v4476_v21 = vrot.slane %v4462_v5, %v12269_v41  ;;  %v13170_v26 = vrot.slane %v4834_v19, %v12272_v48  ;;  %v4401_v14 = vrot.slane %v4393_v43, %v12269_v41  ;;  %v4886_v58 = vcombine.high %v13105_v8, %v13108_v59 }
 0x81f   : > { %v4825_v18 = vrot.slane %v4817_v11, %v12272_v48  ;;  %v13167_v54 = vrot.slane %v4818_v13, %v12272_v48  ;;  %v4408_v4 = vrot.slane %v4394_v15, %v12269_v41 }
 0x820   : > { %11634 = vmatpush3.bf16.xpose.msk.msra.mxu1 %vm12783_vm4, %v12967_v40  ;;  %11650 = vmatpush3.bf16.xpose.msk.msra.mxu0 %vm12783_vm4, %v12969_v7  ;;  %v4841_v40 = vrot.slane %v4833_v25, %v12272_v48  ;;  %v4453_v7 = vrot.slane %v4445_v42, %v12269_v41  ;;  %v4493_v1 = vcombine.low %v4460_v22, %v4476_v21 }
 0x821   : > { %11651 = vmatprep.subr.bf16.mxu1 %v11997_v3  ;;  %11663 = vmatprep.subr.bf16.mxu0 %v11997_v3  ;;  %v4494_v11 = vcombine.high %v4460_v22, %v4476_v21  ;;  %v4409_v25 = vcombine.low %v4385_v51, %v4401_v14  ;;  %v4426_v47 = vcombine.high %v4392_v36, %v4408_v4 }
 0x822   : > { %v4849_v50 = vcombine.low %v4825_v18, %v4841_v40  ;;  %v4850_v63 = vcombine.high %v4825_v18, %v4841_v40  ;;  %v4477_v16 = vcombine.low %v4453_v7, %v4469_v52  ;;  %v4478_v45 = vcombine.high %v4453_v7, %v4469_v52  ;;  %v4204_v7 = vpop.permute.xlu1 %4203 }
 0x823   : > { %v4501_v18 = vrot.slane %v4493_v1, %v12272_v48  ;;  %v4508_v27 = vrot.slane %v4494_v11, %v12272_v48  ;;  %v4417_v31 = vrot.slane %v4409_v25, %v12272_v48  ;;  %v4582_v1 = vcombine.high %v13014_v62, %v4204_v7 }
 0x824   : > { %v11652_v34 = vpack.c.bf16 %v4917_v10, %v4849_v50  ;;  %v11664_v0 = vpack.c.bf16 %v4918_v33, %v4850_v63  ;;  %v4410_v10 = vcombine.high %v4385_v51, %v4401_v14  ;;  %v4425_v33 = vcombine.low %v4392_v36, %v4408_v4  ;;  %v4202_v50 = vpop.permute.xlu0 %4201 }
 0x825   : > { %v4485_v42 = vrot.slane %v4477_v16, %v12272_v48  ;;  %v4492_v46 = vrot.slane %v4478_v45, %v12272_v48  ;;  %v5005_v36 = vcombine.low %v4501_v18, %v4508_v27  ;;  %v10462_v57 = vcombine.high %v4501_v18, %v4508_v27 }
 0x826   : > { %v4424_v40 = vrot.slane %v4410_v10, %v12272_v48  ;;  %v4228_v14 = vpop.permute.xlu1 %4227  ;;  %v4513_v4 = vcombine.low %v13020_v2, %v4202_v50  ;;  %v4514_v16 = vcombine.high %v13020_v2, %v4202_v50  ;;  %v4581_v45 = vcombine.low %v13014_v62, %v4204_v7 }
 0x827   : > { %11170 = vmatmul.mubr.msk.f32.vlgmr.msra.gmra.mrb[28].mxu1 %vm5329_vm3, %v2991_v32  ;;  %11189 = vmatmul.mubr.msk.f32.vlgmr.msra.gmra.mrb[24].mxu0 %vm5329_vm3, %v2992_v23  ;;  %v4433_v32 = vrot.slane %v4425_v33, %v12272_v48  ;;  %v4440_v23 = vrot.slane %v4426_v47, %v12272_v48  ;;  %v4989_v22 = vcombine.low %v4485_v42, %v4492_v46 }
 0x828   : > { %11653 = vmatpush3.bf16.msra.mxu1 %v11652_v34  ;;  %11665 = vmatpush3.bf16.msra.mxu0 %v11664_v0  ;;  %v10461_v51 = vcombine.high %v4485_v42, %v4492_v46  ;;  %v4921_v63 = vcombine.low %v4417_v31, %v4424_v40  ;;  %v10459_v53 = vcombine.high %v4417_v31, %v4424_v40  ;;  %v4226_v11 = vpop.permute.xlu0 %4225 }
 0x829   : > { %11654 = vmatprep.subr.bf16.mxu1 %v11997_v3  ;;  %11666 = vmatprep.subr.bf16.mxu0 %v11997_v3  ;;  %v4937_v6 = vcombine.low %v4433_v32, %v4440_v23  ;;  %v10460_v5 = vcombine.high %v4433_v32, %v4440_v23  ;;  %v13193_v13 = vrot.slane %v4989_v22, %v12269_v41 }
 0x82a   : > { %11207 = vmatprep.mubr.msk.f32.mxu1 %vm11998_vm0, %v11999_v9  ;;  %11226 = vmatprep.mubr.msk.f32.mxu0 %vm11998_vm0, %v11999_v9  ;;  %v13196_v19 = vrot.slane %v10461_v51, %v12269_v41  ;;  %v13199_v43 = vrot.slane %v5005_v36, %v12269_v41  ;;  %v13202_v15 = vrot.slane %v10462_v57, %v12269_v41 }
 0x82b   : > { %v13205_v34 = vrot.slane %v4921_v63, %v12269_v41  ;;  %v13208_v0 = vrot.slane %v10459_v53, %v12269_v41  ;;  %v13211_v52 = vrot.slane %v4937_v6, %v12269_v41  ;;  %v13214_v21 = vrot.slane %v10460_v5, %v12269_v41 }
 0x82c   : > { %v4529_v25 = vcombine.low %v4178_v30, %v4226_v11  ;;  %v4530_v10 = vcombine.high %v4178_v30, %v4226_v11  ;;  %v4597_v33 = vcombine.low %v4180_v56, %v4228_v14  ;;  %v4598_v47 = vcombine.high %v4180_v56, %v4228_v14 }
 0x82d   : > { %v4521_v42 = vrot.slane %v4513_v4, %v12269_v41  ;;  %v4528_v46 = vrot.slane %v4514_v16, %v12269_v41  ;;  %v4589_v18 = vrot.slane %v4581_v45, %v12269_v41  ;;  %v4596_v27 = vrot.slane %v4582_v1, %v12269_v41 }
 0x82e   : > { %v4537_v31 = vrot.slane %v4529_v25, %v12269_v41  ;;  %v4544_v2 = vrot.slane %v4530_v10, %v12269_v41  ;;  %v4605_v40 = vrot.slane %v4597_v33, %v12269_v41  ;;  %v4612_v62 = vrot.slane %v4598_v47, %v12269_v41 }
 0x82f   : > { %v4953_v30 = vcombine.low %v13205_v34, %v13208_v0  ;;  %v4969_v56 = vcombine.low %v13211_v52, %v13214_v21  ;;  %v5021_v32 = vcombine.low %v13193_v13, %v13196_v19  ;;  %v5037_v23 = vcombine.low %v13199_v43, %v13202_v15 }
 0x830   : > { %v4545_v7 = vcombine.low %v4521_v42, %v4537_v31  ;;  %v4546_v22 = vcombine.high %v4521_v42, %v4537_v31  ;;  %v4561_v51 = vcombine.low %v4528_v46, %v4544_v2  ;;  %v4562_v36 = vcombine.high %v4528_v46, %v4544_v2 }
 0x831   : > { %v4613_v57 = vcombine.low %v4589_v18, %v4605_v40  ;;  %v4614_v50 = vcombine.high %v4589_v18, %v4605_v40  ;;  %v4629_v63 = vcombine.low %v4596_v27, %v4612_v62  ;;  %v4630_v53 = vcombine.high %v4596_v27, %v4612_v62 }
 0x832   : > { %v4553_v6 = vrot.slane %v4545_v7, %v12272_v48  ;;  %v4560_v5 = vrot.slane %v4546_v22, %v12272_v48  ;;  %v4569_v14 = vrot.slane %v4561_v51, %v12272_v48  ;;  %v4576_v4 = vrot.slane %v4562_v36, %v12272_v48 }
 0x833   : > { %v4621_v16 = vrot.slane %v4613_v57, %v12272_v48  ;;  %v4628_v45 = vrot.slane %v4614_v50, %v12272_v48  ;;  %v4637_v1 = vrot.slane %v4629_v63, %v12272_v48  ;;  %v4644_v11 = vrot.slane %v4630_v53, %v12272_v48 }
 0x834   : > { %v5057_v25 = vcombine.low %v4553_v6, %v4560_v5  ;;  %v10463_v10 = vcombine.high %v4553_v6, %v4560_v5  ;;  %v5073_v33 = vcombine.low %v4569_v14, %v4576_v4  ;;  %v10464_v47 = vcombine.high %v4569_v14, %v4576_v4 }
 0x835   : > { %v5125_v42 = vcombine.low %v4621_v16, %v4628_v45  ;;  %v10465_v46 = vcombine.high %v4621_v16, %v4628_v45  ;;  %v5141_v18 = vcombine.low %v4637_v1, %v4644_v11  ;;  %v10466_v27 = vcombine.high %v4637_v1, %v4644_v11 }
 0x836   : > { %v13245_v31 = vrot.slane %v5057_v25, %v12269_v41  ;;  %v5072_v2 = vrot.slane %v10463_v10, %v12269_v41  ;;  %v5080_v40 = vrot.slane %v5073_v33, %v12269_v41  ;;  %v5088_v62 = vrot.slane %v10464_v47, %v12269_v41 }
 0x837   : > { %v13251_v7 = vrot.slane %v5125_v42, %v12269_v41  ;;  %v5140_v22 = vrot.slane %v10465_v46, %v12269_v41  ;;  %v13255_v51 = vrot.slane %v5141_v18, %v12269_v41  ;;  %v13258_v36 = vrot.slane %v10466_v27, %v12269_v41 }
 0x838   : > { %v4961_v57 = vrot.slane %v4953_v30, %v12272_v48  ;;  %v4977_v50 = vrot.slane %v4969_v56, %v12272_v48  ;;  %v5029_v63 = vrot.slane %v5021_v32, %v12272_v48  ;;  %v5045_v53 = vrot.slane %v5037_v23, %v12272_v48 }
 0x839   : > { %v5089_v6 = vcombine.low %v13245_v31, %v5072_v2  ;;  %v5105_v5 = vcombine.low %v5080_v40, %v5088_v62  ;;  %v5157_v14 = vcombine.low %v13251_v7, %v5140_v22  ;;  %v5173_v4 = vcombine.low %v13255_v51, %v13258_v36 }
 0x83a   : > { %v4985_v16 = vcombine.low %v4961_v57, %v4977_v50  ;;  %v5053_v45 = vcombine.low %v5029_v63, %v5045_v53  ;;  %v4986_v1 = vcombine.high %v4961_v57, %v4977_v50  ;;  %v5054_v11 = vcombine.high %v5029_v63, %v5045_v53 }
 0x83b   : > { %v5097_v30 = vrot.slane %v5089_v6, %v12272_v48  ;;  %v5113_v56 = vrot.slane %v5105_v5, %v12272_v48  ;;  %v5165_v32 = vrot.slane %v5157_v14, %v12272_v48  ;;  %v5181_v23 = vrot.slane %v5173_v4, %v12272_v48 }
 0x83c   : > { %v11655_v25 = vpack.c.bf16 %v5053_v45, %v4985_v16  ;;  %v11667_v10 = vpack.c.bf16 %v5054_v11, %v4986_v1  ;;  %v4851_v33 = vcombine.low %v13167_v54, %v13170_v26  ;;  %v4900_v47 = vrot.slane %v4886_v58, %v12272_v48 }
 0x83d   : > { %v5121_v42 = vcombine.low %v5097_v30, %v5113_v56  ;;  %v5189_v46 = vcombine.low %v5165_v32, %v5181_v23  ;;  %v5122_v18 = vcombine.high %v5097_v30, %v5113_v56  ;;  %v5190_v27 = vcombine.high %v5165_v32, %v5181_v23 }
 0x83e   : > { %11656 = vmatpush3.bf16.msra.mxu1 %v11655_v25  ;;  %11668 = vmatpush3.bf16.msra.mxu0 %v11667_v10  ;;  %v4902_v57 = vcombine.high %v13113_v60, %v13116_v55  ;;  %v4852_v50 = vcombine.high %v13167_v54, %v13170_v26  ;;  %v4954_v63 = vcombine.high %v13205_v34, %v13208_v0 }
 0x83f   : > { %11657 = vmatprep.subr.bf16.mxu1 %v11997_v3  ;;  %11669 = vmatprep.subr.bf16.mxu0 %v11997_v3  ;;  %v11658_v8 = vpack.c.bf16 %v5189_v46, %v5121_v42  ;;  %v11670_v59 = vpack.c.bf16 %v5190_v27, %v5122_v18  ;;  %v4970_v58 = vcombine.high %v13211_v52, %v13214_v21 }
 0x840   : > { %v4916_v53 = vrot.slane %v4902_v57, %v12272_v48  ;;  %v4968_v6 = vrot.slane %v4954_v63, %v12272_v48  ;;  %v5022_v60 = vcombine.high %v13193_v13, %v13196_v19  ;;  %v5038_v55 = vcombine.high %v13199_v43, %v13202_v15 }
 0x841   : > { %v4984_v54 = vrot.slane %v4970_v58, %v12272_v48  ;;  %v5090_v26 = vcombine.high %v13245_v31, %v5072_v2  ;;  %v5106_v34 = vcombine.high %v5080_v40, %v5088_v62  ;;  %v5158_v0 = vcombine.high %v13251_v7, %v5140_v22 }
 0x842   : > { %11659 = vmatpush3.bf16.msra.mxu1 %v11658_v8  ;;  %11671 = vmatpush3.bf16.msra.mxu0 %v11670_v59  ;;  %v4919_v52 = vcombine.low %v4900_v47, %v4916_v53  ;;  %v4920_v21 = vcombine.high %v4900_v47, %v4916_v53  ;;  %v5036_v5 = vrot.slane %v5022_v60, %v12272_v48  ;;  %v4182_v53 = vpop.permute.xlu0 %4181 }
 0x843   : > { %11660 = vmatprep.subr.bf16.mxu1 %v11997_v3  ;;  %11672 = vmatprep.subr.bf16.mxu0 %v11997_v3  ;;  %v4987_v13 = vcombine.low %v4968_v6, %v4984_v54  ;;  %v5052_v19 = vrot.slane %v5038_v55, %v12272_v48  ;;  %v4988_v43 = vcombine.high %v4968_v6, %v4984_v54  ;;  %v4184_v6 = vpop.permute.xlu1 %4183 }
 0x844   : > { %v13301_v15 = vpack.c.bf16 %v4919_v52, %v4851_v33  ;;  %v13303_v31 = vpack.c.bf16 %v4920_v21, %v4852_v50  ;;  %v5104_v2 = vrot.slane %v5090_v26, %v12272_v48  ;;  %v5120_v40 = vrot.slane %v5106_v34, %v12272_v48 }
 0x845   : > { %v5055_v62 = vcombine.low %v5036_v5, %v5052_v19  ;;  %v5056_v7 = vcombine.high %v5036_v5, %v5052_v19  ;;  %v5172_v22 = vrot.slane %v5158_v0, %v12272_v48  ;;  %v5174_v14 = vcombine.high %v13255_v51, %v13258_v36 }
 0x846   : > { %v5123_v4 = vcombine.low %v5104_v2, %v5120_v40  ;;  %v5124_v16 = vcombine.high %v5104_v2, %v5120_v40 }
 0x847   : > { %v13310_v45 = vpack.c.bf16 %v5055_v62, %v4987_v13  ;;  %v13312_v1 = vpack.c.bf16 %v5056_v7, %v4988_v43  ;;  %v5188_v11 = vrot.slane %v5174_v14, %v12272_v48 }
 0x849   : > { %v5191_v30 = vcombine.low %v5172_v22, %v5188_v11  ;;  %v5192_v56 = vcombine.high %v5172_v22, %v5188_v11 }
 0x84b   : > { %v13315_v32 = vpack.c.bf16 %v5191_v30, %v5123_v4  ;;  %v13317_v23 = vpack.c.bf16 %v5192_v56, %v5124_v16 }
 0x8da   : > { %v5423_v25 = vpop.f32.mrb[26].mxu1  ;;  %v5520_v10 = vpop.f32.mrb[22].mxu0 }
 0x8db   : > { %v5718_v33 = vmul.f32 0.5, %v5423_v25  ;;  %v5719_v47 = vmul.f32 0.5, %v5520_v10  ;;  %v11133_v51 = vpop.f32.mrb[27].mxu1  ;;  %v11152_v36 = vpop.f32.mrb[23].mxu0 }
 0x8dd   : > { %v5723_v42 = vsel %vm5722_vm5, %v5718_v33, -inf  ;;  %v5726_v46 = vsel %vm5722_vm5, %v5719_v47, -inf }
 0x8de   : > { %5724 = vmax.xlane.f32.xlu0 %v5723_v42  ;;  %5727 = vmax.xlane.f32.xlu1 %v5726_v46 }
 0x8ef   : > { %4207 = vrot.lane.b32.xlu1 %v13032_v49, %s14493_s27 }
 0x8fa   : > { %v5617_v18 = vpop.f32.mrb[28].mxu1  ;;  %v5714_v27 = vpop.f32.mrb[24].mxu0 }
 0x8fb   : > { %v5720_v57 = vmul.f32 0.5, %v5617_v18  ;;  %v11171_v50 = vpop.f32.mrb[29].mxu1  ;;  %v11190_v63 = vpop.f32.mrb[25].mxu0  ;;  %v5721_v8 = vmul.f32 0.5, %v5714_v27 }
 0x8fd   : > { %v5729_v59 = vsel %vm5722_vm5, %v5720_v57, -inf  ;;  %v5732_v58 = vsel %vm5722_vm5, %v5721_v8, -inf }
 0x8fe   : > { %5730 = vmax.xlane.f32.xlu0 %v5729_v59 }
 0x902   : > { %5733 = vmax.xlane.f32.xlu0 %v5732_v58 }
 0x918   : > { %4205 = vrot.lane.b32.xlu0 %v13038_v61, %s14493_s27 }
 0x96b   : > { %v5725_v60 = vpop.xlane.xlu0 %5724  ;;  %v5728_v55 = vpop.xlane.xlu1 %5727 }
 0x96c   : > { %v5735_v54 = vsub.f32 %v5718_v33, %v5725_v60  ;;  %v5736_v26 = vsub.f32 %v5719_v47, %v5728_v55 }
 0x96e   : > { %v5739_v34 = vmul.f32 1.442695, %v5735_v54  ;;  %v5741_v0 = vmul.f32 1.442695, %v5736_v26 }
 0x96f   : > { %v4208_v30 = vpop.permute.xlu1 %4207 }
 0x970   : > { %11868 = vpow2.f32 %v5739_v34  ;;  %v4717_v47 = vcombine.low %v13032_v49, %v4208_v30  ;;  %v4718_v51 = vcombine.high %v13032_v49, %v4208_v30 }
 0x971   : > { %11870 = vpow2.f32 %v5741_v0 }
 0x972   : > { %v4732_v58 = vrot.slane %v4718_v51, %v12269_v41 }
 0x97a   : > { %v13327_v52 = vpop.eup %11868 }
 0x97b   : > { %v13329_v21 = vpop.eup %11870  ;;  %v5747_v5 = vsel %vm5722_vm5, %v13327_v52, 0.0 }
 0x97c   : > { %5748 = vadd.xlane.f32.xlu0 %v5747_v5  ;;  %v5750_v13 = vsel %vm5722_vm5, %v13329_v21, 0.0 }
 0x97d   : > { %5751 = vadd.xlane.f32.xlu1 %v5750_v13 }
 0x98b   : > { %v5731_v19 = vpop.xlane.xlu0 %5730 }
 0x98c   : > { %v5737_v2 = vsub.f32 %v5720_v57, %v5731_v19 }
 0x98e   : > { %4231 = vrot.lane.b32.xlu1 %v13032_v49, %s14497_s29  ;;  %v5743_v62 = vmul.f32 1.442695, %v5737_v2 }
 0x98f   : > { %v5734_v43 = vpop.xlane.xlu0 %5733 }
 0x990   : > { %v5738_v40 = vsub.f32 %v5721_v8, %v5734_v43  ;;  %11872 = vpow2.f32 %v5743_v62 }
 0x992   : > { %4229 = vrot.lane.b32.xlu0 %v13038_v61, %s14497_s29  ;;  %v5745_v7 = vmul.f32 1.442695, %v5738_v40 }
 0x993   : > { %v4206_v11 = vpop.permute.xlu0 %4205 }
 0x994   : > { %11874 = vpow2.f32 %v5745_v7  ;;  %v4649_v10 = vcombine.low %v13038_v61, %v4206_v11  ;;  %v4650_v33 = vcombine.high %v13038_v61, %v4206_v11  ;;  %v4725_v61 = vrot.slane %v4717_v47, %v12269_v41 }
 0x996   : > { %v4657_v50 = vrot.slane %v4649_v10, %v12269_v41  ;;  %v4664_v63 = vrot.slane %v4650_v33, %v12269_v41 }
 0x99a   : > { %v13339_v22 = vpop.eup %11872 }
 0x99b   : > { %v5753_v4 = vsel %vm5722_vm5, %v13339_v22, 0.0 }
 0x99e   : > { %v13341_v14 = vpop.eup %11874 }
 0x99f   : > { %v5756_v16 = vsel %vm5722_vm5, %v13341_v14, 0.0 }
 0x9b1   : > { %5754 = vadd.xlane.f32.xlu0 %v5753_v4 }
 0x9b2   : > { %5757 = vadd.xlane.f32.xlu1 %v5756_v16 }
 0xa09   : > { %v5749_v56 = vpop.xlane.xlu0 %5748 }
 0xa0a   : > { %v5752_v25 = vpop.xlane.xlu1 %5751  ;;  %11876 = vrcp.f32 %v5749_v56 }
 0xa0b   : > { %11878 = vrcp.f32 %v5752_v25 }
 0xa0d   : > { %v4230_v36 = vpop.permute.xlu0 %4229 }
 0xa0e   : > { %v4665_v42 = vcombine.low %v4182_v53, %v4230_v36  ;;  %v4666_v46 = vcombine.high %v4182_v53, %v4230_v36  ;;  %v4232_v18 = vpop.permute.xlu1 %4231 }
 0xa0f   : > { %v4733_v27 = vcombine.low %v4184_v6, %v4232_v18  ;;  %v4734_v57 = vcombine.high %v4184_v6, %v4232_v18 }
 0xa10   : > { %v4673_v8 = vrot.slane %v4665_v42, %v12269_v41  ;;  %v4680_v59 = vrot.slane %v4666_v46, %v12269_v41 }
 0xa11   : > { %v4741_v49 = vrot.slane %v4733_v27, %v12269_v41  ;;  %v4748_v60 = vrot.slane %v4734_v57, %v12269_v41 }
 0xa12   : > { %v4681_v53 = vcombine.low %v4657_v50, %v4673_v8  ;;  %v4682_v55 = vcombine.high %v4657_v50, %v4673_v8  ;;  %v4697_v54 = vcombine.low %v4664_v63, %v4680_v59  ;;  %v4698_v6 = vcombine.high %v4664_v63, %v4680_v59 }
 0xa13   : > { %v4749_v26 = vcombine.low %v4725_v61, %v4741_v49  ;;  %v4750_v34 = vcombine.high %v4725_v61, %v4741_v49  ;;  %v4765_v0 = vcombine.low %v4732_v58, %v4748_v60  ;;  %v4766_v5 = vcombine.high %v4732_v58, %v4748_v60 }
 0xa14   : > { %v4689_v13 = vrot.slane %v4681_v53, %v12272_v48  ;;  %v4696_v19 = vrot.slane %v4682_v55, %v12272_v48  ;;  %v4705_v43 = vrot.slane %v4697_v54, %v12272_v48  ;;  %v4712_v2 = vrot.slane %v4698_v6, %v12272_v48  ;;  %v11877_v25 = vpop.eup %11876 }
 0xa15   : > { %v4757_v40 = vrot.slane %v4749_v26, %v12272_v48  ;;  %v4764_v62 = vrot.slane %v4750_v34, %v12272_v48  ;;  %v4773_v7 = vrot.slane %v4765_v0, %v12272_v48  ;;  %v4780_v10 = vrot.slane %v4766_v5, %v12272_v48  ;;  %v11879_v0 = vpop.eup %11878 }
 0xa16   : > { %v5193_v4 = vcombine.low %v4689_v13, %v4696_v19  ;;  %v10467_v16 = vcombine.high %v4689_v13, %v4696_v19  ;;  %v5209_v11 = vcombine.low %v4705_v43, %v4712_v2  ;;  %v10468_v30 = vcombine.high %v4705_v43, %v4712_v2 }
 0xa17   : > { %v5261_v33 = vcombine.low %v4757_v40, %v4764_v62  ;;  %v10469_v47 = vcombine.high %v4757_v40, %v4764_v62  ;;  %v5277_v57 = vcombine.low %v4773_v7, %v4780_v10  ;;  %v10470_v50 = vcombine.high %v4773_v7, %v4780_v10 }
 0xa18   : > { %v5200_v51 = vrot.slane %v5193_v4, %v12269_v41  ;;  %v5208_v36 = vrot.slane %v10467_v16, %v12269_v41  ;;  %v5216_v42 = vrot.slane %v5209_v11, %v12269_v41  ;;  %v5224_v46 = vrot.slane %v10468_v30, %v12269_v41 }
 0xa19   : > { %v5268_v18 = vrot.slane %v5261_v33, %v12269_v41  ;;  %v5276_v27 = vrot.slane %v10469_v47, %v12269_v41  ;;  %v5284_v8 = vrot.slane %v5277_v57, %v12269_v41  ;;  %v5292_v61 = vrot.slane %v10470_v50, %v12269_v41  ;;  %v6062_v57 = vld [vmem:[%s14429_s10 + $0xc] sm:$0xf] }
 0xa1a   : > { %v5225_v63 = vcombine.low %v5200_v51, %v5208_v36  ;;  %v5241_v59 = vcombine.low %v5216_v42, %v5224_v46  ;;  %v5760_v19 = vmul.f32 %v11877_v25, %v13327_v52  ;;  %v5762_v43 = vmul.f32 %v11879_v0, %v13329_v21 }
 0xa1b   : > { %v5293_v56 = vcombine.low %v5268_v18, %v5276_v27  ;;  %v5309_v53 = vcombine.low %v5284_v8, %v5292_v61  ;;  %v5226_v2 = vcombine.high %v5200_v51, %v5208_v36  ;;  %v5242_v40 = vcombine.high %v5216_v42, %v5224_v46  ;;  %v6059_v36 = vld [vmem:[%s14429_s10] sm:$0xf] }
 0xa1c   : > { %v5233_v58 = vrot.slane %v5225_v63, %v12272_v48  ;;  %v5249_v49 = vrot.slane %v5241_v59, %v12272_v48  ;;  %v5294_v62 = vcombine.high %v5268_v18, %v5276_v27  ;;  %v5310_v7 = vcombine.high %v5284_v8, %v5292_v61 }
 0xa1d   : > { %v5301_v60 = vrot.slane %v5293_v56, %v12272_v48  ;;  %v5317_v54 = vrot.slane %v5309_v53, %v12272_v48  ;;  %v5240_v52 = vrot.slane %v5226_v2, %v12272_v48  ;;  %v5256_v21 = vrot.slane %v5242_v40, %v12272_v48 }
 0xa1e   : > { %v5257_v55 = vcombine.low %v5233_v58, %v5249_v49  ;;  %v5258_v6 = vcombine.high %v5233_v58, %v5249_v49  ;;  %v5308_v4 = vrot.slane %v5294_v62, %v12272_v48  ;;  %v5324_v16 = vrot.slane %v5310_v7, %v12272_v48 }
 0xa1f   : > { %v5325_v26 = vcombine.low %v5301_v60, %v5317_v54  ;;  %v5326_v34 = vcombine.high %v5301_v60, %v5317_v54  ;;  %v5260_v11 = vcombine.high %v5240_v52, %v5256_v21 }
 0xa20   : > { %v5328_v30 = vcombine.high %v5308_v4, %v5324_v16 }
 0xa21   : > { %v11661_v5 = vpack.c.bf16 %v5325_v26, %v5257_v55  ;;  %v11673_v13 = vpack.c.bf16 %v5326_v34, %v5258_v6 }
 0xa23   : > { %11662 = vmatpush3.bf16.msra.mxu1 %v11661_v5  ;;  %11674 = vmatpush3.bf16.msra.mxu0 %v11673_v13  ;;  %v10519_v13 = vld [vmem:[%s14430_s11] ss:$0 sm:$0xff] }
 0xa24   : > { %11675 = vmatprep.subr.bf16.mxu1 %v11997_v3  ;;  %11687 = vmatprep.subr.bf16.mxu0 %v11997_v3 }
 0xa26   : > { %11208 = vmatmul.mubr.msk.f32.vlgmr.msra.gmra.mrb[30].mxu1 %vm5722_vm5, %v5760_v19  ;;  %11227 = vmatmul.mubr.msk.f32.vlgmr.msra.gmra.mrb[26].mxu0 %vm5722_vm5, %v5762_v43 }
 0xa27   : > { %11677 = vmatpush3.bf16.msra.mxu1 %v13301_v15  ;;  %11689 = vmatpush3.bf16.msra.mxu0 %v13303_v31  ;;  %v5259_v15 = vcombine.low %v5240_v52, %v5256_v21  ;;  %v5327_v31 = vcombine.low %v5308_v4, %v5324_v16  ;;  %v6407_v16 = vld [vmem:[%s14431_s12] sm:$0xff] }
 0xa28   : > { %11678 = vmatprep.subr.bf16.mxu1 %v11997_v3  ;;  %11690 = vmatprep.subr.bf16.mxu0 %v11997_v3 }
 0xa29   : > { %11245 = vmatprep.mubr.msk.f32.mxu1 %vm11998_vm0, %v11999_v9  ;;  %11264 = vmatprep.mubr.msk.f32.mxu0 %vm11998_vm0, %v11999_v9  ;;  %v11685_v10 = vpack.c.bf16 %v5327_v31, %v5259_v15  ;;  %v6408_v15 = vld [vmem:[%s14431_s12 + $0x8] sm:$0xff] }
 0xa2a   : > { %v11700_v31 = vpack.c.bf16 %v6408_v15, %v6407_v16  ;;  %v10542_v16 = vld [vmem:[%s14435_s16 + $0x50] sm:$0xff]  ;;  %v10543_v15 = vld [vmem:[%s14435_s16 + $0x58] sm:$0xff] }
 0xa2b   : > { %11680 = vmatpush3.bf16.msra.mxu1 %v13310_v45  ;;  %11692 = vmatpush3.bf16.msra.mxu0 %v13312_v1  ;;  %v11697_v45 = vpack.c.bf16 %v5328_v30, %v5260_v11  ;;  %v6410_v11 = vld [vmem:[%s14431_s12 + $0x18] sm:$0xff] }
 0xa2c   : > { %11681 = vmatprep.subr.bf16.mxu1 %v11997_v3  ;;  %11693 = vmatprep.subr.bf16.mxu0 %v11997_v3 }
 0xa2f   : > { %11683 = vmatpush3.bf16.msra.mxu1 %v13315_v32  ;;  %11695 = vmatpush3.bf16.msra.mxu0 %v13317_v23 }
 0xa30   : > { %11684 = vmatprep.subr.bf16.mxu1 %v11997_v3  ;;  %11696 = vmatprep.subr.bf16.mxu0 %v11997_v3 }
 0xa33   : > { %11686 = vmatpush3.bf16.msra.mxu1 %v11685_v10  ;;  %11698 = vmatpush3.bf16.msra.mxu0 %v11697_v45  ;;  %v6492_v10 = vld [vmem:[%s14433_s14] sm:$0xff]  ;;  %v6493_v45 = vld [vmem:[%s14433_s14 + $0x8] sm:$0xff] }
 0xa34   : > { %11267 = vmatprep.subr.mxu1 %v11999_v9  ;;  %11277 = vmatprep.subr.mxu0 %v11999_v9 }
 0xa3e   : > { %v5755_v1 = vpop.xlane.xlu0 %5754 }
 0xa3f   : > { %11880 = vrcp.f32 %v5755_v1  ;;  %v5758_v33 = vpop.xlane.xlu1 %5757  ;;  %v6494_v1 = vld [vmem:[%s14433_s14 + $0x10] sm:$0xff] }
 0xa40   : > { %11882 = vrcp.f32 %v5758_v33  ;;  %v11706_v33 = vpack.c.bf16 %v6493_v45, %v6492_v10  ;;  %v10524_v45 = vld [vmem:[%s14436_s17] ss:$0 sm:$0xff] }
 0xa49   : > { %v11881_v47 = vpop.eup %11880 }
 0xa4a   : > { %v11883_v32 = vpop.eup %11882  ;;  %v5764_v23 = vmul.f32 %v11881_v47, %v13339_v22  ;;  %v6061_v22 = vld [vmem:[%s14429_s10 + $0x8] sm:$0xf]  ;;  %v6495_v47 = vld [vmem:[%s14433_s14 + $0x18] sm:$0xff] }
 0xa4b   : > { %v5766_v51 = vmul.f32 %v11883_v32, %v13341_v14  ;;  %v6060_v14 = vld [vmem:[%s14429_s10 + $0x4] sm:$0xf]  ;;  %v11709_v32 = vpack.c.bf16 %v6495_v47, %v6494_v1 }
 0xa4c   : > { %11246 = vmatmul.mubr.msk.f32.vlgmr.msra.gmra.mrb[32].mxu1 %vm5722_vm5, %v5764_v23  ;;  %v6496_v23 = vld [vmem:[%s14433_s14 + $0x20] sm:$0xff] }
 0xa4d   : > { %11265 = vmatmul.mubr.msk.f32.vlgmr.msra.gmra.mrb[28].mxu0 %vm5722_vm5, %v5766_v51  ;;  %11269 = vmatprep.mubr.msk.f32.mxu1 %vm11998_vm0, %v11999_v9  ;;  %v6497_v51 = vld [vmem:[%s14433_s14 + $0x28] sm:$0xff] }
 0xa4e   : > { %11279 = vmatprep.mubr.msk.f32.mxu0 %vm11998_vm0, %v11999_v9  ;;  %11268 = vmatpush3.msk.msra.mxu1 %vm6066_vm6, %v6059_v36  ;;  %v11712_v36 = vpack.c.bf16 %v6497_v51, %v6496_v23 }
 0xa4f   : > { %11272 = vmatprep.subr.mxu1 %v11999_v9  ;;  %11278 = vmatpush3.msk.msra.mxu0 %vm6066_vm6, %v6061_v22 }
 0xa50   : > { %11699 = vmatprep.subr.bf16.mxu0 %v11997_v3 }
 0xaf9   : > { %v5836_v42 = vpop.f32.mrb[30].mxu1  ;;  %v5909_v46 = vpop.f32.mrb[26].mxu0 }
 0xafa   : > { %v11209_v18 = vpop.f32.mrb[31].mxu1  ;;  %v11228_v27 = vpop.f32.mrb[27].mxu0  ;;  %11270 = vmatmul.mubr.msk.f32.vlgmr.msra.gmra.mrb[34].mxu1 %vm5329_vm3, %v5836_v42 }
 0xafb   : > { %11273 = vmatpush3.msk.msra.mxu1 %vm6066_vm6, %v6060_v14  ;;  %11274 = vmatprep.mubr.msk.f32.mxu1 %vm11998_vm0, %v11999_v9  ;;  %v13495_v18 = vld [vmem:[%s14439_s20] sm:$0xf] }
 0xafc   : > { %11282 = vmatprep.subr.mxu1 %v11999_v9 }
 0xafe   : > { %11275 = vmatmul.mubr.msk.f32.vlgmr.msra.gmra.mrb[36].mxu1 %vm5329_vm3, %v5909_v46  ;;  %v6399_v46 = vsub.s32 1, %v12266_v37 }
 0xaff   : > { %11283 = vmatpush3.msk.msra.mxu1 %vm6066_vm6, %v6062_v57  ;;  %11284 = vmatprep.mubr.msk.f32.mxu1 %vm11998_vm0, %v11999_v9 }
 0xb00   : > { %11705 = vmatprep.subr.bf16.mxu1 %v11997_v3  ;;  %v6400_v27 = vrot.slane %v13495_v18, %v6399_v46 }
 0xb1f   : > { %v5982_v50 = vpop.f32.mrb[32].mxu1 }
 0xb20   : > { %v6055_v63 = vpop.f32.mrb[28].mxu0  ;;  %v11247_v8 = vpop.f32.mrb[33].mxu1  ;;  %11280 = vmatmul.mubr.msk.f32.vlgmr.msra.gmra.mrb[30].mxu0 %vm5329_vm3, %v5982_v50 }
 0xb21   : > { %v11266_v59 = vpop.f32.mrb[29].mxu0  ;;  %11285 = vmatmul.mubr.msk.f32.vlgmr.msra.gmra.mrb[38].mxu1 %vm5329_vm3, %v6055_v63  ;;  %11295 = vmatprep.mubr.msk.f32.mxu0 %vm11998_vm0, %v11999_v9  ;;  %v13501_v63 = vld [vmem:[%s14440_s21] sm:$0xf] }
 0xb22   : > { %11314 = vmatprep.mubr.msk.f32.mxu1 %vm11998_vm0, %v11999_v9  ;;  %11701 = vmatpush3.bf16.msra.mxu0 %v11700_v31  ;;  %v6405_v8 = vrot.slane %v13501_v63, %v6399_v46  ;;  %v11735_v31 = vpack.c.bf16 %v10543_v15, %v10542_v16 }
 0xb23   : > { %11702 = vmatprep.subr.bf16.mxu0 %v11997_v3  ;;  %11707 = vmatpush3.bf16.msra.mxu1 %v11706_v33 }
 0xb24   : > { %11708 = vmatprep.subr.bf16.mxu1 %v11997_v3 }
 0xb27   : > { %11710 = vmatpush3.bf16.msra.mxu1 %v11709_v32 }
 0xb28   : > { %11711 = vmatprep.subr.bf16.mxu1 %v11997_v3 }
 0xb2b   : > { %11713 = vmatpush3.bf16.msra.mxu1 %v11712_v36 }
 0xb2c   : > { %11714 = vmatprep.subr.bf16.mxu1 %v11997_v3 }
 0xbcd   : > { %v6136_v56 = vpop.f32.mrb[34].mxu1 }
 0xbce   : > { %v11271_v61 = vpop.f32.mrb[35].mxu1  ;;  %v6368_v49 = vsel %vm808_vm1, %v6136_v56, 0.0 }
 0xbcf   : > { %v6498_v61 = vld [vmem:[%s14433_s14 + $0x30] sm:$0xff] }
 0xbd1   : > { %v6212_v58 = vpop.f32.mrb[36].mxu1 }
 0xbd2   : > { %v6369_v60 = vsel %vm808_vm1, %v6212_v58, 0.0  ;;  %v11276_v53 = vpop.f32.mrb[37].mxu1  ;;  %v6499_v58 = vld [vmem:[%s14433_s14 + $0x38] sm:$0xff] }
 0xbd3   : > { %v6370_v55 = vadd.f32 %v6369_v60, %v6368_v49  ;;  %v11715_v49 = vpack.c.bf16 %v6499_v58, %v6498_v61  ;;  %v10520_v60 = vld [vmem:[%s14432_s13] ss:$0 sm:$0xff]  ;;  %v6596_v58 = vsub.s32 2, %v12266_v37 }
 0xbd5   : > { %11716 = vmatpush3.bf16.msra.mxu1 %v11715_v49 }
 0xbd6   : > { %11725 = vmatprep.subr.bf16.mxu1 %v11997_v3 }
 0xbf3   : > { %v6288_v54 = vpop.f32.mrb[30].mxu0 }
 0xbf4   : > { %v6371_v6 = vsel %vm808_vm1, %v6288_v54, 0.0  ;;  %v6364_v25 = vpop.f32.mrb[38].mxu1  ;;  %v11281_v26 = vpop.f32.mrb[31].mxu0 }
 0xbf5   : > { %v6372_v34 = vadd.f32 %v6371_v6, %v6370_v55  ;;  %v11286_v0 = vpop.f32.mrb[39].mxu1  ;;  %v6373_v5 = vsel %vm808_vm1, %v6364_v25, 0.0  ;;  %v6605_v6 = vld [vmem:[%s14435_s16] sm:$0xff]  ;;  %v6606_v25 = vld [vmem:[%s14435_s16 + $0x8] sm:$0xff]  ;;  %v6607_v26 = vld [vmem:[%s14435_s16 + $0x10] sm:$0xff] }
 0xbf6   : > { %v6608_v0 = vld [vmem:[%s14435_s16 + $0x18] sm:$0xff] }
 0xbf7   : > { %v6374_v19 = vadd.f32 %v6373_v5, %v6372_v34  ;;  %v11717_v34 = vpack.c.bf16 %v6606_v25, %v6605_v6  ;;  %v11721_v5 = vpack.c.bf16 %v6608_v0, %v6607_v26 }
 0xbf9   : > { %v6382_v43 = vadd.f32 %v10519_v13, %v6374_v19 }
 0xbfb   : > { %v6383_v2 = vadd.f32 %v6382_v43, %v12618_v44  ;;  %v6409_v44 = vld [vmem:[%s14431_s12 + $0x10] sm:$0xff] }
 0xbfc   : > { %v11703_v30 = vpack.c.bf16 %v6410_v11, %v6409_v44  ;;  %v10535_v44 = vld [vmem:[%s14435_s16 + $0x30] sm:$0xff]  ;;  %v10536_v11 = vld [vmem:[%s14435_s16 + $0x38] sm:$0xff] }
 0xbfd   : > { %v6384_v40 = vsel %vm808_vm1, %v6383_v2, 0.0 }
 0xbfe   : > { %6385 = vadd.xlane.f32.xlu0 %v6384_v40  ;;  %11704 = vmatpush3.bf16.msra.mxu0 %v11703_v30  ;;  %v10540_v40 = vld [vmem:[%s14435_s16 + $0x40] sm:$0xff]  ;;  %v11729_v30 = vpack.c.bf16 %v10536_v11, %v10535_v44 }
 0xbff   : > { %11718 = vmatprep.subr.bf16.mxu0 %v11717_v34 }
 0xc8b   : > { %v6386_v62 = vpop.xlane.xlu0 %6385 }
 0xc8c   : > { %v6387_v7 = vmul.f32 0.03125, %v6386_v62  ;;  %v10541_v62 = vld [vmem:[%s14435_s16 + $0x48] sm:$0xff] }
 0xc8e   : > { %v6388_v52 = vsub.f32 %v6383_v2, %v6387_v7  ;;  %v11732_v7 = vpack.c.bf16 %v10541_v62, %v10540_v40 }
 0xc90   : > { %v6389_v21 = vmul.f32 %v6388_v52, %v6388_v52 }
 0xc92   : > { %v6390_v4 = vsel %vm808_vm1, %v6389_v21, 0.0  ;;  %v10534_v21 = vld [vmem:[%s14435_s16 + $0x28] sm:$0xff] }
 0xc93   : > { %6391 = vadd.xlane.f32.xlu0 %v6390_v4 }
 0xd20   : > { %v6392_v22 = vpop.xlane.xlu0 %6391 }
 0xd21   : > { %v6393_v14 = vmul.f32 0.03125, %v6392_v22 }
 0xd23   : > { %v6394_v42 = vadd.f32 1e-05, %v6393_v14 }
 0xd25   : > { %11884 = vrsqrt.f32 %v6394_v42 }
 0xd2f   : > { %v11885_v57 = vpop.eup %11884 }
 0xd30   : > { %v6396_v50 = vmul.f32 %v11885_v57, %v6388_v52  ;;  %v10533_v52 = vld [vmem:[%s14435_s16 + $0x20] sm:$0xff] }
 0xd31   : > { %v11726_v4 = vpack.c.bf16 %v10534_v21, %v10533_v52 }
 0xd32   : > { %v6401_v59 = vmul.f32 %v6400_v27, %v6396_v50 }
 0xd34   : > { %v6406_v56 = vadd.f32 %v6405_v8, %v6401_v59 }
 0xd36   : > { %11296 = vmatmul.mubr.msk.f32.vlgmr.msra.gmra.mrb[32].mxu0 %vm808_vm1, %v6406_v56 }
 0xd37   : > { %11325 = vmatprep.mubr.msk.f32.mxu0 %vm808_vm1, %v12448_v17  ;;  %11720 = vmatpush3.bf16.msra.mxu0 %v11717_v34 }
 0xd38   : > { %11722 = vmatprep.subr.bf16.mxu0 %v11721_v5 }
 0xd3b   : > { %11724 = vmatpush3.bf16.msra.mxu0 %v11721_v5 }
 0xd3c   : > { %11731 = vmatprep.subr.bf16.mxu0 %v11997_v3 }
 0xd3e   : > { %11326 = vmatmul.mubr.msk.f32.vlgmr.msra.gmra.mrb[34].mxu0 %vm808_vm1, %v12454_v20  ;;  %v10522_v20 = vld [vmem:[%s14434_s15] ss:$0 sm:$0xff] }
 0xd3f   : > { %11328 = vmatprep.mubr.msk.f32.mxu0 %vm808_vm1, %v12467_v24  ;;  %11733 = vmatpush3.bf16.msra.mxu0 %v11732_v7 }
 0xd40   : > { %11734 = vmatprep.subr.bf16.mxu0 %v11997_v3 }
 0xd42   : > { %11329 = vmatmul.mubr.msk.f32.gmra.mrb[36].mxu0 %vm808_vm1, %v12473_v28 }
 0xd43   : > { %11331 = vmatprep.mubr.msk.f32.mxu0 %vm808_vm1, %v12476_v29  ;;  %11736 = vmatpush3.bf16.msra.mxu0 %v11735_v31 }
 0xd44   : > { %11753 = vmatprep.subr.bf16.mxu0 %v11997_v3 }
 0xd46   : > { %11332 = vmatmul.mubr.msk.f32.gmra.mrb[38].mxu0 %vm808_vm1, %v12489_v35 }
 0xd47   : > { %11334 = vmatprep.mubr.msk.f32.mxu0 %vm808_vm1, %v12494_v38 }
 0xd4a   : > { %11335 = vmatmul.mubr.msk.f32.gmra.mrb[40].mxu0 %vm808_vm1, %v12502_v39 }
 0xd4b   : > { %11356 = vmatprep.mubr.msk.f32.mxu0 %vm11998_vm0, %v11999_v9 }
 0xe09   : > { %v6487_v53 = vpop.f32.mrb[32].mxu0 }
 0xe0a   : > { %v6488_v55 = vadd.f32 %v10520_v60, %v6487_v53  ;;  %v11297_v54 = vpop.f32.mrb[33].mxu0  ;;  %v6597_v60 = vrot.slane %v13495_v18, %v6596_v58 }
 0xe0b   : > { %v6602_v54 = vrot.slane %v13501_v63, %v6596_v58 }
 0xe0c   : > { %v6491_v17 = vmax.f32 %v6488_v55, 0.0 }
 0xe0e   : > { %11315 = vmatmul.mubr.msk.f32.vlgmr.msra.gmra.mrb[40].mxu1 %vm5722_vm5, %v6491_v17 }
 0xe0f   : > { %11345 = vmatprep.mubr.msk.f32.mxu1 %vm11998_vm0, %v11999_v9  ;;  %11727 = vmatpush3.bf16.msra.mxu1 %v11726_v4 }
 0xe10   : > { %11728 = vmatprep.subr.bf16.mxu1 %v11997_v3 }
 0xe11   : > { %v11327_v10 = vpop.f32.mrb[34].mxu0 }
 0xe12   : > { %v13588_v1 = vadd.f32 %v11327_v10, %v10524_v45  ;;  %v6682_v33 = vpop.f32.mrb[35].mxu0 }
 0xe13   : > { %11730 = vmatpush3.bf16.msra.mxu1 %v11729_v30  ;;  %v13590_v47 = vadd.f32 %v10524_v45, %v6682_v33 }
 0xe14   : > { %11737 = vmatprep.subr.bf16.mxu1 %v11997_v3 }
 0xe15   : > { %v11330_v32 = vpop.f32.mrb[36].mxu0 }
 0xe16   : > { %v6692_v23 = vpop.f32.mrb[37].mxu0  ;;  %v13611_v46 = vadd.f32 %v11330_v32, %v10524_v45 }
 0xe17   : > { %v13599_v14 = vadd.f32 %v10524_v45, %v6692_v23 }
 0xe19   : > { %v11333_v51 = vpop.f32.mrb[38].mxu0 }
 0xe1a   : > { %v6702_v36 = vpop.f32.mrb[39].mxu0  ;;  %v13625_v57 = vadd.f32 %v11333_v51, %v10524_v45 }
 0xe1b   : > { %v13615_v27 = vadd.f32 %v10524_v45, %v6702_v36 }
 0xe1d   : > { %v11336_v22 = vpop.f32.mrb[40].mxu0 }
 0xe1e   : > { %v6712_v42 = vpop.f32.mrb[41].mxu0  ;;  %v13641_v8 = vadd.f32 %v11336_v22, %v10524_v45 }
 0xe1f   : > { %v13631_v50 = vadd.f32 %v10524_v45, %v6712_v42 }
 0xee1   : > { %v6576_v24 = vpop.f32.mrb[40].mxu1 }
 0xee2   : > { %v6577_v28 = vadd.f32 %v10522_v20, %v6576_v24  ;;  %v11316_v13 = vpop.f32.mrb[41].mxu1 }
 0xee4   : > { %v6580_v29 = vadd.f32 %v6577_v28, %v6406_v56 }
 0xee6   : > { %v6581_v19 = vsel %vm808_vm1, %v6580_v29, 0.0 }
 0xee7   : > { %6582 = vadd.xlane.f32.xlu1 %v6581_v19  ;;  %v11922_v19 = vld [vmem:[%s12219_s4] sm:$0xff]  ;;  %s12007_s4 = smov [#allocation2]  }
 0xee8   : > { %s11937_s0 = sshll.u32 %s12007_s4, 4  ;;  %s11938_s0 = int_to_ptr.vmem [resolvable:$false] %s11937_s0 }
 0xee9   : > { %s11939_s1 = scalar_lea.vmem %s11938_s0, 256  ;;  %p11940_p0 = scmp.lt.s32.totalorder %s10233_s24, %s11938_s0 }
 0xeea   : > { %p11941_p1 = scmp.lt.s32.totalorder %s11939_s1, %s11933_s26 }
 0xeec   : > { %p11942_p2 = por %p11941_p1, %p11940_p0 }
 0xeee   : > { %p11943_p3 = pnand %p11942_p2, %p11936_p13 }
 0xef8   : > { %6901 = vrot.lane.b32.xlu1 %v13590_v47, %s14496_s23 }
 0xefc   : > { %6925 = vrot.lane.b32.xlu1 %v13590_v47, %s14493_s27 }
 0xf00   : > { %6927 = vrot.lane.b32.xlu1 %v13588_v1, %s14493_s27 }
 0xf04   : > { %6951 = vrot.lane.b32.xlu1 %v13588_v1, %s14497_s29 }
 0xf08   : > { %6907 = vrot.lane.b32.xlu1 %v13611_v46, %s14496_s23 }
 0xf0c   : > { %6931 = vrot.lane.b32.xlu1 %v13611_v46, %s14493_s27 }
 0xf10   : > { %6955 = vrot.lane.b32.xlu1 %v13611_v46, %s14497_s29 }
 0xf14   : > { %6911 = vrot.lane.b32.xlu1 %v13625_v57, %s14496_s23 }
 0xf18   : > { %6935 = vrot.lane.b32.xlu1 %v13625_v57, %s14493_s27 }
 0xf1c   : > { %6959 = vrot.lane.b32.xlu1 %v13625_v57, %s14497_s29 }
 0xf20   : > { %6915 = vrot.lane.b32.xlu1 %v13641_v8, %s14496_s23 }
 0xf24   : > { %6939 = vrot.lane.b32.xlu1 %v13641_v8, %s14493_s27 }
 0xf28   : > { %6963 = vrot.lane.b32.xlu1 %v13641_v8, %s14497_s29 }
 0xf74   : > { %v6583_v35 = vpop.xlane.xlu1 %6582 }
 0xf75   : > { %v6584_v43 = vmul.f32 0.03125, %v6583_v35 }
 0xf77   : > { %v13553_v38 = vsub.f32 %v6580_v29, %v6584_v43 }
 0xf78   : > { %v6902_v53 = vpop.permute.xlu1 %6901 }
 0xf79   : > { %v6586_v39 = vmul.f32 %v13553_v38, %v13553_v38 }
 0xf7b   : > { %v6587_v2 = vsel %vm808_vm1, %v6586_v39, 0.0 }
 0xf7c   : > { %6588 = vadd.xlane.f32.xlu0 %v6587_v2  ;;  %v6926_v26 = vpop.permute.xlu1 %6925 }
 0xf7d   : > { %v6973_v5 = vcombine.low %v13590_v47, %v6926_v26  ;;  %v6974_v18 = vcombine.high %v13590_v47, %v6926_v26 }
 0xf7f   : > { %v6981_v28 = vrot.slane %v6973_v5, %v12269_v41  ;;  %v6988_v13 = vrot.slane %v6974_v18, %v12269_v41 }
 0xf80   : > { %v6928_v43 = vpop.permute.xlu1 %6927 }
 0xf81   : > { %v7042_v39 = vcombine.high %v13588_v1, %v6928_v43 }
 0xf83   : > { %v7056_v15 = vrot.slane %v7042_v39, %v12269_v41 }
 0xf84   : > { %v6952_v11 = vpop.permute.xlu1 %6951 }
 0xf88   : > { %v13705_v58 = vpop.permute.xlu1 %6907 }
 0xf92   : > { %6903 = vrot.lane.b32.xlu0 %v13588_v1, %s14496_s23 }
 0xf96   : > { %6949 = vrot.lane.b32.xlu0 %v13590_v47, %s14497_s29 }
 0xf9a   : > { %6905 = vrot.lane.b32.xlu0 %v13599_v14, %s14496_s23 }
 0xf9e   : > { %6929 = vrot.lane.b32.xlu0 %v13599_v14, %s14493_s27 }
 0xfa2   : > { %6953 = vrot.lane.b32.xlu0 %v13599_v14, %s14497_s29 }
 0xfa6   : > { %6909 = vrot.lane.b32.xlu0 %v13615_v27, %s14496_s23 }
 0xfaa   : > { %6933 = vrot.lane.b32.xlu0 %v13615_v27, %s14493_s27 }
 0xfae   : > { %6957 = vrot.lane.b32.xlu0 %v13615_v27, %s14497_s29 }
 0xfb2   : > { %6913 = vrot.lane.b32.xlu0 %v13631_v50, %s14496_s23 }
 0xfb6   : > { %6937 = vrot.lane.b32.xlu0 %v13631_v50, %s14493_s27 }
 0xfba   : > { %6961 = vrot.lane.b32.xlu0 %v13631_v50, %s14497_s29 }
0x1009   : > { %v6589_v59 = vpop.xlane.xlu0 %6588 }
0x100a   : > { %v6590_v56 = vmul.f32 0.03125, %v6589_v59 }
0x100c   : > { %v6591_v61 = vadd.f32 1e-05, %v6590_v56 }
0x100d   : > { %v6904_v49 = vpop.permute.xlu0 %6903 }
0x100e   : > { %11886 = vrsqrt.f32 %v6591_v61  ;;  %v7057_v45 = vcombine.low %v6904_v49, %v6952_v11 }
0x1010   : > { %v7065_v22 = vrot.slane %v7057_v45, %v12269_v41 }
0x1011   : > { %v6950_v6 = vpop.permute.xlu0 %6949 }
0x1012   : > { %v6989_v34 = vcombine.low %v6902_v53, %v6950_v6  ;;  %v6990_v0 = vcombine.high %v6902_v53, %v6950_v6 }
0x1014   : > { %v6997_v63 = vrot.slane %v6989_v34, %v12269_v41  ;;  %v7004_v24 = vrot.slane %v6990_v0, %v12269_v41 }
0x1015   : > { %v13668_v29 = vpop.permute.xlu0 %6905 }
0x1016   : > { %v7005_v2 = vcombine.low %v6981_v28, %v6997_v63  ;;  %v7006_v40 = vcombine.high %v6981_v28, %v6997_v63  ;;  %v7021_v62 = vcombine.low %v6988_v13, %v7004_v24  ;;  %v7022_v7 = vcombine.high %v6988_v13, %v7004_v24  ;;  %v6932_v24 = vpop.permute.xlu1 %6931 }
0x1018   : > { %v11887_v55 = vpop.eup %11886  ;;  %v7013_v52 = vrot.slane %v7005_v2, %v12272_v48  ;;  %v7020_v21 = vrot.slane %v7006_v40, %v12272_v48  ;;  %v7029_v44 = vrot.slane %v7021_v62, %v12272_v48  ;;  %v7036_v31 = vrot.slane %v7022_v7, %v12272_v48 }
0x1019   : > { %v6593_v17 = vmul.f32 %v11887_v55, %v13553_v38  ;;  %v7041_v38 = vcombine.low %v13588_v1, %v6928_v43  ;;  %v6930_v4 = vpop.permute.xlu0 %6929  ;;  %v7058_v1 = vcombine.high %v6904_v49, %v6952_v11  ;;  %v7177_v62 = vcombine.low %v13611_v46, %v6932_v24 }
0x101a   : > { %v7517_v30 = vcombine.low %v7013_v52, %v7020_v21  ;;  %v10547_v10 = vcombine.high %v7013_v52, %v7020_v21  ;;  %v7533_v33 = vcombine.low %v7029_v44, %v7036_v31  ;;  %v10548_v47 = vcombine.high %v7029_v44, %v7036_v31 }
0x101b   : > { %v6598_v25 = vmul.f32 %v6597_v60, %v6593_v17  ;;  %v7049_v16 = vrot.slane %v7041_v38, %v12269_v41  ;;  %v7109_v32 = vcombine.low %v13599_v14, %v6930_v4  ;;  %v7110_v23 = vcombine.high %v13599_v14, %v6930_v4 }
0x101c   : > { %v13692_v51 = vrot.slane %v7517_v30, %v12269_v41  ;;  %v13695_v36 = vrot.slane %v10547_v10, %v12269_v41  ;;  %v7072_v42 = vrot.slane %v7058_v1, %v12269_v41  ;;  %v13700_v56 = vrot.slane %v7533_v33, %v12269_v41 }
0x101d   : > { %v6603_v20 = vadd.f32 %v6602_v54, %v6598_v25  ;;  %v6954_v59 = vpop.permute.xlu0 %6953  ;;  %v13703_v61 = vrot.slane %v10548_v47, %v12269_v41  ;;  %v7073_v55 = vcombine.low %v7049_v16, %v7065_v22  ;;  %v7074_v54 = vcombine.high %v7049_v16, %v7065_v22 }
0x101e   : > { %v7125_v14 = vcombine.low %v13668_v29, %v6954_v59  ;;  %v7126_v49 = vcombine.high %v13668_v29, %v6954_v59  ;;  %v7549_v60 = vcombine.low %v13692_v51, %v13695_v36  ;;  %v7550_v53 = vcombine.high %v13692_v51, %v13695_v36 }
0x101f   : > { %11357 = vmatmul.mubr.msk.f32.vlgmr.msra.gmra.mrb[42].mxu0 %vm808_vm1, %v6603_v20  ;;  %v6604_v35 = vadd.f32 %v11922_v19, %v6603_v20  ;;  %10204 = vst.msk [vmem:[%s745_s3] sm:$0xff] %vm808_vm1, %v6603_v20  ;;  %v7565_v17 = vcombine.low %v13700_v56, %v13703_v61  ;;  %v7566_v6 = vcombine.high %v13700_v56, %v13703_v61 }
0x1020   : > { %11394 = vmatprep.mubr.msk.f32.mxu0 %vm11998_vm0, %v11999_v9  ;;  %v7089_v25 = vcombine.low %v7056_v15, %v7072_v42  ;;  %v7090_v26 = vcombine.high %v7056_v15, %v7072_v42  ;;  %v7081_v34 = vrot.slane %v7073_v55, %v12272_v48  ;;  %v7088_v0 = vrot.slane %v7074_v54, %v12272_v48  ;;  %v6956_v15 = vpop.permute.xlu1 %6955 }
0x1021   : > { %11346 = vmatmul.mubr.msk.f32.vlgmr.msra.gmra.mrb[42].mxu1 %vm808_vm1, %v6604_v35  ;;  %v7117_v20 = vrot.slane %v7109_v32, %v12269_v41  ;;  %v7124_v63 = vrot.slane %v7110_v23, %v12269_v41  ;;  %v13724_v28 = vrot.slane %v7549_v60, %v12272_v48  ;;  %v13727_v13 = vrot.slane %v7565_v17, %v12272_v48  ;;  %v13749_v10 = vpop.permute.xlu0 %6909 }
0x1022   : > { %11375 = vmatprep.mubr.msk.f32.mxu1 %vm11998_vm0, %v11999_v9  ;;  %v7097_v5 = vrot.slane %v7089_v25, %v12272_v48  ;;  %v7104_v18 = vrot.slane %v7090_v26, %v12272_v48  ;;  %v7585_v29 = vcombine.low %v7081_v34, %v7088_v0  ;;  %v10549_v19 = vcombine.high %v7081_v34, %v7088_v0 }
0x1023   : > { %v7133_v38 = vrot.slane %v7125_v14, %v12269_v41  ;;  %v7140_v39 = vrot.slane %v7126_v49, %v12269_v41  ;;  %v7178_v7 = vcombine.high %v13611_v46, %v6932_v24  ;;  %v7185_v32 = vrot.slane %v7177_v62, %v12269_v41 }
0x1024   : > { %v7601_v35 = vcombine.low %v7097_v5, %v7104_v18  ;;  %v10550_v43 = vcombine.high %v7097_v5, %v7104_v18  ;;  %v13732_v2 = vrot.slane %v7585_v29, %v12269_v41  ;;  %v13735_v40 = vrot.slane %v10549_v19, %v12269_v41  ;;  %v13763_v60 = vpop.permute.xlu1 %6911 }
0x1025   : > { %v7141_v4 = vcombine.low %v7117_v20, %v7133_v38  ;;  %v7142_v16 = vcombine.high %v7117_v20, %v7133_v38  ;;  %v7157_v11 = vcombine.low %v7124_v63, %v7140_v39  ;;  %v7158_v30 = vcombine.high %v7124_v63, %v7140_v39  ;;  %v6934_v24 = vpop.permute.xlu0 %6933 }
0x1026   : > { %v13740_v52 = vrot.slane %v7601_v35, %v12269_v41  ;;  %v13743_v21 = vrot.slane %v10550_v43, %v12269_v41  ;;  %v7617_v44 = vcombine.low %v13732_v2, %v13735_v40  ;;  %v7618_v31 = vcombine.high %v13732_v2, %v13735_v40 }
0x1027   : > { %v7149_v1 = vrot.slane %v7141_v4, %v12272_v48  ;;  %v7156_v33 = vrot.slane %v7142_v16, %v12272_v48  ;;  %v7165_v23 = vrot.slane %v7157_v11, %v12272_v48  ;;  %v7172_v22 = vrot.slane %v7158_v30, %v12272_v48 }
0x1028   : > { %v7633_v46 = vcombine.low %v13740_v52, %v13743_v21  ;;  %v7634_v45 = vcombine.high %v13740_v52, %v13743_v21  ;;  %v7625_v47 = vrot.slane %v7617_v44, %v12272_v48  ;;  %v7192_v59 = vrot.slane %v7178_v7, %v12269_v41  ;;  %v6936_v39 = vpop.permute.xlu1 %6935 }
0x1029   : > { %v7653_v14 = vcombine.low %v7149_v1, %v7156_v33  ;;  %v10551_v49 = vcombine.high %v7149_v1, %v7156_v33  ;;  %v7669_v55 = vcombine.low %v7165_v23, %v7172_v22  ;;  %v10552_v54 = vcombine.high %v7165_v23, %v7172_v22  ;;  %v6958_v23 = vpop.permute.xlu0 %6957 }
0x102a   : > { %v7641_v42 = vrot.slane %v7633_v46, %v12272_v48  ;;  %v7193_v17 = vcombine.low %v13705_v58, %v6956_v15  ;;  %v7194_v25 = vcombine.high %v13705_v58, %v6956_v15  ;;  %v7581_v0 = vcombine.low %v13724_v28, %v13727_v13 }
0x102b   : > { %v13768_v26 = vrot.slane %v7653_v14, %v12269_v41  ;;  %v13771_v34 = vrot.slane %v10551_v49, %v12269_v41  ;;  %v13776_v18 = vrot.slane %v7669_v55, %v12269_v41  ;;  %v13779_v20 = vrot.slane %v10552_v54, %v12269_v41 }
0x102c   : > { %v7649_v5 = vcombine.low %v7625_v47, %v7641_v42  ;;  %v7201_v63 = vrot.slane %v7193_v17, %v12269_v41  ;;  %v7208_v58 = vrot.slane %v7194_v25, %v12269_v41  ;;  %v7582_v4 = vcombine.high %v13724_v28, %v13727_v13 }
0x102d   : > { %v7686_v29 = vcombine.high %v13768_v26, %v13771_v34  ;;  %v7702_v35 = vcombine.high %v13776_v18, %v13779_v20  ;;  %v7650_v30 = vcombine.high %v7625_v47, %v7641_v42  ;;  %v7245_v46 = vcombine.low %v13615_v27, %v6934_v24  ;;  %v6960_v42 = vpop.permute.xlu1 %6959 }
0x102e   : > { %v11738_v19 = vpack.c.bf16 %v7649_v5, %v7581_v0  ;;  %v7209_v43 = vcombine.low %v7185_v32, %v7201_v63  ;;  %v7210_v38 = vcombine.high %v7185_v32, %v7201_v63  ;;  %v7225_v62 = vcombine.low %v7192_v59, %v7208_v58 }
0x102f   : > { %v7226_v7 = vcombine.high %v7192_v59, %v7208_v58  ;;  %v7246_v32 = vcombine.high %v13615_v27, %v6934_v24  ;;  %v11754_v13 = vpack.c.bf16 %v7650_v30, %v7582_v4  ;;  %v7253_v49 = vrot.slane %v7245_v46, %v12269_v41 }
0x1030   : > { %11740 = vmatpush3.bf16.xpose.msk.msra.mxu1 %vm12783_vm4, %v11738_v19  ;;  %v7217_v16 = vrot.slane %v7209_v43, %v12272_v48  ;;  %v7224_v15 = vrot.slane %v7210_v38, %v12272_v48  ;;  %v7233_v44 = vrot.slane %v7225_v62, %v12272_v48  ;;  %v7313_v47 = vcombine.low %v13625_v57, %v6936_v39 }
0x1031   : > { %11741 = vmatprep.subr.bf16.mxu1 %v11997_v3  ;;  %v7240_v11 = vrot.slane %v7226_v7, %v12272_v48  ;;  %11756 = vmatpush3.bf16.xpose.msk.msra.mxu0 %vm12783_vm4, %v11754_v13  ;;  %v7314_v54 = vcombine.high %v13625_v57, %v6936_v39  ;;  %v7261_v17 = vcombine.low %v13749_v10, %v6958_v23  ;;  %v13837_v30 = vpop.permute.xlu1 %6915 }
0x1032   : > { %v7721_v1 = vcombine.low %v7217_v16, %v7224_v15  ;;  %v10553_v33 = vcombine.high %v7217_v16, %v7224_v15  ;;  %v7260_v0 = vrot.slane %v7246_v32, %v12269_v41  ;;  %v7262_v5 = vcombine.high %v13749_v10, %v6958_v23  ;;  %11757 = vmatprep.subr.bf16.mxu0 %v11997_v3 }
0x1033   : > { %v7737_v22 = vcombine.low %v7233_v44, %v7240_v11  ;;  %v10554_v28 = vcombine.high %v7233_v44, %v7240_v11  ;;  %v7269_v58 = vrot.slane %v7261_v17, %v12269_v41  ;;  %v7329_v24 = vcombine.low %v13763_v60, %v6960_v42  ;;  %v13835_v11 = vpop.permute.xlu0 %6913 }
0x1034   : > { %v13799_v59 = vrot.slane %v7721_v1, %v12269_v41  ;;  %v13802_v14 = vrot.slane %v10553_v33, %v12269_v41  ;;  %v7685_v57 = vcombine.low %v13768_v26, %v13771_v34  ;;  %v7321_v19 = vrot.slane %v7313_v47, %v12269_v41 }
0x1035   : > { %v13807_v55 = vrot.slane %v7737_v22, %v12269_v41  ;;  %v13810_v27 = vrot.slane %v10554_v28, %v12269_v41  ;;  %v7276_v43 = vrot.slane %v7262_v5, %v12269_v41  ;;  %v7330_v38 = vcombine.high %v13763_v60, %v6960_v42 }
0x1036   : > { %v7754_v25 = vcombine.high %v13799_v59, %v13802_v14  ;;  %v7701_v10 = vcombine.low %v13776_v18, %v13779_v20  ;;  %v7328_v39 = vrot.slane %v7314_v54, %v12269_v41  ;;  %v7277_v62 = vcombine.low %v7253_v49, %v7269_v58 }
0x1037   : > { %v7770_v63 = vcombine.high %v13807_v55, %v13810_v27  ;;  %v7278_v7 = vcombine.high %v7253_v49, %v7269_v58  ;;  %v7293_v4 = vcombine.low %v7260_v0, %v7276_v43  ;;  %v7294_v16 = vcombine.high %v7260_v0, %v7276_v43 }
0x1038   : > { %v7337_v15 = vrot.slane %v7329_v24, %v12269_v41  ;;  %v7344_v44 = vrot.slane %v7330_v38, %v12269_v41  ;;  %v7753_v60 = vcombine.low %v13799_v59, %v13802_v14  ;;  %v7769_v46 = vcombine.low %v13807_v55, %v13810_v27 }
0x1039   : > { %v7285_v1 = vrot.slane %v7277_v62, %v12272_v48  ;;  %v7292_v33 = vrot.slane %v7278_v7, %v12272_v48  ;;  %v7301_v32 = vrot.slane %v7293_v4, %v12272_v48  ;;  %v7308_v23 = vrot.slane %v7294_v16, %v12272_v48  ;;  %v6938_v4 = vpop.permute.xlu0 %6937  ;;  %v6940_v16 = vpop.permute.xlu1 %6939 }
0x103a   : > { %v7345_v22 = vcombine.low %v7321_v19, %v7337_v15  ;;  %v7346_v28 = vcombine.high %v7321_v19, %v7337_v15  ;;  %v7361_v47 = vcombine.low %v7328_v39, %v7344_v44  ;;  %v7362_v42 = vcombine.high %v7328_v39, %v7344_v44 }
0x103b   : > { %v7789_v13 = vcombine.low %v7285_v1, %v7292_v33  ;;  %v10555_v49 = vcombine.high %v7285_v1, %v7292_v33  ;;  %v7805_v54 = vcombine.low %v7301_v32, %v7308_v23  ;;  %v10556_v17 = vcombine.high %v7301_v32, %v7308_v23 }
0x103c   : > { %v7353_v0 = vrot.slane %v7345_v22, %v12272_v48  ;;  %v7360_v5 = vrot.slane %v7346_v28, %v12272_v48  ;;  %v7369_v43 = vrot.slane %v7361_v47, %v12272_v48  ;;  %v7376_v19 = vrot.slane %v7362_v42, %v12272_v48 }
0x103d   : > { %v13850_v58 = vrot.slane %v7789_v13, %v12269_v41  ;;  %v13853_v24 = vrot.slane %v10555_v49, %v12269_v41  ;;  %v13858_v38 = vrot.slane %v7805_v54, %v12269_v41  ;;  %v13861_v39 = vrot.slane %v10556_v17, %v12269_v41 }
0x103e   : > { %v7857_v62 = vcombine.low %v7353_v0, %v7360_v5  ;;  %v10557_v7 = vcombine.high %v7353_v0, %v7360_v5  ;;  %v7693_v15 = vrot.slane %v7685_v57, %v12272_v48  ;;  %v7873_v1 = vcombine.low %v7369_v43, %v7376_v19 }
0x103f   : > { %v7822_v44 = vcombine.high %v13850_v58, %v13853_v24  ;;  %v10558_v33 = vcombine.high %v7369_v43, %v7376_v19  ;;  %v7709_v32 = vrot.slane %v7701_v10, %v12272_v48  ;;  %v7838_v23 = vcombine.high %v13858_v38, %v13861_v39  ;;  %v6964_v43 = vpop.permute.xlu1 %6963 }
0x1040   : > { %v13870_v22 = vrot.slane %v7857_v62, %v12269_v41  ;;  %v13873_v28 = vrot.slane %v10557_v7, %v12269_v41  ;;  %v7761_v13 = vrot.slane %v7753_v60, %v12272_v48  ;;  %v7777_v57 = vrot.slane %v7769_v46, %v12272_v48 }
0x1041   : > { %v13878_v49 = vrot.slane %v7873_v1, %v12269_v41  ;;  %v13881_v47 = vrot.slane %v10558_v33, %v12269_v41  ;;  %v7381_v42 = vcombine.low %v13631_v50, %v6938_v4  ;;  %v7382_v54 = vcombine.high %v13631_v50, %v6938_v4  ;;  %v6962_v50 = vpop.permute.xlu0 %6961 }
0x1042   : > { %v7890_v10 = vcombine.high %v13870_v22, %v13873_v28  ;;  %v13893_v60 = vrot.slane %v7550_v53, %v12272_v48  ;;  %v13899_v46 = vrot.slane %v7566_v6, %v12272_v48  ;;  %v7449_v0 = vcombine.low %v13641_v8, %v6940_v16 }
0x1043   : > { %v7906_v17 = vcombine.high %v13878_v49, %v13881_v47  ;;  %v7450_v5 = vcombine.high %v13641_v8, %v6940_v16  ;;  %v13907_v19 = vrot.slane %v7618_v31, %v12272_v48  ;;  %v13913_v51 = vrot.slane %v7634_v45, %v12272_v48 }
0x1044   : > { %v7717_v36 = vcombine.low %v7693_v15, %v7709_v32  ;;  %v7785_v56 = vcombine.low %v7761_v13, %v7777_v57  ;;  %v7389_v61 = vrot.slane %v7381_v42, %v12269_v41  ;;  %v7396_v8 = vrot.slane %v7382_v54, %v12269_v41 }
0x1045   : > { %v7718_v53 = vcombine.high %v7693_v15, %v7709_v32  ;;  %v7786_v6 = vcombine.high %v7761_v13, %v7777_v57  ;;  %v7397_v7 = vcombine.low %v13835_v11, %v6962_v50  ;;  %v7398_v2 = vcombine.high %v13835_v11, %v6962_v50 }
0x1046   : > { %v11742_v62 = vpack.c.bf16 %v7785_v56, %v7717_v36  ;;  %v7465_v40 = vcombine.low %v13837_v30, %v6964_v43  ;;  %v7457_v31 = vrot.slane %v7449_v0, %v12269_v41  ;;  %v7464_v52 = vrot.slane %v7450_v5, %v12269_v41 }
0x1047   : > { %v11758_v21 = vpack.c.bf16 %v7786_v6, %v7718_v53  ;;  %v7466_v45 = vcombine.high %v13837_v30, %v6964_v43  ;;  %v7405_v4 = vrot.slane %v7397_v7, %v12269_v41  ;;  %v7412_v16 = vrot.slane %v7398_v2, %v12269_v41 }
0x1048   : > { %11744 = vmatpush3.bf16.xpose.msk.msra.mxu1 %vm12783_vm4, %v11742_v62  ;;  %v7473_v15 = vrot.slane %v7465_v40, %v12269_v41  ;;  %v7583_v11 = vcombine.low %v13893_v60, %v13899_v46  ;;  %v7651_v30 = vcombine.low %v13907_v19, %v13913_v51  ;;  %v7584_v33 = vcombine.high %v13893_v60, %v13899_v46 }
0x1049   : > { %11760 = vmatpush3.bf16.xpose.msk.msra.mxu0 %vm12783_vm4, %v11758_v21  ;;  %v7480_v1 = vrot.slane %v7466_v45, %v12269_v41  ;;  %11745 = vmatprep.subr.bf16.mxu1 %v11997_v3  ;;  %v7413_v32 = vcombine.low %v7389_v61, %v7405_v4  ;;  %v7414_v13 = vcombine.high %v7389_v61, %v7405_v4 }
0x104a   : > { %v7429_v57 = vcombine.low %v7396_v8, %v7412_v16  ;;  %v7430_v42 = vcombine.high %v7396_v8, %v7412_v16  ;;  %11761 = vmatprep.subr.bf16.mxu0 %v11997_v3  ;;  %v7481_v54 = vcombine.low %v7457_v31, %v7473_v15  ;;  %v7482_v0 = vcombine.high %v7457_v31, %v7473_v15 }
0x104b   : > { %v7497_v5 = vcombine.low %v7464_v52, %v7480_v1  ;;  %v7498_v50 = vcombine.high %v7464_v52, %v7480_v1  ;;  %v7421_v43 = vrot.slane %v7413_v32, %v12272_v48  ;;  %v7428_v36 = vrot.slane %v7414_v13, %v12272_v48 }
0x104c   : > { %v7437_v56 = vrot.slane %v7429_v57, %v12272_v48  ;;  %v7444_v53 = vrot.slane %v7430_v42, %v12272_v48  ;;  %v7489_v60 = vrot.slane %v7481_v54, %v12272_v48  ;;  %v7496_v46 = vrot.slane %v7482_v0, %v12272_v48 }
0x104d   : > { %v7505_v61 = vrot.slane %v7497_v5, %v12272_v48  ;;  %v7512_v8 = vrot.slane %v7498_v50, %v12272_v48  ;;  %v7925_v6 = vcombine.low %v7421_v43, %v7428_v36  ;;  %v10559_v62 = vcombine.high %v7421_v43, %v7428_v36 }
0x104e   : > { %v7941_v7 = vcombine.low %v7437_v56, %v7444_v53  ;;  %v10560_v2 = vcombine.high %v7437_v56, %v7444_v53  ;;  %v7993_v40 = vcombine.low %v7489_v60, %v7496_v46  ;;  %v10561_v31 = vcombine.high %v7489_v60, %v7496_v46 }
0x104f   : > { %v8009_v52 = vcombine.low %v7505_v61, %v7512_v8  ;;  %v10562_v21 = vcombine.high %v7505_v61, %v7512_v8  ;;  %v7932_v45 = vrot.slane %v7925_v6, %v12269_v41  ;;  %v7940_v4 = vrot.slane %v10559_v62, %v12269_v41 }
0x1050   : > { %v7948_v16 = vrot.slane %v7941_v7, %v12269_v41  ;;  %v7956_v15 = vrot.slane %v10560_v2, %v12269_v41  ;;  %v8000_v1 = vrot.slane %v7993_v40, %v12269_v41  ;;  %v8008_v32 = vrot.slane %v10561_v31, %v12269_v41 }
0x1051   : > { %v8016_v13 = vrot.slane %v8009_v52, %v12269_v41  ;;  %v8024_v57 = vrot.slane %v10562_v21, %v12269_v41  ;;  %v7958_v42 = vcombine.high %v7932_v45, %v7940_v4  ;;  %v7700_v50 = vrot.slane %v7686_v29, %v12272_v48 }
0x1052   : > { %v7974_v54 = vcombine.high %v7948_v16, %v7956_v15  ;;  %v8026_v0 = vcombine.high %v8000_v1, %v8008_v32  ;;  %v7716_v43 = vrot.slane %v7702_v35, %v12272_v48  ;;  %v7768_v36 = vrot.slane %v7754_v25, %v12272_v48 }
0x1053   : > { %v8042_v5 = vcombine.high %v8016_v13, %v8024_v57  ;;  %v7784_v56 = vrot.slane %v7770_v63, %v12272_v48  ;;  %v13971_v53 = vpack.c.bf16 %v7651_v30, %v7583_v11  ;;  %v7652_v26 = vcombine.high %v13907_v19, %v13913_v51 }
0x1054   : > { %v7719_v29 = vcombine.low %v7700_v50, %v7716_v43  ;;  %v7720_v20 = vcombine.high %v7700_v50, %v7716_v43  ;;  %v7821_v14 = vcombine.low %v13850_v58, %v13853_v24  ;;  %v7837_v55 = vcombine.low %v13858_v38, %v13861_v39 }
0x1055   : > { %v13975_v34 = vpack.c.bf16 %v7652_v26, %v7584_v33  ;;  %v7787_v18 = vcombine.low %v7768_v36, %v7784_v56  ;;  %v7788_v35 = vcombine.high %v7768_v36, %v7784_v56  ;;  %v7889_v27 = vcombine.low %v13870_v22, %v13873_v28 }
0x1056   : > { %v7905_v25 = vcombine.low %v13878_v49, %v13881_v47  ;;  %v7829_v63 = vrot.slane %v7821_v14, %v12272_v48  ;;  %v7845_v19 = vrot.slane %v7837_v55, %v12272_v48  ;;  %v7836_v30 = vrot.slane %v7822_v44, %v12272_v48  ;;  %v10545_v14 = vld [vmem:[%s14436_s17 + $0x2] ss:$0 sm:$0xff] }
0x1057   : > { %v13977_v60 = vpack.c.bf16 %v7787_v18, %v7719_v29  ;;  %v13979_v59 = vpack.c.bf16 %v7788_v35, %v7720_v20  ;;  %v7897_v51 = vrot.slane %v7889_v27, %v12272_v48  ;;  %v7852_v33 = vrot.slane %v7838_v23, %v12272_v48 }
0x1058   : > { %v7913_v11 = vrot.slane %v7905_v25, %v12272_v48  ;;  %v7904_v46 = vrot.slane %v7890_v10, %v12272_v48  ;;  %v7920_v61 = vrot.slane %v7906_v17, %v12272_v48  ;;  %v7853_v8 = vcombine.low %v7829_v63, %v7845_v19 }
0x1059   : > { %v7854_v62 = vcombine.high %v7829_v63, %v7845_v19  ;;  %v7855_v24 = vcombine.low %v7836_v30, %v7852_v33  ;;  %v7856_v7 = vcombine.high %v7836_v30, %v7852_v33  ;;  %v7957_v23 = vcombine.low %v7932_v45, %v7940_v4 }
0x105a   : > { %v7921_v6 = vcombine.low %v7897_v51, %v7913_v11  ;;  %v7922_v58 = vcombine.high %v7897_v51, %v7913_v11  ;;  %v7923_v44 = vcombine.low %v7904_v46, %v7920_v61  ;;  %v7924_v2 = vcombine.high %v7904_v46, %v7920_v61 }
0x105b   : > { %v7973_v28 = vcombine.low %v7948_v16, %v7956_v15  ;;  %v8025_v10 = vcombine.low %v8000_v1, %v8008_v32  ;;  %v8041_v31 = vcombine.low %v8016_v13, %v8024_v57  ;;  %v7965_v49 = vrot.slane %v7957_v23, %v12272_v48 }
0x105c   : > { %v11746_v38 = vpack.c.bf16 %v7921_v6, %v7853_v8  ;;  %v11762_v39 = vpack.c.bf16 %v7922_v58, %v7854_v62  ;;  %v14009_v40 = vpack.c.bf16 %v7923_v44, %v7855_v24  ;;  %v14011_v22 = vpack.c.bf16 %v7924_v2, %v7856_v7 }
0x105d   : > { %v7981_v47 = vrot.slane %v7973_v28, %v12272_v48  ;;  %v8033_v17 = vrot.slane %v8025_v10, %v12272_v48  ;;  %v8049_v52 = vrot.slane %v8041_v31, %v12272_v48  ;;  %v7972_v21 = vrot.slane %v7958_v42, %v12272_v48 }
0x105e   : > { %11748 = vmatpush3.bf16.xpose.msk.msra.mxu1 %vm12783_vm4, %v11746_v38  ;;  %11764 = vmatpush3.bf16.xpose.msk.msra.mxu0 %vm12783_vm4, %v11762_v39  ;;  %v7988_v45 = vrot.slane %v7974_v54, %v12272_v48  ;;  %v8040_v4 = vrot.slane %v8026_v0, %v12272_v48  ;;  %v8056_v16 = vrot.slane %v8042_v5, %v12272_v48  ;;  %v10538_v54 = vld [vmem:[%s14436_s17 + $0x1] ss:$0 sm:$0xff] }
0x105f   : > { %11749 = vmatprep.subr.bf16.mxu1 %v11997_v3  ;;  %11765 = vmatprep.subr.bf16.mxu0 %v11997_v3  ;;  %v7989_v15 = vcombine.low %v7965_v49, %v7981_v47  ;;  %v8057_v1 = vcombine.low %v8033_v17, %v8049_v52  ;;  %v7990_v32 = vcombine.high %v7965_v49, %v7981_v47 }
0x1060   : > { %v8058_v13 = vcombine.high %v8033_v17, %v8049_v52  ;;  %v7991_v57 = vcombine.low %v7972_v21, %v7988_v45  ;;  %v8059_v50 = vcombine.low %v8040_v4, %v8056_v16  ;;  %v7992_v43 = vcombine.high %v7972_v21, %v7988_v45 }
0x1061   : > { %v8060_v36 = vcombine.high %v8040_v4, %v8056_v16  ;;  %v11750_v56 = vpack.c.bf16 %v8057_v1, %v7989_v15 }
0x1062   : > { %v11766_v26 = vpack.c.bf16 %v8058_v13, %v7990_v32  ;;  %v14027_v29 = vpack.c.bf16 %v8059_v50, %v7991_v57 }
0x1063   : > { %v14029_v18 = vpack.c.bf16 %v8060_v36, %v7992_v43 }
0x1066   : > { %11752 = vmatpush3.bf16.xpose.msk.msra.mxu1 %vm12783_vm4, %v11750_v56  ;;  %11768 = vmatpush3.bf16.xpose.msk.msra.mxu0 %vm12783_vm4, %v11766_v26 }
0x1067   : > { %11769 = vmatprep.subr.bf16.mxu1 %v11997_v3  ;;  %11785 = vmatprep.subr.bf16.mxu0 %v11997_v3 }
0x10f2   : > { %v6889_v42 = vpop.f32.mrb[42].mxu0 }
0x10f3   : > { %v11358_v0 = vpop.f32.mrb[43].mxu0  ;;  %v6890_v55 = vadd.f32 %v10545_v14, %v6889_v42 }
0x10f4   : > { %v6803_v5 = vpop.f32.mrb[42].mxu1 }
0x10f5   : > { %v6804_v20 = vadd.f32 %v10538_v54, %v6803_v5  ;;  %v11347_v35 = vpop.f32.mrb[43].mxu1 }
0x10f7   : > { %8062 = vrot.lane.b32.xlu0 %v6804_v20, %s14496_s23  ;;  %8065 = vrot.lane.b32.xlu1 %v6804_v20, %s14493_s27 }
0x10fb   : > { %8068 = vrot.lane.b32.xlu0 %v6804_v20, %s14497_s29  ;;  %8208 = vrot.lane.b32.xlu1 %v6890_v55, %s14496_s23 }
0x10ff   : > { %8211 = vrot.lane.b32.xlu0 %v6890_v55, %s14493_s27  ;;  %8214 = vrot.lane.b32.xlu1 %v6890_v55, %s14497_s29  ;;  %s14499_s29 = sld [smem:[#allocation21_spill]] }
0x1105   : > { %s14342_s22 = scalar_lea.hbm %s14499_s29, %s10673_s6 }
0x1169   : > { %v8063_v27 = vpop.permute.xlu0 %8062  ;;  %v8066_v25 = vpop.permute.xlu1 %8065 }
0x116a   : > { %v8071_v63 = vcombine.low %v6804_v20, %v8066_v25  ;;  %v8072_v19 = vcombine.high %v6804_v20, %v8066_v25 }
0x116c   : > { %v8079_v46 = vrot.slane %v8071_v63, %v12269_v41  ;;  %v8086_v61 = vrot.slane %v8072_v19, %v12269_v41 }
0x116d   : > { %v8069_v51 = vpop.permute.xlu0 %8068  ;;  %v8209_v33 = vpop.permute.xlu1 %8208 }
0x116e   : > { %v8087_v11 = vcombine.low %v8063_v27, %v8069_v51  ;;  %v8088_v30 = vcombine.high %v8063_v27, %v8069_v51 }
0x1170   : > { %v8095_v8 = vrot.slane %v8087_v11, %v12269_v41  ;;  %v8102_v6 = vrot.slane %v8088_v30, %v12269_v41 }
0x1171   : > { %v8212_v23 = vpop.permute.xlu0 %8211  ;;  %v8215_v28 = vpop.permute.xlu1 %8214 }
0x1172   : > { %v8103_v62 = vcombine.low %v8079_v46, %v8095_v8  ;;  %v8104_v58 = vcombine.high %v8079_v46, %v8095_v8  ;;  %v8119_v24 = vcombine.low %v8086_v61, %v8102_v6  ;;  %v8120_v44 = vcombine.high %v8086_v61, %v8102_v6 }
0x1173   : > { %v8217_v17 = vcombine.low %v6890_v55, %v8212_v23  ;;  %v8218_v52 = vcombine.high %v6890_v55, %v8212_v23  ;;  %v8233_v21 = vcombine.low %v8209_v33, %v8215_v28  ;;  %v8234_v45 = vcombine.high %v8209_v33, %v8215_v28 }
0x1174   : > { %v8111_v7 = vrot.slane %v8103_v62, %v12272_v48  ;;  %v8118_v2 = vrot.slane %v8104_v58, %v12272_v48  ;;  %v8127_v38 = vrot.slane %v8119_v24, %v12272_v48  ;;  %v8134_v39 = vrot.slane %v8120_v44, %v12272_v48 }
0x1175   : > { %v8225_v57 = vrot.slane %v8217_v17, %v12269_v41  ;;  %v8241_v50 = vrot.slane %v8233_v21, %v12269_v41  ;;  %v8232_v43 = vrot.slane %v8218_v52, %v12269_v41  ;;  %v8248_v36 = vrot.slane %v8234_v45, %v12269_v41 }
0x1176   : > { %v8139_v10 = vcombine.low %v8111_v7, %v8118_v2  ;;  %v10563_v31 = vcombine.high %v8111_v7, %v8118_v2  ;;  %v8155_v49 = vcombine.low %v8127_v38, %v8134_v39  ;;  %v10564_v47 = vcombine.high %v8127_v38, %v8134_v39 }
0x1177   : > { %v8249_v0 = vcombine.low %v8225_v57, %v8241_v50  ;;  %v8250_v5 = vcombine.high %v8225_v57, %v8241_v50  ;;  %v8265_v20 = vcombine.low %v8232_v43, %v8248_v36  ;;  %v8266_v35 = vcombine.high %v8232_v43, %v8248_v36 }
0x1178   : > { %v8146_v4 = vrot.slane %v8139_v10, %v12269_v41  ;;  %v8154_v16 = vrot.slane %v10563_v31, %v12269_v41  ;;  %v8162_v15 = vrot.slane %v8155_v49, %v12269_v41  ;;  %v8170_v1 = vrot.slane %v10564_v47, %v12269_v41 }
0x1179   : > { %v8257_v14 = vrot.slane %v8249_v0, %v12272_v48  ;;  %v8264_v55 = vrot.slane %v8250_v5, %v12272_v48  ;;  %v8280_v27 = vrot.slane %v8266_v35, %v12272_v48 }
0x117a   : > { %v8171_v32 = vcombine.low %v8146_v4, %v8154_v16  ;;  %v8187_v13 = vcombine.low %v8162_v15, %v8170_v1  ;;  %v8172_v61 = vcombine.high %v8146_v4, %v8154_v16 }
0x117b   : > { %v8285_v25 = vcombine.low %v8257_v14, %v8264_v55 }
0x117c   : > { %v8179_v56 = vrot.slane %v8171_v32, %v12272_v48  ;;  %v8195_v26 = vrot.slane %v8187_v13, %v12272_v48 }
0x117e   : > { %v8203_v42 = vcombine.low %v8179_v56, %v8195_v26  ;;  %v8204_v54 = vcombine.high %v8179_v56, %v8195_v26 }
0x1180   : > { %11376 = vmatmul.mubr.msk.f32.vlgmr.msra.gmra.mrb[44].mxu1 %vm5329_vm3, %v8203_v42  ;;  %11395 = vmatmul.mubr.msk.f32.vlgmr.msra.gmra.mrb[44].mxu0 %vm5329_vm3, %v8204_v54 }
0x1181   : > { %11772 = vmatpush3.bf16.xpose.msk.msra.mxu1 %vm12783_vm4, %v13971_v53  ;;  %11788 = vmatpush3.bf16.xpose.msk.msra.mxu0 %vm12783_vm4, %v13975_v34  ;;  %v8273_v53 = vrot.slane %v8265_v20, %v12272_v48  ;;  %v10565_v34 = vcombine.high %v8257_v14, %v8264_v55 }
0x1182   : > { %11773 = vmatprep.subr.bf16.mxu1 %v11997_v3  ;;  %11789 = vmatprep.subr.bf16.mxu0 %v11997_v3 }
0x1183   : > { %11413 = vmatprep.mubr.msk.f32.mxu1 %vm11998_vm0, %v11999_v9  ;;  %11432 = vmatprep.mubr.msk.f32.mxu0 %vm11998_vm0, %v11999_v9  ;;  %v8301_v63 = vcombine.low %v8273_v53, %v8280_v27  ;;  %v10566_v19 = vcombine.high %v8273_v53, %v8280_v27  ;;  %v8292_v9 = vrot.slane %v8285_v25, %v12269_v41 }
0x1184   : > { %v8300_v51 = vrot.slane %v10565_v34, %v12269_v41 }
0x1185   : > { %v8308_v11 = vrot.slane %v8301_v63, %v12269_v41  ;;  %v8316_v30 = vrot.slane %v10566_v19, %v12269_v41  ;;  %v8188_v41 = vcombine.high %v8162_v15, %v8170_v1 }
0x1186   : > { %v8317_v33 = vcombine.low %v8292_v9, %v8300_v51  ;;  %v8318_v62 = vcombine.high %v8292_v9, %v8300_v51 }
0x1187   : > { %v8333_v46 = vcombine.low %v8308_v11, %v8316_v30  ;;  %v8334_v58 = vcombine.high %v8308_v11, %v8316_v30 }
0x1189   : > { %11776 = vmatpush3.bf16.xpose.msk.msra.mxu1 %vm12783_vm4, %v13977_v60  ;;  %11792 = vmatpush3.bf16.xpose.msk.msra.mxu0 %vm12783_vm4, %v13979_v59  ;;  %v8325_v60 = vrot.slane %v8317_v33, %v12272_v48  ;;  %v8341_v59 = vrot.slane %v8333_v46, %v12272_v48  ;;  %v8348_v24 = vrot.slane %v8334_v58, %v12272_v48 }
0x118a   : > { %11777 = vmatprep.subr.bf16.mxu1 %v11997_v3  ;;  %11793 = vmatprep.subr.bf16.mxu0 %v11997_v3 }
0x118b   : > { %v8349_v8 = vcombine.low %v8325_v60, %v8341_v59  ;;  %v8350_v6 = vcombine.high %v8325_v60, %v8341_v59 }
0x1191   : > { %11780 = vmatpush3.bf16.xpose.msk.msra.mxu1 %vm12783_vm4, %v14009_v40  ;;  %11796 = vmatpush3.bf16.xpose.msk.msra.mxu0 %vm12783_vm4, %v14011_v22  ;;  %v8202_v40 = vrot.slane %v8188_v41, %v12272_v48  ;;  %v8332_v22 = vrot.slane %v8318_v62, %v12272_v48 }
0x1192   : > { %11781 = vmatprep.subr.bf16.mxu1 %v11997_v3  ;;  %11797 = vmatprep.subr.bf16.mxu0 %v11997_v3  ;;  %v8186_v3 = vrot.slane %v8172_v61, %v12272_v48 }
0x1193   : > { %v14121_v12 = vcombine.high %v8332_v22, %v8348_v24 }
0x1194   : > { %v8205_v44 = vcombine.low %v8186_v3, %v8202_v40  ;;  %v8206_v7 = vcombine.high %v8186_v3, %v8202_v40 }
0x1199   : > { %11784 = vmatpush3.bf16.xpose.msk.msra.mxu1 %vm12783_vm4, %v14027_v29  ;;  %11800 = vmatpush3.bf16.xpose.msk.msra.mxu0 %vm12783_vm4, %v14029_v18  ;;  %v14119_v29 = vcombine.low %v8332_v22, %v8348_v24 }
0x119a   : > { %11435 = vmatprep.subr.mxu1 %v8349_v8  ;;  %11449 = vmatprep.subr.mxu0 %v8350_v6 }
0x11a0   : > { %11414 = vmatmul.mubr.msk.f32.vlgmr.msra.gmra.mrb[46].mxu1 %vm5329_vm3, %v8205_v44  ;;  %11433 = vmatmul.mubr.msk.f32.vlgmr.msra.gmra.mrb[46].mxu0 %vm5329_vm3, %v8206_v7 }
0x11a1   : > { %11436 = vmatpush3.msra.mxu1 %v8349_v8  ;;  %11450 = vmatpush3.msra.mxu0 %v8350_v6 }
0x11a2   : > { %11463 = vmatprep.subr.mxu1 %v14119_v29  ;;  %11477 = vmatprep.subr.mxu0 %v14121_v12 }
0x1253   : > { %v8446_v18 = vpop.f32.mrb[44].mxu1  ;;  %v8543_v2 = vpop.f32.mrb[44].mxu0 }
0x1254   : > { %v8741_v38 = vmul.f32 0.5, %v8446_v18  ;;  %v8742_v48 = vmul.f32 0.5, %v8543_v2  ;;  %v11377_v39 = vpop.f32.mrb[45].mxu1  ;;  %v11396_v23 = vpop.f32.mrb[45].mxu0 }
0x1256   : > { %v8745_v28 = vsel %vm5722_vm5, %v8741_v38, -inf  ;;  %v8752_v10 = vsel %vm5722_vm5, %v8742_v48, -inf }
0x1257   : > { %v8746_v31 = vrot.slane %v8745_v28, 4  ;;  %v8753_v49 = vrot.slane %v8752_v10, 4 }
0x1259   : > { %v8747_v47 = vmax.f32 %v8745_v28, %v8746_v31  ;;  %v8754_v17 = vmax.f32 %v8752_v10, %v8753_v49 }
0x125b   : > { %v8748_v52 = vrot.slane %v8747_v47, 2  ;;  %v8755_v21 = vrot.slane %v8754_v17, 2 }
0x125d   : > { %v8749_v45 = vmax.f32 %v8747_v47, %v8748_v52  ;;  %v8756_v4 = vmax.f32 %v8754_v17, %v8755_v21 }
0x125f   : > { %v8750_v16 = vrot.slane %v8749_v45, 1  ;;  %v8757_v15 = vrot.slane %v8756_v4, 1 }
0x1261   : > { %v8751_v1 = vmax.f32 %v8749_v45, %v8750_v16  ;;  %v8758_v32 = vmax.f32 %v8756_v4, %v8757_v15 }
0x1263   : > { %v8773_v13 = vsub.f32 %v8741_v38, %v8751_v1  ;;  %v8774_v57 = vsub.f32 %v8742_v48, %v8758_v32 }
0x1265   : > { %v8777_v50 = vmul.f32 1.442695, %v8773_v13  ;;  %v8779_v43 = vmul.f32 1.442695, %v8774_v57 }
0x1267   : > { %11888 = vpow2.f32 %v8777_v50 }
0x1268   : > { %11890 = vpow2.f32 %v8779_v43 }
0x1271   : > { %v11889_v36 = vpop.eup %11888 }
0x1272   : > { %v11891_v56 = vpop.eup %11890  ;;  %v8785_v26 = vsel %vm5722_vm5, %v11889_v36, 0.0 }
0x1273   : > { %v8786_v42 = vrot.slane %v8785_v26, 4  ;;  %v8792_v54 = vsel %vm5722_vm5, %v11891_v56, 0.0  ;;  %v8640_v0 = vpop.f32.mrb[46].mxu1  ;;  %v8737_v5 = vpop.f32.mrb[46].mxu0 }
0x1274   : > { %v8793_v20 = vrot.slane %v8792_v54, 4  ;;  %v8743_v35 = vmul.f32 0.5, %v8640_v0  ;;  %v8744_v14 = vmul.f32 0.5, %v8737_v5  ;;  %v11415_v55 = vpop.f32.mrb[47].mxu1  ;;  %v11434_v53 = vpop.f32.mrb[47].mxu0 }
0x1275   : > { %v8787_v27 = vadd.f32 %v8786_v42, %v8785_v26 }
0x1276   : > { %v8794_v25 = vadd.f32 %v8793_v20, %v8792_v54  ;;  %v8759_v34 = vsel %vm5722_vm5, %v8743_v35, -inf  ;;  %v8766_v63 = vsel %vm5722_vm5, %v8744_v14, -inf }
0x1277   : > { %v8788_v19 = vrot.slane %v8787_v27, 2  ;;  %v8760_v9 = vrot.slane %v8759_v34, 4  ;;  %v8767_v51 = vrot.slane %v8766_v63, 4 }
0x1278   : > { %v8795_v11 = vrot.slane %v8794_v25, 2 }
0x1279   : > { %v8761_v30 = vmax.f32 %v8759_v34, %v8760_v9  ;;  %v8768_v33 = vmax.f32 %v8766_v63, %v8767_v51  ;;  %v8789_v46 = vadd.f32 %v8788_v19, %v8787_v27 }
0x127a   : > { %v8796_v60 = vadd.f32 %v8795_v11, %v8794_v25 }
0x127b   : > { %v8762_v59 = vrot.slane %v8761_v30, 2  ;;  %v8769_v61 = vrot.slane %v8768_v33, 2  ;;  %v8790_v41 = vrot.slane %v8789_v46, 1 }
0x127c   : > { %v8797_v8 = vrot.slane %v8796_v60, 1 }
0x127d   : > { %v8763_v6 = vmax.f32 %v8761_v30, %v8762_v59  ;;  %v8770_v62 = vmax.f32 %v8768_v33, %v8769_v61  ;;  %v8791_v58 = vadd.f32 %v8790_v41, %v8789_v46 }
0x127e   : > { %v8798_v3 = vadd.f32 %v8797_v8, %v8796_v60 }
0x127f   : > { %v8764_v40 = vrot.slane %v8763_v6, 1  ;;  %v8771_v22 = vrot.slane %v8770_v62, 1  ;;  %11892 = vrcp.f32 %v8791_v58 }
0x1280   : > { %11894 = vrcp.f32 %v8798_v3 }
0x1281   : > { %v8765_v24 = vmax.f32 %v8763_v6, %v8764_v40  ;;  %v8772_v44 = vmax.f32 %v8770_v62, %v8771_v22  ;;  %v9465_v22 = vld [vmem:[%s14437_s18] sm:$0xf] }
0x1283   : > { %v8775_v7 = vsub.f32 %v8743_v35, %v8765_v24  ;;  %v8776_v18 = vsub.f32 %v8744_v14, %v8772_v44  ;;  %v9466_v24 = vld [vmem:[%s14437_s18 + $0x4] sm:$0xf]  ;;  %v9467_v44 = vld [vmem:[%s14437_s18 + $0x8] sm:$0xf] }
0x1285   : > { %v8781_v2 = vmul.f32 1.442695, %v8775_v7  ;;  %v8783_v38 = vmul.f32 1.442695, %v8776_v18  ;;  %v9468_v7 = vld [vmem:[%s14437_s18 + $0xc] sm:$0xf] }
0x1287   : > { %11896 = vpow2.f32 %v8781_v2 }
0x1288   : > { %11898 = vpow2.f32 %v8783_v38 }
0x1289   : > { %v11893_v48 = vpop.eup %11892 }
0x128a   : > { %v11895_v39 = vpop.eup %11894  ;;  %v8814_v23 = vmul.f32 %v11893_v48, %v11889_v36 }
0x128b   : > { %v8816_v28 = vmul.f32 %v11895_v39, %v11891_v56 }
0x128c   : > { %8821 = vxpose.xlu0.b32.start.end [1/1] (short) (narrow) %v8814_v23, 64 }
0x128d   : > { %8853 = vxpose.xlu1.b32.start.end [1/1] (short) (narrow) %v8816_v28, 64 }
0x1291   : > { %v11897_v10 = vpop.eup %11896 }
0x1292   : > { %v11899_v31 = vpop.eup %11898  ;;  %v8799_v49 = vsel %vm5722_vm5, %v11897_v10, 0.0 }
0x1293   : > { %v8800_v47 = vrot.slane %v8799_v49, 4  ;;  %v8806_v17 = vsel %vm5722_vm5, %v11899_v31, 0.0 }
0x1294   : > { %v8807_v52 = vrot.slane %v8806_v17, 4 }
0x1295   : > { %v8801_v21 = vadd.f32 %v8800_v47, %v8799_v49 }
0x1296   : > { %v8808_v45 = vadd.f32 %v8807_v52, %v8806_v17 }
0x1297   : > { %v8802_v4 = vrot.slane %v8801_v21, 2 }
0x1298   : > { %v8809_v16 = vrot.slane %v8808_v45, 2 }
0x1299   : > { %v8803_v15 = vadd.f32 %v8802_v4, %v8801_v21 }
0x129a   : > { %v8810_v1 = vadd.f32 %v8809_v16, %v8808_v45 }
0x129b   : > { %v8804_v32 = vrot.slane %v8803_v15, 1 }
0x129c   : > { %v8811_v13 = vrot.slane %v8810_v1, 1 }
0x129d   : > { %v8805_v57 = vadd.f32 %v8804_v32, %v8803_v15 }
0x129e   : > { %v8812_v50 = vadd.f32 %v8811_v13, %v8810_v1 }
0x129f   : > { %11900 = vrcp.f32 %v8805_v57 }
0x12a0   : > { %11902 = vrcp.f32 %v8812_v50 }
0x12a9   : > { %v11901_v43 = vpop.eup %11900 }
0x12aa   : > { %v11903_v36 = vpop.eup %11902  ;;  %v8818_v56 = vmul.f32 %v11901_v43, %v11897_v10 }
0x12ab   : > { %v8820_v26 = vmul.f32 %v11903_v36, %v11899_v31 }
0x12ac   : > { %8885 = vxpose.xlu0.b32.start.end [1/1] (short) (narrow) %v8818_v56, 64 }
0x12ad   : > { %8917 = vxpose.xlu1.b32.start.end [1/1] (short) (narrow) %v8820_v26, 64 }
0x130c   : > { %v8837_v42 = vpop.trf.xlu0 }
0x130d   : > { %v8869_v54 = vpop.trf.xlu1  ;;  %11437 = vmatprep.mubr.msk.f32.mxu1 %vm1489_vm2, %v8837_v42 }
0x130e   : > { %11451 = vmatprep.mubr.msk.f32.mxu0 %vm1489_vm2, %v8869_v54 }
0x1310   : > { %v8838_v0 = vpop.trf.xlu0 }
0x1311   : > { %v8870_v5 = vpop.trf.xlu1  ;;  %11438 = vmatmul.mubr.msk.f32.vlgmr.msra.gmra.mrb[48].mxu1 %vm1489_vm2, %v8838_v0 }
0x1312   : > { %11452 = vmatmul.mubr.msk.f32.vlgmr.msra.gmra.mrb[48].mxu0 %vm1489_vm2, %v8870_v5  ;;  %11464 = vmatpush3.msra.mxu1 %v14119_v29 }
0x1313   : > { %11478 = vmatpush3.msra.mxu0 %v14121_v12  ;;  %11491 = vmatprep.subr.msk.mxu1 %vm6066_vm6, %v9465_v22 }
0x1314   : > { %v8839_v20 = vpop.trf.xlu0  ;;  %11505 = vmatprep.subr.msk.mxu0 %vm6066_vm6, %v9466_v24 }
0x1315   : > { %v8871_v35 = vpop.trf.xlu1  ;;  %11440 = vmatprep.mubr.msk.f32.mxu1 %vm1489_vm2, %v8839_v20 }
0x1316   : > { %11454 = vmatprep.mubr.msk.f32.mxu0 %vm1489_vm2, %v8871_v35 }
0x1318   : > { %v8840_v14 = vpop.trf.xlu0 }
0x1319   : > { %v8872_v55 = vpop.trf.xlu1  ;;  %11441 = vmatmul.mubr.msk.f32.gmra.mrb[50].mxu1 %vm1489_vm2, %v8840_v14 }
0x131a   : > { %11455 = vmatmul.mubr.msk.f32.gmra.mrb[50].mxu0 %vm1489_vm2, %v8872_v55 }
0x131c   : > { %v8841_v53 = vpop.trf.xlu0 }
0x131d   : > { %v8873_v27 = vpop.trf.xlu1  ;;  %11443 = vmatprep.mubr.msk.f32.mxu1 %vm1489_vm2, %v8841_v53 }
0x131e   : > { %11457 = vmatprep.mubr.msk.f32.mxu0 %vm1489_vm2, %v8873_v27 }
0x1320   : > { %v8842_v29 = vpop.trf.xlu0 }
0x1321   : > { %v8874_v12 = vpop.trf.xlu1  ;;  %11444 = vmatmul.mubr.msk.f32.gmra.mrb[52].mxu1 %vm1489_vm2, %v8842_v29 }
0x1322   : > { %11458 = vmatmul.mubr.msk.f32.gmra.mrb[52].mxu0 %vm1489_vm2, %v8874_v12 }
0x1324   : > { %v8843_v25 = vpop.trf.xlu0 }
0x1325   : > { %v8875_v34 = vpop.trf.xlu1  ;;  %11446 = vmatprep.mubr.msk.f32.mxu1 %vm1489_vm2, %v8843_v25 }
0x1326   : > { %11460 = vmatprep.mubr.msk.f32.mxu0 %vm1489_vm2, %v8875_v34 }
0x1328   : > { %v8844_v63 = vpop.trf.xlu0 }
0x1329   : > { %v8876_v19 = vpop.trf.xlu1  ;;  %11447 = vmatmul.mubr.msk.f32.gmra.mrb[54].mxu1 %vm1489_vm2, %v8844_v63 }
0x132a   : > { %11461 = vmatmul.mubr.msk.f32.gmra.mrb[54].mxu0 %vm1489_vm2, %v8876_v19 }
0x132c   : > { %v8901_v9 = vpop.trf.xlu0 }
0x132d   : > { %v8933_v51 = vpop.trf.xlu1  ;;  %11465 = vmatprep.mubr.msk.f32.mxu1 %vm1489_vm2, %v8901_v9 }
0x132e   : > { %11479 = vmatprep.mubr.msk.f32.mxu0 %vm1489_vm2, %v8933_v51 }
0x1330   : > { %v8902_v11 = vpop.trf.xlu0 }
0x1331   : > { %11466 = vmatmul.mubr.msk.f32.vlgmr.msra.gmra.mrb[56].mxu1 %vm1489_vm2, %v8902_v11  ;;  %v8934_v30 = vpop.trf.xlu1 }
0x1332   : > { %11480 = vmatmul.mubr.msk.f32.vlgmr.msra.gmra.mrb[56].mxu0 %vm1489_vm2, %v8934_v30  ;;  %11492 = vmatpush3.msk.msra.mxu1 %vm6066_vm6, %v9465_v22 }
0x1333   : > { %11506 = vmatpush3.msk.msra.mxu0 %vm6066_vm6, %v9466_v24  ;;  %11519 = vmatprep.subr.msk.mxu1 %vm6066_vm6, %v9467_v44 }
0x1334   : > { %v8903_v33 = vpop.trf.xlu0  ;;  %11533 = vmatprep.subr.msk.mxu0 %vm6066_vm6, %v9468_v7 }
0x1335   : > { %v8935_v46 = vpop.trf.xlu1  ;;  %11468 = vmatprep.mubr.msk.f32.mxu1 %vm1489_vm2, %v8903_v33 }
0x1336   : > { %11482 = vmatprep.mubr.msk.f32.mxu0 %vm1489_vm2, %v8935_v46 }
0x1338   : > { %v8904_v60 = vpop.trf.xlu0 }
0x1339   : > { %11469 = vmatmul.mubr.msk.f32.gmra.mrb[58].mxu1 %vm1489_vm2, %v8904_v60  ;;  %v8936_v59 = vpop.trf.xlu1 }
0x133a   : > { %11483 = vmatmul.mubr.msk.f32.gmra.mrb[58].mxu0 %vm1489_vm2, %v8936_v59 }
0x133c   : > { %v8905_v61 = vpop.trf.xlu0 }
0x133d   : > { %v8937_v41 = vpop.trf.xlu1  ;;  %11471 = vmatprep.mubr.msk.f32.mxu1 %vm1489_vm2, %v8905_v61 }
0x133e   : > { %11485 = vmatprep.mubr.msk.f32.mxu0 %vm1489_vm2, %v8937_v41 }
0x1340   : > { %v8906_v8 = vpop.trf.xlu0 }
0x1341   : > { %11472 = vmatmul.mubr.msk.f32.gmra.mrb[60].mxu1 %vm1489_vm2, %v8906_v8  ;;  %v8938_v6 = vpop.trf.xlu1 }
0x1342   : > { %11486 = vmatmul.mubr.msk.f32.gmra.mrb[60].mxu0 %vm1489_vm2, %v8938_v6 }
0x1344   : > { %v8907_v62 = vpop.trf.xlu0 }
0x1345   : > { %v8939_v58 = vpop.trf.xlu1  ;;  %11474 = vmatprep.mubr.msk.f32.mxu1 %vm1489_vm2, %v8907_v62 }
0x1346   : > { %11488 = vmatprep.mubr.msk.f32.mxu0 %vm1489_vm2, %v8939_v58 }
0x1348   : > { %v8908_v3 = vpop.trf.xlu0 }
0x1349   : > { %11475 = vmatmul.mubr.msk.f32.gmra.mrb[62].mxu1 %vm1489_vm2, %v8908_v3  ;;  %v8940_v40 = vpop.trf.xlu1 }
0x134a   : > { %11489 = vmatmul.mubr.msk.f32.gmra.mrb[62].mxu0 %vm1489_vm2, %v8940_v40 }
0x13e4   : > { %v11439_v18 = vpop.f32.mrb[48].mxu1 }
0x13e5   : > { %v11453_v2 = vpop.f32.mrb[48].mxu0  ;;  %v9039_v38 = vpop.f32.mrb[49].mxu1 }
0x13e6   : > { %v9168_v48 = vpop.f32.mrb[49].mxu0  ;;  %11493 = vmatprep.mubr.msk.f32.mxu1 %vm5329_vm3, %v9039_v38 }
0x13e7   : > { %11507 = vmatprep.mubr.msk.f32.mxu0 %vm5329_vm3, %v9168_v48  ;;  %11494 = vmatmul.mubr.msk.f32.vlgmr.msra.gmra.mrb[64].mxu1 %vm5329_vm3, %v11439_v18 }
0x13e8   : > { %11508 = vmatmul.mubr.msk.f32.vlgmr.msra.gmra.mrb[64].mxu0 %vm5329_vm3, %v11453_v2  ;;  %11520 = vmatpush3.msk.msra.mxu1 %vm6066_vm6, %v9467_v44 }
0x13e9   : > { %11534 = vmatpush3.msk.msra.mxu0 %vm6066_vm6, %v9468_v7 }
0x13ec   : > { %v11442_v39 = vpop.f32.mrb[50].mxu1 }
0x13ed   : > { %v11456_v23 = vpop.f32.mrb[50].mxu0  ;;  %v9049_v28 = vpop.f32.mrb[51].mxu1 }
0x13ee   : > { %v9178_v10 = vpop.f32.mrb[51].mxu0  ;;  %11496 = vmatprep.mubr.msk.f32.mxu1 %vm5329_vm3, %v9049_v28 }
0x13ef   : > { %11510 = vmatprep.mubr.msk.f32.mxu0 %vm5329_vm3, %v9178_v10  ;;  %11497 = vmatmul.mubr.msk.f32.gmra.mrb[66].mxu1 %vm5329_vm3, %v11442_v39 }
0x13f0   : > { %11511 = vmatmul.mubr.msk.f32.gmra.mrb[66].mxu0 %vm5329_vm3, %v11456_v23 }
0x13f4   : > { %v11445_v31 = vpop.f32.mrb[52].mxu1 }
0x13f5   : > { %v11459_v49 = vpop.f32.mrb[52].mxu0  ;;  %v9059_v47 = vpop.f32.mrb[53].mxu1 }
0x13f6   : > { %v9188_v17 = vpop.f32.mrb[53].mxu0  ;;  %11499 = vmatprep.mubr.msk.f32.mxu1 %vm5329_vm3, %v9059_v47 }
0x13f7   : > { %11513 = vmatprep.mubr.msk.f32.mxu0 %vm5329_vm3, %v9188_v17  ;;  %11500 = vmatmul.mubr.msk.f32.gmra.mrb[68].mxu1 %vm5329_vm3, %v11445_v31 }
0x13f8   : > { %11514 = vmatmul.mubr.msk.f32.gmra.mrb[68].mxu0 %vm5329_vm3, %v11459_v49 }
0x13fc   : > { %v11448_v52 = vpop.f32.mrb[54].mxu1 }
0x13fd   : > { %v11462_v21 = vpop.f32.mrb[54].mxu0  ;;  %v9069_v45 = vpop.f32.mrb[55].mxu1 }
0x13fe   : > { %v9198_v4 = vpop.f32.mrb[55].mxu0  ;;  %11502 = vmatprep.mubr.msk.f32.mxu1 %vm5329_vm3, %v9069_v45 }
0x13ff   : > { %11516 = vmatprep.mubr.msk.f32.mxu0 %vm5329_vm3, %v9198_v4  ;;  %11503 = vmatmul.mubr.msk.f32.gmra.mrb[70].mxu1 %vm5329_vm3, %v11448_v52 }
0x1400   : > { %11517 = vmatmul.mubr.msk.f32.gmra.mrb[70].mxu0 %vm5329_vm3, %v11462_v21 }
0x1404   : > { %v11467_v16 = vpop.f32.mrb[56].mxu1 }
0x1405   : > { %v9297_v15 = vpop.f32.mrb[57].mxu1  ;;  %v11481_v1 = vpop.f32.mrb[56].mxu0 }
0x1406   : > { %11521 = vmatprep.mubr.msk.f32.mxu1 %vm5329_vm3, %v9297_v15  ;;  %v9426_v32 = vpop.f32.mrb[57].mxu0 }
0x1407   : > { %11522 = vmatmul.mubr.msk.f32.vlgmr.msra.gmra.mrb[72].mxu1 %vm5329_vm3, %v11467_v16  ;;  %11535 = vmatprep.mubr.msk.f32.mxu0 %vm5329_vm3, %v9426_v32 }
0x1408   : > { %11536 = vmatmul.mubr.msk.f32.vlgmr.msra.gmra.mrb[72].mxu0 %vm5329_vm3, %v11481_v1  ;;  %v14245_v1 = vld [vmem:[%s14438_s19] ss:$0 sm:$0xff] }
0x140c   : > { %v11470_v13 = vpop.f32.mrb[58].mxu1 }
0x140d   : > { %v9307_v57 = vpop.f32.mrb[59].mxu1  ;;  %v11484_v50 = vpop.f32.mrb[58].mxu0 }
0x140e   : > { %11524 = vmatprep.mubr.msk.f32.mxu1 %vm5329_vm3, %v9307_v57  ;;  %v9436_v43 = vpop.f32.mrb[59].mxu0 }
0x140f   : > { %11525 = vmatmul.mubr.msk.f32.gmra.mrb[74].mxu1 %vm5329_vm3, %v11470_v13  ;;  %11538 = vmatprep.mubr.msk.f32.mxu0 %vm5329_vm3, %v9436_v43 }
0x1410   : > { %11539 = vmatmul.mubr.msk.f32.gmra.mrb[74].mxu0 %vm5329_vm3, %v11484_v50 }
0x1414   : > { %v11473_v36 = vpop.f32.mrb[60].mxu1 }
0x1415   : > { %v9317_v56 = vpop.f32.mrb[61].mxu1  ;;  %v11487_v26 = vpop.f32.mrb[60].mxu0 }
0x1416   : > { %11527 = vmatprep.mubr.msk.f32.mxu1 %vm5329_vm3, %v9317_v56  ;;  %v9446_v42 = vpop.f32.mrb[61].mxu0  ;;  %v11923_v56 = vld [vmem:[%s12438_s2 + $0x8] sm:$0xff] }
0x1417   : > { %11528 = vmatmul.mubr.msk.f32.gmra.mrb[76].mxu1 %vm5329_vm3, %v11473_v36  ;;  %11541 = vmatprep.mubr.msk.f32.mxu0 %vm5329_vm3, %v9446_v42 }
0x1418   : > { %11542 = vmatmul.mubr.msk.f32.gmra.mrb[76].mxu0 %vm5329_vm3, %v11487_v26 }
0x141c   : > { %v11476_v54 = vpop.f32.mrb[62].mxu1 }
0x141d   : > { %v9327_v0 = vpop.f32.mrb[63].mxu1  ;;  %v11490_v5 = vpop.f32.mrb[62].mxu0 }
0x141e   : > { %11530 = vmatprep.mubr.msk.f32.mxu1 %vm5329_vm3, %v9327_v0  ;;  %v9456_v20 = vpop.f32.mrb[63].mxu0 }
0x141f   : > { %11531 = vmatmul.mubr.msk.f32.gmra.mrb[78].mxu1 %vm5329_vm3, %v11476_v54  ;;  %11544 = vmatprep.mubr.msk.f32.mxu0 %vm5329_vm3, %v9456_v20 }
0x1420   : > { %11545 = vmatmul.mubr.msk.f32.gmra.mrb[78].mxu0 %vm5329_vm3, %v11490_v5  ;;  %v11924_v5 = vld [vmem:[%s12438_s2] sm:$0xff] }
0x14ba   : > { %v11495_v35 = vpop.f32.mrb[64].mxu1 }
0x14bb   : > { %v10004_v14 = vsel %vm808_vm1, %v11495_v35, 0.0  ;;  %v11509_v55 = vpop.f32.mrb[64].mxu0  ;;  %v9562_v53 = vpop.f32.mrb[65].mxu1 }
0x14bc   : > { %v10005_v27 = vsel %vm808_vm1, %v11509_v55, 0.0  ;;  %v9997_v29 = vsel %vm808_vm1, %v9562_v53, 0.0  ;;  %v9694_v12 = vpop.f32.mrb[65].mxu0 }
0x14bd   : > { %v10006_v25 = vadd.f32 %v10005_v27, %v10004_v14  ;;  %v9998_v34 = vsel %vm808_vm1, %v9694_v12, 0.0 }
0x14be   : > { %v9999_v63 = vadd.f32 %v9998_v34, %v9997_v29 }
0x14c2   : > { %v11498_v19 = vpop.f32.mrb[66].mxu1 }
0x14c3   : > { %v10018_v9 = vsel %vm808_vm1, %v11498_v19, 0.0  ;;  %v11512_v51 = vpop.f32.mrb[66].mxu0  ;;  %v9572_v11 = vpop.f32.mrb[67].mxu1 }
0x14c4   : > { %v10019_v30 = vsel %vm808_vm1, %v11512_v51, 0.0  ;;  %v10011_v33 = vsel %vm808_vm1, %v9572_v11, 0.0  ;;  %v9704_v46 = vpop.f32.mrb[67].mxu0  ;;  %v11925_v11 = vld [vmem:[%s12438_s2 + $0x18] sm:$0xff] }
0x14c5   : > { %v10020_v60 = vadd.f32 %v10019_v30, %v10018_v9  ;;  %v10012_v59 = vsel %vm808_vm1, %v9704_v46, 0.0 }
0x14c6   : > { %v10013_v61 = vadd.f32 %v10012_v59, %v10011_v33 }
0x14ca   : > { %v11501_v41 = vpop.f32.mrb[68].mxu1 }
0x14cb   : > { %v10032_v8 = vsel %vm808_vm1, %v11501_v41, 0.0  ;;  %v11515_v6 = vpop.f32.mrb[68].mxu0  ;;  %v9582_v62 = vpop.f32.mrb[69].mxu1 }
0x14cc   : > { %v10033_v58 = vsel %vm808_vm1, %v11515_v6, 0.0  ;;  %v10025_v3 = vsel %vm808_vm1, %v9582_v62, 0.0  ;;  %v9714_v40 = vpop.f32.mrb[69].mxu0  ;;  %v11926_v6 = vld [vmem:[%s12438_s2 + $0x10] sm:$0xff] }
0x14cd   : > { %v10034_v22 = vadd.f32 %v10033_v58, %v10032_v8  ;;  %v10026_v24 = vsel %vm808_vm1, %v9714_v40, 0.0 }
0x14ce   : > { %v10027_v44 = vadd.f32 %v10026_v24, %v10025_v3 }
0x14d2   : > { %v11504_v7 = vpop.f32.mrb[70].mxu1 }
0x14d3   : > { %v10046_v18 = vsel %vm808_vm1, %v11504_v7, 0.0  ;;  %v11518_v2 = vpop.f32.mrb[70].mxu0  ;;  %v9592_v38 = vpop.f32.mrb[71].mxu1 }
0x14d4   : > { %v10047_v48 = vsel %vm808_vm1, %v11518_v2, 0.0  ;;  %v10039_v39 = vsel %vm808_vm1, %v9592_v38, 0.0  ;;  %v9724_v23 = vpop.f32.mrb[71].mxu0 }
0x14d5   : > { %v14234_v28 = vadd.f32 %v10047_v48, %v10046_v18  ;;  %v10040_v10 = vsel %vm808_vm1, %v9724_v23, 0.0  ;;  %v11927_v48 = vld [vmem:[%s12438_s2 + $0x28] sm:$0xff] }
0x14d6   : > { %v14237_v31 = vadd.f32 %v10040_v10, %v10039_v39 }
0x14da   : > { %v11523_v49 = vpop.f32.mrb[72].mxu1 }
0x14db   : > { %v10007_v47 = vsel %vm808_vm1, %v11523_v49, 0.0  ;;  %v9826_v17 = vpop.f32.mrb[73].mxu1  ;;  %v11537_v52 = vpop.f32.mrb[72].mxu0  ;;  %v11928_v49 = vld [vmem:[%s12438_s2 + $0x20] sm:$0xff] }
0x14dc   : > { %v10008_v21 = vadd.f32 %v10007_v47, %v10006_v25  ;;  %v10000_v45 = vsel %vm808_vm1, %v9826_v17, 0.0  ;;  %v9958_v4 = vpop.f32.mrb[73].mxu0  ;;  %v10009_v15 = vsel %vm808_vm1, %v11537_v52, 0.0 }
0x14dd   : > { %v10001_v16 = vadd.f32 %v10000_v45, %v9999_v63  ;;  %v10002_v13 = vsel %vm808_vm1, %v9958_v4, 0.0 }
0x14de   : > { %v10010_v32 = vadd.f32 %v10009_v15, %v10008_v21 }
0x14df   : > { %v10003_v57 = vadd.f32 %v10002_v13, %v10001_v16 }
0x14e0   : > { %v10061_v50 = vadd.f32 %v14245_v1, %v10010_v32 }
0x14e1   : > { %v10060_v43 = vadd.f32 %v14245_v1, %v10003_v57 }
0x14e2   : > { %v11526_v36 = vpop.f32.mrb[74].mxu1  ;;  %v14251_v26 = vadd.f32 %v11923_v56, %v10061_v50  ;;  %v11930_v56 = vld [vmem:[%s12438_s2 + $0x30] sm:$0xff] }
0x14e3   : > { %v10021_v42 = vsel %vm808_vm1, %v11526_v36, 0.0  ;;  %v9836_v54 = vpop.f32.mrb[75].mxu1  ;;  %v11540_v0 = vpop.f32.mrb[74].mxu0  ;;  %v14255_v20 = vadd.f32 %v11924_v5, %v10060_v43  ;;  %v11929_v43 = vld [vmem:[%s12438_s2 + $0x38] sm:$0xff] }
0x14e4   : > { %v10022_v35 = vadd.f32 %v10021_v42, %v10020_v60  ;;  %v10014_v14 = vsel %vm808_vm1, %v9836_v54, 0.0  ;;  %v10079_v55 = vsel %vm808_vm1, %v14251_v26, 0.0  ;;  %v9968_v53 = vpop.f32.mrb[75].mxu0  ;;  %v10023_v29 = vsel %vm808_vm1, %v11540_v0, 0.0 }
0x14e5   : > { %v10015_v27 = vadd.f32 %v10014_v14, %v10013_v61  ;;  %10080 = vadd.xlane.f32.xlu1 %v10079_v55  ;;  %v10076_v12 = vsel %vm808_vm1, %v14255_v20, 0.0  ;;  %v10016_v34 = vsel %vm808_vm1, %v9968_v53, 0.0 }
0x14e6   : > { %v10024_v25 = vadd.f32 %v10023_v29, %v10022_v35  ;;  %10077 = vadd.xlane.f32.xlu0 %v10076_v12 }
0x14e7   : > { %v10017_v63 = vadd.f32 %v10016_v34, %v10015_v27 }
0x14e8   : > { %v10063_v19 = vadd.f32 %v14245_v1, %v10024_v25 }
0x14e9   : > { %v10062_v9 = vadd.f32 %v14245_v1, %v10017_v63 }
0x14ea   : > { %v11529_v51 = vpop.f32.mrb[76].mxu1  ;;  %v14267_v30 = vadd.f32 %v11925_v11, %v10063_v19 }
0x14eb   : > { %v10035_v33 = vsel %vm808_vm1, %v11529_v51, 0.0  ;;  %v9846_v46 = vpop.f32.mrb[77].mxu1  ;;  %v11543_v60 = vpop.f32.mrb[76].mxu0  ;;  %v10070_v62 = vadd.f32 %v11926_v6, %v10062_v9 }
0x14ec   : > { %v10036_v59 = vadd.f32 %v10035_v33, %v10034_v22  ;;  %v10028_v61 = vsel %vm808_vm1, %v9846_v46, 0.0  ;;  %v10085_v41 = vsel %vm808_vm1, %v14267_v30, 0.0  ;;  %v9978_v8 = vpop.f32.mrb[77].mxu0  ;;  %v10037_v3 = vsel %vm808_vm1, %v11543_v60, 0.0 }
0x14ed   : > { %v10029_v58 = vadd.f32 %v10028_v61, %v10027_v44  ;;  %10086 = vadd.xlane.f32.xlu0 %v10085_v41  ;;  %v10030_v24 = vsel %vm808_vm1, %v9978_v8, 0.0  ;;  %v10082_v18 = vsel %vm808_vm1, %v10070_v62, 0.0 }
0x14ee   : > { %v10038_v40 = vadd.f32 %v10037_v3, %v10036_v59 }
0x14ef   : > { %v10031_v7 = vadd.f32 %v10030_v24, %v10029_v58 }
0x14f0   : > { %v10065_v22 = vadd.f32 %v14245_v1, %v10038_v40 }
0x14f1   : > { %v10064_v2 = vadd.f32 %v14245_v1, %v10031_v7  ;;  %10083 = vadd.xlane.f32.xlu0 %v10082_v18 }
0x14f2   : > { %v11532_v38 = vpop.f32.mrb[78].mxu1  ;;  %v10073_v39 = vadd.f32 %v11927_v48, %v10065_v22 }
0x14f3   : > { %v10049_v44 = vsel %vm808_vm1, %v11532_v38, 0.0  ;;  %v9856_v23 = vpop.f32.mrb[79].mxu1  ;;  %v11546_v10 = vpop.f32.mrb[78].mxu0  ;;  %v10072_v47 = vadd.f32 %v11928_v49, %v10064_v2 }
0x14f4   : > { %v10050_v17 = vadd.f32 %v10049_v44, %v14234_v28  ;;  %v10042_v52 = vsel %vm808_vm1, %v9856_v23, 0.0  ;;  %v10091_v21 = vsel %vm808_vm1, %v10073_v39, 0.0  ;;  %v9988_v45 = vpop.f32.mrb[79].mxu0  ;;  %v10051_v16 = vsel %vm808_vm1, %v11546_v10, 0.0 }
0x14f5   : > { %v10043_v4 = vadd.f32 %v10042_v52, %v14237_v31  ;;  %10092 = vadd.xlane.f32.xlu0 %v10091_v21  ;;  %v10088_v15 = vsel %vm808_vm1, %v10072_v47, 0.0  ;;  %v10044_v13 = vsel %vm808_vm1, %v9988_v45, 0.0 }
0x14f6   : > { %v10052_v32 = vadd.f32 %v10051_v16, %v10050_v17  ;;  %10089 = vadd.xlane.f32.xlu1 %v10088_v15 }
0x14f7   : > { %v10045_v57 = vadd.f32 %v10044_v13, %v10043_v4 }
0x14f8   : > { %v10067_v28 = vadd.f32 %v14245_v1, %v10052_v32 }
0x14f9   : > { %v10066_v50 = vadd.f32 %v14245_v1, %v10045_v57 }
0x14fa   : > { %v10075_v36 = vadd.f32 %v11929_v43, %v10067_v28 }
0x14fb   : > { %v10074_v42 = vadd.f32 %v11930_v56, %v10066_v50 }
0x14fc   : > { %v10097_v31 = vsel %vm808_vm1, %v10075_v36, 0.0 }
0x14fd   : > { %10098 = vadd.xlane.f32.xlu0 %v10097_v31  ;;  %v10094_v54 = vsel %vm808_vm1, %v10074_v42, 0.0 }
0x14fe   : > { %10095 = vadd.xlane.f32.xlu1 %v10094_v54 }
0x1572   : > { %v10081_v0 = vpop.xlane.xlu1 %10080 }
0x1573   : > { %v10101_v5 = vmul.f32 0.03125, %v10081_v0  ;;  %v10078_v35 = vpop.xlane.xlu0 %10077 }
0x1574   : > { %v10100_v14 = vmul.f32 0.03125, %v10078_v35 }
0x1575   : > { %v14296_v55 = vsub.f32 %v14251_v26, %v10101_v5 }
0x1576   : > { %v14299_v53 = vsub.f32 %v14255_v20, %v10100_v14 }
0x1577   : > { %v10117_v1 = vmul.f32 %v14296_v55, %v14296_v55 }
0x1578   : > { %v10116_v27 = vmul.f32 %v14299_v53, %v14299_v53 }
0x1579   : > { %v10127_v29 = vsel %vm808_vm1, %v10117_v1, 0.0 }
0x157a   : > { %v10087_v12 = vpop.xlane.xlu0 %10086  ;;  %10128 = vadd.xlane.f32.xlu0 %v10127_v29  ;;  %v10124_v25 = vsel %vm808_vm1, %v10116_v27, 0.0 }
0x157b   : > { %v10103_v34 = vmul.f32 0.03125, %v10087_v12  ;;  %10125 = vadd.xlane.f32.xlu1 %v10124_v25 }
0x157d   : > { %v14308_v26 = vsub.f32 %v14267_v30, %v10103_v34 }
0x157e   : > { %v10084_v63 = vpop.xlane.xlu0 %10083 }
0x157f   : > { %v10102_v20 = vmul.f32 0.03125, %v10084_v63  ;;  %v10119_v19 = vmul.f32 %v14308_v26, %v14308_v26 }
0x1581   : > { %v14312_v9 = vsub.f32 %v10070_v62, %v10102_v20  ;;  %v10133_v51 = vsel %vm808_vm1, %v10119_v19, 0.0 }
0x1582   : > { %v10093_v11 = vpop.xlane.xlu0 %10092  ;;  %10134 = vadd.xlane.f32.xlu0 %v10133_v51 }
0x1583   : > { %v10105_v33 = vmul.f32 0.03125, %v10093_v11  ;;  %v10090_v46 = vpop.xlane.xlu1 %10089  ;;  %v10118_v60 = vmul.f32 %v14312_v9, %v14312_v9 }
0x1584   : > { %v10104_v59 = vmul.f32 0.03125, %v10090_v46 }
0x1585   : > { %v14317_v61 = vsub.f32 %v10073_v39, %v10105_v33  ;;  %v10130_v30 = vsel %vm808_vm1, %v10118_v60, 0.0 }
0x1586   : > { %v14320_v41 = vsub.f32 %v10072_v47, %v10104_v59  ;;  %10131 = vadd.xlane.f32.xlu1 %v10130_v30 }
0x1587   : > { %v10121_v8 = vmul.f32 %v14317_v61, %v14317_v61 }
0x1588   : > { %v10120_v6 = vmul.f32 %v14320_v41, %v14320_v41 }
0x1589   : > { %v10139_v62 = vsel %vm808_vm1, %v10121_v8, 0.0 }
0x158a   : > { %10140 = vadd.xlane.f32.xlu0 %v10139_v62  ;;  %v10099_v58 = vpop.xlane.xlu0 %10098  ;;  %v10136_v3 = vsel %vm808_vm1, %v10120_v6, 0.0 }
0x158b   : > { %v10107_v40 = vmul.f32 0.03125, %v10099_v58  ;;  %10137 = vadd.xlane.f32.xlu1 %v10136_v3  ;;  %v10096_v24 = vpop.xlane.xlu1 %10095 }
0x158c   : > { %v10106_v7 = vmul.f32 0.03125, %v10096_v24 }
0x158d   : > { %v14328_v22 = vsub.f32 %v10075_v36, %v10107_v40 }
0x158e   : > { %v14330_v18 = vsub.f32 %v10074_v42, %v10106_v7 }
0x158f   : > { %v10123_v2 = vmul.f32 %v14328_v22, %v14328_v22 }
0x1590   : > { %v10122_v38 = vmul.f32 %v14330_v18, %v14330_v18 }
0x1591   : > { %v10145_v48 = vsel %vm808_vm1, %v10123_v2, 0.0 }
0x1592   : > { %10146 = vadd.xlane.f32.xlu0 %v10145_v48  ;;  %v10142_v39 = vsel %vm808_vm1, %v10122_v38, 0.0 }
0x1593   : > { %10143 = vadd.xlane.f32.xlu1 %v10142_v39 }
0x1594   : > { %11946 = shalt.err (!%p11943_p3)
}
0x1595   : > { %s11947_s5 = scalar_lea.hbm %s14342_s22, 128  ;;  %s11951_s3 = scalar_lea.hbm %s14499_s29, 256 }
0x1596   : > { %p11948_p4 = scmp.ne.s32.totalorder %s14342_s22, %s11947_s5  ;;  %p11952_p9 = scmp.lt.u32.totalorder %s14342_s22, %s14499_s29 }
0x1597   : > { %p11953_p10 = scmp.lt.u32.totalorder %s11951_s3, %s11947_s5  ;;  %p11955_p12 = scmp.lt.u32.totalorder %s11947_s5, %s14342_s22 }
0x1598   : > { %p11949_p7 = pnand %p11948_p4, %p12166_p5 }
0x1599   : > { %p11954_p11 = por %p11953_p10, %p11952_p9 }
0x159a   : > { %p11950_p8 = pneg %p11949_p7 }
0x159b   : > { %p11956_p13 = por %p11955_p12, %p11954_p11 }
0x159d   : > { %p11957_p0 = pnand %p11956_p13, %p11950_p8 }
0x159f   : > { %11960 = shalt.err (!%p11957_p0)
}
0x15a0   : > { %11801 = dma.vmem_to_hbm [thread:$0]  (%p12166_p5), %s10233_s24, 128, %s14342_s22, %s10214_s25   ;;  %v10182_v45 = vsub.s32 3, %v12266_v37  ;;  %v11931_v32 = vld [vmem:[%s14439_s20] sm:$0xf] }
0x15a1   : > { %v11932_v43 = vld [vmem:[%s14440_s21] sm:$0xf]  ;;  %s14500_s4 = sld [smem:[#allocation22_spill]] }
0x15a2   : > { %v10183_v13 = vrot.slane %v11931_v32, %v10182_v45  ;;  %v10195_v36 = vrot.slane %v11932_v43, %v10182_v45 }
0x15a7   : > { %s14378_s0 = scalar_lea.vmem %s14500_s4, %s12432_s7 }
0x1607   : > { %v10129_v44 = vpop.xlane.xlu0 %10128 }
0x1608   : > { %v10149_v23 = vmul.f32 0.03125, %v10129_v44  ;;  %v10126_v10 = vpop.xlane.xlu1 %10125 }
0x1609   : > { %v10148_v49 = vmul.f32 0.03125, %v10126_v10 }
0x160a   : > { %v10157_v47 = vadd.f32 1e-05, %v10149_v23 }
0x160b   : > { %v10156_v17 = vadd.f32 1e-05, %v10148_v49 }
0x160c   : > { %11904 = vrsqrt.f32 %v10157_v47 }
0x160d   : > { %11906 = vrsqrt.f32 %v10156_v17 }
0x160f   : > { %v10135_v52 = vpop.xlane.xlu0 %10134 }
0x1610   : > { %v10151_v21 = vmul.f32 0.03125, %v10135_v52 }
0x1612   : > { %v10159_v4 = vadd.f32 1e-05, %v10151_v21 }
0x1613   : > { %v10132_v16 = vpop.xlane.xlu1 %10131 }
0x1614   : > { %11908 = vrsqrt.f32 %v10159_v4  ;;  %v10150_v15 = vmul.f32 0.03125, %v10132_v16 }
0x1616   : > { %v11905_v57 = vpop.eup %11904  ;;  %v10158_v28 = vadd.f32 1e-05, %v10150_v15 }
0x1617   : > { %v11907_v50 = vpop.eup %11906  ;;  %v10173_v37 = vmul.f32 %v11905_v57, %v14296_v55  ;;  %v10141_v56 = vpop.xlane.xlu0 %10140 }
0x1618   : > { %v10172_v42 = vmul.f32 %v11907_v50, %v14299_v53  ;;  %11910 = vrsqrt.f32 %v10158_v28  ;;  %v10153_v31 = vmul.f32 0.03125, %v10141_v56  ;;  %v10138_v54 = vpop.xlane.xlu1 %10137 }
0x1619   : > { %v10185_v0 = vmul.f32 %v10183_v13, %v10173_v37  ;;  %v10152_v5 = vmul.f32 0.03125, %v10138_v54 }
0x161a   : > { %v10184_v35 = vmul.f32 %v10183_v13, %v10172_v42  ;;  %v10161_v14 = vadd.f32 1e-05, %v10153_v31 }
0x161b   : > { %v10197_v1 = vadd.f32 %v10195_v36, %v10185_v0  ;;  %v10160_v27 = vadd.f32 1e-05, %v10152_v5 }
0x161c   : > { %v10196_v55 = vadd.f32 %v10195_v36, %v10184_v35  ;;  %11912 = vrsqrt.f32 %v10161_v14 }
0x161d   : > { %10206 = vst.msk [vmem:[%s14378_s0 + $0x8] sm:$0xff] %vm808_vm1, %v10197_v1  ;;  %11914 = vrsqrt.f32 %v10160_v27 }
0x161e   : > { %v11909_v53 = vpop.eup %11908  ;;  %10205 = vst.msk [vmem:[%s14378_s0] sm:$0xff] %vm808_vm1, %v10196_v55 }
0x161f   : > { %v10175_v29 = vmul.f32 %v11909_v53, %v14308_v26  ;;  %v10147_v12 = vpop.xlane.xlu0 %10146 }
0x1620   : > { %v10155_v25 = vmul.f32 0.03125, %v10147_v12  ;;  %v10144_v34 = vpop.xlane.xlu1 %10143 }
0x1621   : > { %v10187_v63 = vmul.f32 %v10183_v13, %v10175_v29  ;;  %v10154_v20 = vmul.f32 0.03125, %v10144_v34 }
0x1622   : > { %v11911_v19 = vpop.eup %11910  ;;  %v10163_v51 = vadd.f32 1e-05, %v10155_v25 }
0x1623   : > { %v10199_v11 = vadd.f32 %v10195_v36, %v10187_v63  ;;  %v10174_v33 = vmul.f32 %v11911_v19, %v14312_v9  ;;  %v10162_v46 = vadd.f32 1e-05, %v10154_v20 }
0x1624   : > { %11916 = vrsqrt.f32 %v10163_v51 }
0x1625   : > { %10208 = vst.msk [vmem:[%s14378_s0 + $0x18] sm:$0xff] %vm808_vm1, %v10199_v11  ;;  %v10186_v60 = vmul.f32 %v10183_v13, %v10174_v33  ;;  %11918 = vrsqrt.f32 %v10162_v46 }
0x1626   : > { %v11913_v26 = vpop.eup %11912 }
0x1627   : > { %v11915_v59 = vpop.eup %11914  ;;  %v10198_v30 = vadd.f32 %v10195_v36, %v10186_v60  ;;  %v10177_v8 = vmul.f32 %v11913_v26, %v14317_v61 }
0x1628   : > { %v10176_v6 = vmul.f32 %v11915_v59, %v14320_v41 }
0x1629   : > { %10207 = vst.msk [vmem:[%s14378_s0 + $0x10] sm:$0xff] %vm808_vm1, %v10198_v30  ;;  %v10189_v9 = vmul.f32 %v10183_v13, %v10177_v8 }
0x162a   : > { %v10188_v62 = vmul.f32 %v10183_v13, %v10176_v6 }
0x162b   : > { %v10201_v58 = vadd.f32 %v10195_v36, %v10189_v9 }
0x162c   : > { %v10200_v3 = vadd.f32 %v10195_v36, %v10188_v62 }
0x162d   : > { %10210 = vst.msk [vmem:[%s14378_s0 + $0x28] sm:$0xff] %vm808_vm1, %v10201_v58 }
0x162e   : > { %v11917_v40 = vpop.eup %11916  ;;  %10209 = vst.msk [vmem:[%s14378_s0 + $0x20] sm:$0xff] %vm808_vm1, %v10200_v3 }
0x162f   : > { %v11919_v24 = vpop.eup %11918  ;;  %v10179_v7 = vmul.f32 %v11917_v40, %v14328_v22 }
0x1630   : > { %v10178_v61 = vmul.f32 %v11919_v24, %v14330_v18 }
0x1631   : > { %v10191_v2 = vmul.f32 %v10183_v13, %v10179_v7 }
0x1632   : > { %v10190_v41 = vmul.f32 %v10183_v13, %v10178_v61 }
0x1633   : > { %v10203_v38 = vadd.f32 %v10195_v36, %v10191_v2 }
0x1634   : > { %v10202_v48 = vadd.f32 %v10195_v36, %v10190_v41 }
0x1635   : > { %10212 = vst.msk [vmem:[%s14378_s0 + $0x38] sm:$0xff] %vm808_vm1, %v10203_v38 }
0x1636   : > { %10211 = vst.msk [vmem:[%s14378_s0 + $0x30] sm:$0xff] %vm808_vm1, %v10202_v48 }
0x1637 PF: > { %s14501_s7 = sld [smem:[#allocation7_spill]]  ;;  %s14502_s1 = sld [smem:[#allocation5_spill]] }
0x163d   : > { %p11807_p5 = scmp.ge.s32.totalorder %s14501_s7, 2  ;;  %s10247_s8 = sand.u32 1, %s14502_s1  }
0x163e   : > { %s10248_s28 = scalar_lea.sflag [#allocation3], %s10247_s8 }
0x163f   : > { %p11804_p1 = pnand %p11807_p5, %p12170_p6 }
0x1641   : > { %11978 = dma.done.wait (!%p11804_p1), %s10248_s28, 128  }
0x1642   : > { %11980 = vsyncadd (!%p11804_p1), %s10248_s28, 4294967168  ;;  %s14504_s25 = sld [smem:[#allocation8_spill]]  ;;  %s14505_s3 = sld [smem:[#allocation6_spill]] }
0x1643   : > { %s14506_s24 = sld [smem:[#allocation9_spill]]  ;;  %s14507_s4 = smov %s11987_s30 }
0x1648   : > { %p34_p2 = scmp.ge.s32.totalorder %s14504_s25, 4   ;;  %s14508_s30 = smov %s14505_s3 }
0x164a   :  { %36 = sbr.rel (!%p34_p2) target bundleno = 15 (0xf), region = 176 }
0x1651   :  { %10261 = vsyncpa [#allocation3], 1 }
0x1652   :  { %10263 = vsyncpa [#allocation3 + $0x1], 1 }

</bundles_post_ra>
